<compile_context>
chip_gen: v6e
topology: v6e:2x2x1
jax: 0.10.0
libtpu: 0.0.40
codegen_flags: <defaults>
</compile_context>

<pallas_src>
import functools
import math

import jax
import jax.numpy as jnp
from jax.experimental import pallas as pl
from jax.experimental.pallas import tpu as pltpu

BN_EPS = 1e-5
K_TAPS = 3

# logical / sublane-padded channel counts
C_IN, C1, C2 = 17, 50, 70
C_IN_P, C1_P, C2_P = 24, 56, 72


def _cdiv(a, b):
    return -(-a // b)


def _plan(L):
    """Static length bookkeeping for the polyphase pipeline (all Python ints)."""
    V1 = L - 2          # conv1 valid length
    L1 = V1 // 2        # after pool1
    V2 = L1 - 2
    L2 = V2 // 2
    V3 = L2 - 2
    L3 = V3 // 2
    assert L3 >= 1, "input length too small for the conv/pool stack"
    # columns per phase at each stage; each conv reads columns t and t+1 of its
    # input phases, hence the +1 chaining back through the stages.
    T3 = max(_cdiv(V3, 2), 1)
    T2 = max(_cdiv(V2, 4), T3 + 1)
    T1 = max(_cdiv(V1, 8), T2 + 1)
    T0 = max(_cdiv(L, 8), T1 + 1)
    return dict(V1=V1, V2=V2, V3=V3, L1=L1, L2=L2, L3=L3,
                T0=T0, T1=T1, T2=T2, T3=T3)


# ---------------- in-kernel building block (traced inside the Pallas kernel) ----


def _conv_bn_relu_pool(get_tap, w_ref, g_ref, b_ref, rhs_ref, *,
                       p_in, cin_p, t_out, n, v_out, pooled_dtype):
    """One Conv1d(k=3) -> BN(train) -> ReLU -> MaxPool(2) block, polyphase form.

    get_tap(src_phase, off, blk) -> bf16 value (cin_p, blk): columns
        [off*n, off*n+blk) of input phase `src_phase` (t-major, batch-minor).
    rhs_ref : bf16 scratch (3*cin_p, p_in*t_out*n) im2col slab.
    Returns p_in//2 pooled phase slabs, each (cout_p, t_out*n) in pooled_dtype.
    """
    blk = t_out * n

    # --- im2col staging: one lane-dense bf16 slab covering ALL phases/taps.
    for p in range(p_in):
        for k in range(K_TAPS):
            src_p = (p + k) % p_in
            off = (p + k) // p_in                  # 0 or 1: shifted slice only
            rhs_ref[k * cin_p:(k + 1) * cin_p, p * blk:(p + 1) * blk] = \
                get_tap(src_p, off, blk)
        # Zero the padded (invalid) output columns of this phase so the conv
        # output there is exactly 0 -> BN statistics need no masking at all.
        vp = _cdiv(v_out - p, p_in) if v_out > p else 0
        if vp < t_out:
            rhs_ref[:, p * blk + vp * n:(p + 1) * blk] = jnp.zeros(
                (K_TAPS * cin_p, (t_out - vp) * n), jnp.bfloat16)

    # --- conv: ONE bf16 MXU contraction per stage, f32 accumulation.
    y = jnp.dot(w_ref[...], rhs_ref[...],
                preferred_element_type=jnp.float32)   # (cout_p, p_in*blk) f32

    # --- BatchNorm (training mode): 2 cross-lane reductions per stage.
    #     Invalid columns are exactly 0 so they contribute nothing; divide by
    #     the true element count (a Python constant).
    inv_cnt = 1.0 / float(n * v_out)
    mean = jnp.sum(y, axis=1, keepdims=True) * inv_cnt
    var = jnp.maximum(
        jnp.sum(y * y, axis=1, keepdims=True) * inv_cnt - mean * mean, 0.0)
    scale = g_ref[...] * jax.lax.rsqrt(var + BN_EPS)   # BN folded to scale+shift
    shift = b_ref[...] - mean * scale
    z = y * scale + shift

    # --- ReLU + MaxPool(2): elementwise max between adjacent phase blocks
    #     (pure VPU); downcast the inter-stage activations.
    pooled = []
    for q in range(p_in // 2):
        z0 = z[:, (2 * q) * blk:(2 * q + 1) * blk]
        z1 = z[:, (2 * q + 1) * blk:(2 * q + 2) * blk]
        pooled.append(jnp.maximum(jnp.maximum(z0, z1), 0.0).astype(pooled_dtype))
    return pooled


# ---------------- Pallas kernel ----------------


def cnn_kernel(plan, n_batch,
               x_ref,
               w1_ref, g1_ref, b1_ref,
               w2_ref, g2_ref, b2_ref,
               w3_ref, g3_ref, b3_ref,
               out_ref,
               rhs1_ref, rhs2_ref, rhs3_ref):
    N = n_batch

    # Stage 1: read input phases lazily straight from the ref (no full-slab
    # materialization).
    def tap1(p, off, blk):
        return x_ref[p, :, off * N: off * N + blk]

    ph1 = _conv_bn_relu_pool(tap1, w1_ref, g1_ref, b1_ref, rhs1_ref,
                             p_in=8, cin_p=C_IN_P, t_out=plan["T1"], n=N,
                             v_out=plan["V1"], pooled_dtype=jnp.bfloat16)

    def tap2(p, off, blk):
        return ph1[p][:, off * N: off * N + blk]

    ph2 = _conv_bn_relu_pool(tap2, w2_ref, g2_ref, b2_ref, rhs2_ref,
                             p_in=4, cin_p=C1_P, t_out=plan["T2"], n=N,
                             v_out=plan["V2"], pooled_dtype=jnp.bfloat16)

    def tap3(p, off, blk):
        return ph2[p][:, off * N: off * N + blk]

    ph3 = _conv_bn_relu_pool(tap3, w3_ref, g3_ref, b3_ref, rhs3_ref,
                             p_in=2, cin_p=C2_P, t_out=plan["T3"], n=N,
                             v_out=plan["V3"], pooled_dtype=jnp.float32)

    out_ref[...] = ph3[0]                           # (C2_P, T3*N) lane-dense


# ---------------- wrapper (plain-JAX glue: padding, phase split, weight prep) ---


def _pad_weight_im2col(w, cin_p, cout_p):
    """(Cout, Cin, 3) -> zero-padded tap-major (cout_p, 3*cin_p) bf16."""
    cout, cin, k = w.shape
    wp = jnp.zeros((cout_p, cin_p, k), jnp.float32).at[:cout, :cin, :].set(w)
    return jnp.transpose(wp, (0, 2, 1)).reshape(cout_p, k * cin_p).astype(jnp.bfloat16)


def _pad_affine(v, c_p):
    c = v.shape[0]
    return jnp.zeros((c_p, 1), jnp.float32).at[:c, :].set(v.reshape(c, 1))


def _phase_split(x, t0):
    """(N, 17, L) -> bf16 (8, C_IN_P, T0*N) with slab[p, c, t*N+n] = x[n, c, 8t+p]."""
    n, c, L = x.shape
    xp = jnp.zeros((n, C_IN_P, 8 * t0), jnp.float32).at[:, :c, :L].set(x)
    xp = xp.reshape(n, C_IN_P, t0, 8)
    xp = jnp.transpose(xp, (3, 1, 2, 0))            # (8, C_IN_P, T0, N)
    return xp.reshape(8, C_IN_P, t0 * n).astype(jnp.bfloat16)


def _vmem_limit_bytes():
    """Per-generation VMEM budget with headroom (64 MiB on v7x, 128 on v5e/v6e)."""
    try:
        cap = int(pltpu.get_tpu_info().vmem_capacity_bytes)
    except Exception:
        cap = 64 * 1024 * 1024
    return int(min(cap - 16 * 1024 * 1024, 100 * 1024 * 1024))


def cnn_forward(x, params):
    """x: (N, 17, L) float32. Returns (N, 70 * L_final), like out.view(N, -1)."""
    (w1, _b1, g1, be1, w2, _b2, g2, be2, w3, _b3, g3, be3) = params
    n, c, L = x.shape
    assert c == C_IN
    plan = _plan(L)

    # NOTE: conv biases b1/b2/b3 cancel exactly under training-mode BatchNorm
    # (a per-channel constant is removed by the mean subtraction), so they are
    # intentionally not sent to the kernel.
    args = (
        _phase_split(x.astype(jnp.float32), plan["T0"]),
        _pad_weight_im2col(w1, C_IN_P, C1_P), _pad_affine(g1, C1_P), _pad_affine(be1, C1_P),
        _pad_weight_im2col(w2, C1_P, C2_P), _pad_affine(g2, C2_P), _pad_affine(be2, C2_P),
        _pad_weight_im2col(w3, C2_P, C2_P), _pad_affine(g3, C2_P), _pad_affine(be3, C2_P),
    )
    vmem = pl.BlockSpec(memory_space=pltpu.MemorySpace.VMEM)

    out = pl.pallas_call(
        functools.partial(cnn_kernel, plan, n),
        out_shape=jax.ShapeDtypeStruct((C2_P, plan["T3"] * n), jnp.float32),
        in_specs=[vmem] * len(args),
        out_specs=vmem,
        scratch_shapes=[
            pltpu.VMEM((K_TAPS * C_IN_P, 8 * plan["T1"] * n), jnp.bfloat16),
            pltpu.VMEM((K_TAPS * C1_P, 4 * plan["T2"] * n), jnp.bfloat16),
            pltpu.VMEM((K_TAPS * C2_P, 2 * plan["T3"] * n), jnp.bfloat16),
        ],
        compiler_params=pltpu.CompilerParams(vmem_limit_bytes=_vmem_limit_bytes()),
    )(*args)

    # (C2_P, T3*N) -> strip channel/length padding -> (N, 70, L3) -> (N, -1)
    out = out.reshape(C2_P, plan["T3"], n)[:C2, :plan["L3"], :]
    return jnp.transpose(out, (2, 0, 1)).reshape(n, -1)


# ---------------- deterministic parameter init (PyTorch-like uniform bounds) -----


def init_params(key):
    def conv_init(k, cout, cin, ksize):
        k_w, k_b = jax.random.split(k)
        bound = 1.0 / math.sqrt(cin * ksize)
        w = jax.random.uniform(k_w, (cout, cin, ksize), jnp.float32, -bound, bound)
        b = jax.random.uniform(k_b, (cout, 1), jnp.float32, -bound, bound)
        return w, b

    k1, k2, k3 = jax.random.split(key, 3)
    w1, b1 = conv_init(k1, 50, 17, 3)
    w2, b2 = conv_init(k2, 70, 50, 3)
    w3, b3 = conv_init(k3, 70, 70, 3)

    # BatchNorm affine params at PyTorch defaults: gamma=1, beta=0
    g1, be1 = jnp.ones((50, 1), jnp.float32), jnp.zeros((50, 1), jnp.float32)
    g2, be2 = jnp.ones((70, 1), jnp.float32), jnp.zeros((70, 1), jnp.float32)
    g3, be3 = jnp.ones((70, 1), jnp.float32), jnp.zeros((70, 1), jnp.float32)

    return (w1, b1, g1, be1, w2, b2, g2, be2, w3, b3, g3, be3)


if __name__ == "__main__":
    key = jax.random.PRNGKey(0)
    k_params, k_x = jax.random.split(key)

    params = init_params(k_params)

    # small but valid input: N=2, C=17, L=32 -> conv/pool stack -> (2, 70, 2) -> (2, 140)
    x = jax.random.normal(k_x, (2, 17, 32), dtype=jnp.float32)

    out = cnn_forward(x, params)
    out = jax.block_until_ready(out)

    assert out.shape == (2, 140), out.shape
    assert bool(jnp.all(jnp.isfinite(out)))
    print("KERNEL_OK")
</pallas_src>

<mosaic_0001>
module attributes {stable_mosaic.version = 11 : i64} {
  func.func @cnn_kernel(%arg0: memref<8x24x12xbf16, #tpu.memory_space<vmem>>, %arg1: memref<56x72xbf16, #tpu.memory_space<vmem>>, %arg2: memref<56x1xf32, #tpu.memory_space<vmem>>, %arg3: memref<56x1xf32, #tpu.memory_space<vmem>>, %arg4: memref<72x168xbf16, #tpu.memory_space<vmem>>, %arg5: memref<72x1xf32, #tpu.memory_space<vmem>>, %arg6: memref<72x1xf32, #tpu.memory_space<vmem>>, %arg7: memref<72x216xbf16, #tpu.memory_space<vmem>>, %arg8: memref<72x1xf32, #tpu.memory_space<vmem>>, %arg9: memref<72x1xf32, #tpu.memory_space<vmem>>, %arg10: memref<72x4xf32, #tpu.memory_space<vmem>>, %arg11: memref<72x80xbf16, #tpu.memory_space<vmem>>, %arg12: memref<168x32xbf16, #tpu.memory_space<vmem>>, %arg13: memref<216x8xbf16, #tpu.memory_space<vmem>>) attributes {dimension_semantics = [], scalar_prefetch = 0 : i64, scratch_operands = 3 : i64, tpu.core_type = #tpu.core_type<tc>} {
    %c0 = arith.constant 0 : index
    %c0_0 = arith.constant 0 : index
    %c0_1 = arith.constant 0 : index
    %0 = vector.load %arg0[%c0, %c0_0, %c0_1] : memref<8x24x12xbf16, #tpu.memory_space<vmem>>, vector<1x24x10xbf16>
    %1 = vector.shape_cast %0 : vector<1x24x10xbf16> to vector<24x10xbf16>
    %c0_2 = arith.constant 0 : index
    %c0_3 = arith.constant 0 : index
    %2 = vector.load %arg11[%c0_2, %c0_3] : memref<72x80xbf16, #tpu.memory_space<vmem>>, vector<24x10xbf16>
    tpu.vector_store %arg11[%c0_2, %c0_3], %1 {strides = array<i32>} : memref<72x80xbf16, #tpu.memory_space<vmem>>, vector<24x10xbf16>,
    %c1 = arith.constant 1 : index
    %c0_4 = arith.constant 0 : index
    %c0_5 = arith.constant 0 : index
    %3 = vector.load %arg0[%c1, %c0_4, %c0_5] : memref<8x24x12xbf16, #tpu.memory_space<vmem>>, vector<1x24x10xbf16>
    %4 = vector.shape_cast %3 : vector<1x24x10xbf16> to vector<24x10xbf16>
    %c24 = arith.constant 24 : index
    %c0_6 = arith.constant 0 : index
    %5 = vector.load %arg11[%c24, %c0_6] : memref<72x80xbf16, #tpu.memory_space<vmem>>, vector<24x10xbf16>
    tpu.vector_store %arg11[%c24, %c0_6], %4 {strides = array<i32>} : memref<72x80xbf16, #tpu.memory_space<vmem>>, vector<24x10xbf16>,
    %c2 = arith.constant 2 : index
    %c0_7 = arith.constant 0 : index
    %c0_8 = arith.constant 0 : index
    %6 = vector.load %arg0[%c2, %c0_7, %c0_8] : memref<8x24x12xbf16, #tpu.memory_space<vmem>>, vector<1x24x10xbf16>
    %7 = vector.shape_cast %6 : vector<1x24x10xbf16> to vector<24x10xbf16>
    %c48 = arith.constant 48 : index
    %c0_9 = arith.constant 0 : index
    %8 = vector.load %arg11[%c48, %c0_9] : memref<72x80xbf16, #tpu.memory_space<vmem>>, vector<24x10xbf16>
    tpu.vector_store %arg11[%c48, %c0_9], %7 {strides = array<i32>} : memref<72x80xbf16, #tpu.memory_space<vmem>>, vector<24x10xbf16>,
    %cst = arith.constant 0.000000e+00 : bf16
    %9 = vector.broadcast %cst : bf16 to vector<72x2xbf16>
    %c0_10 = arith.constant 0 : index
    %c8 = arith.constant 8 : index
    %10 = vector.load %arg11[%c0_10, %c8] : memref<72x80xbf16, #tpu.memory_space<vmem>>, vector<72x2xbf16>
    tpu.vector_store %arg11[%c0_10, %c8], %9 {strides = array<i32>} : memref<72x80xbf16, #tpu.memory_space<vmem>>, vector<72x2xbf16>,
    %c1_11 = arith.constant 1 : index
    %c0_12 = arith.constant 0 : index
    %c0_13 = arith.constant 0 : index
    %11 = vector.load %arg0[%c1_11, %c0_12, %c0_13] : memref<8x24x12xbf16, #tpu.memory_space<vmem>>, vector<1x24x10xbf16>
    %12 = vector.shape_cast %11 : vector<1x24x10xbf16> to vector<24x10xbf16>
    %c0_14 = arith.constant 0 : index
    %c10 = arith.constant 10 : index
    %13 = vector.load %arg11[%c0_14, %c10] : memref<72x80xbf16, #tpu.memory_space<vmem>>, vector<24x10xbf16>
    tpu.vector_store %arg11[%c0_14, %c10], %12 {strides = array<i32>} : memref<72x80xbf16, #tpu.memory_space<vmem>>, vector<24x10xbf16>,
    %c2_15 = arith.constant 2 : index
    %c0_16 = arith.constant 0 : index
    %c0_17 = arith.constant 0 : index
    %14 = vector.load %arg0[%c2_15, %c0_16, %c0_17] : memref<8x24x12xbf16, #tpu.memory_space<vmem>>, vector<1x24x10xbf16>
    %15 = vector.shape_cast %14 : vector<1x24x10xbf16> to vector<24x10xbf16>
    %c24_18 = arith.constant 24 : index
    %c10_19 = arith.constant 10 : index
    %16 = vector.load %arg11[%c24_18, %c10_19] : memref<72x80xbf16, #tpu.memory_space<vmem>>, vector<24x10xbf16>
    tpu.vector_store %arg11[%c24_18, %c10_19], %15 {strides = array<i32>} : memref<72x80xbf16, #tpu.memory_space<vmem>>, vector<24x10xbf16>,
    %c3 = arith.constant 3 : index
    %c0_20 = arith.constant 0 : index
    %c0_21 = arith.constant 0 : index
    %17 = vector.load %arg0[%c3, %c0_20, %c0_21] : memref<8x24x12xbf16, #tpu.memory_space<vmem>>, vector<1x24x10xbf16>
    %18 = vector.shape_cast %17 : vector<1x24x10xbf16> to vector<24x10xbf16>
    %c48_22 = arith.constant 48 : index
    %c10_23 = arith.constant 10 : index
    %19 = vector.load %arg11[%c48_22, %c10_23] : memref<72x80xbf16, #tpu.memory_space<vmem>>, vector<24x10xbf16>
    tpu.vector_store %arg11[%c48_22, %c10_23], %18 {strides = array<i32>} : memref<72x80xbf16, #tpu.memory_space<vmem>>, vector<24x10xbf16>,
    %cst_24 = arith.constant 0.000000e+00 : bf16
    %20 = vector.broadcast %cst_24 : bf16 to vector<72x2xbf16>
    %c0_25 = arith.constant 0 : index
    %c18 = arith.constant 18 : index
    %21 = vector.load %arg11[%c0_25, %c18] : memref<72x80xbf16, #tpu.memory_space<vmem>>, vector<72x2xbf16>
    tpu.vector_store %arg11[%c0_25, %c18], %20 {strides = array<i32>} : memref<72x80xbf16, #tpu.memory_space<vmem>>, vector<72x2xbf16>,
    %c2_26 = arith.constant 2 : index
    %c0_27 = arith.constant 0 : index
    %c0_28 = arith.constant 0 : index
    %22 = vector.load %arg0[%c2_26, %c0_27, %c0_28] : memref<8x24x12xbf16, #tpu.memory_space<vmem>>, vector<1x24x10xbf16>
    %23 = vector.shape_cast %22 : vector<1x24x10xbf16> to vector<24x10xbf16>
    %c0_29 = arith.constant 0 : index
    %c20 = arith.constant 20 : index
    %24 = vector.load %arg11[%c0_29, %c20] : memref<72x80xbf16, #tpu.memory_space<vmem>>, vector<24x10xbf16>
    tpu.vector_store %arg11[%c0_29, %c20], %23 {strides = array<i32>} : memref<72x80xbf16, #tpu.memory_space<vmem>>, vector<24x10xbf16>,
    %c3_30 = arith.constant 3 : index
    %c0_31 = arith.constant 0 : index
    %c0_32 = arith.constant 0 : index
    %25 = vector.load %arg0[%c3_30, %c0_31, %c0_32] : memref<8x24x12xbf16, #tpu.memory_space<vmem>>, vector<1x24x10xbf16>
    %26 = vector.shape_cast %25 : vector<1x24x10xbf16> to vector<24x10xbf16>
    %c24_33 = arith.constant 24 : index
    %c20_34 = arith.constant 20 : index
    %27 = vector.load %arg11[%c24_33, %c20_34] : memref<72x80xbf16, #tpu.memory_space<vmem>>, vector<24x10xbf16>
    tpu.vector_store %arg11[%c24_33, %c20_34], %26 {strides = array<i32>} : memref<72x80xbf16, #tpu.memory_space<vmem>>, vector<24x10xbf16>,
    %c4 = arith.constant 4 : index
    %c0_35 = arith.constant 0 : index
    %c0_36 = arith.constant 0 : index
    %28 = vector.load %arg0[%c4, %c0_35, %c0_36] : memref<8x24x12xbf16, #tpu.memory_space<vmem>>, vector<1x24x10xbf16>
    %29 = vector.shape_cast %28 : vector<1x24x10xbf16> to vector<24x10xbf16>
    %c48_37 = arith.constant 48 : index
    %c20_38 = arith.constant 20 : index
    %30 = vector.load %arg11[%c48_37, %c20_38] : memref<72x80xbf16, #tpu.memory_space<vmem>>, vector<24x10xbf16>
    tpu.vector_store %arg11[%c48_37, %c20_38], %29 {strides = array<i32>} : memref<72x80xbf16, #tpu.memory_space<vmem>>, vector<24x10xbf16>,
    %cst_39 = arith.constant 0.000000e+00 : bf16
    %31 = vector.broadcast %cst_39 : bf16 to vector<72x2xbf16>
    %c0_40 = arith.constant 0 : index
    %c28 = arith.constant 28 : index
    %32 = vector.load %arg11[%c0_40, %c28] : memref<72x80xbf16, #tpu.memory_space<vmem>>, vector<72x2xbf16>
    tpu.vector_store %arg11[%c0_40, %c28], %31 {strides = array<i32>} : memref<72x80xbf16, #tpu.memory_space<vmem>>, vector<72x2xbf16>,
    %c3_41 = arith.constant 3 : index
    %c0_42 = arith.constant 0 : index
    %c0_43 = arith.constant 0 : index
    %33 = vector.load %arg0[%c3_41, %c0_42, %c0_43] : memref<8x24x12xbf16, #tpu.memory_space<vmem>>, vector<1x24x10xbf16>
    %34 = vector.shape_cast %33 : vector<1x24x10xbf16> to vector<24x10xbf16>
    %c0_44 = arith.constant 0 : index
    %c30 = arith.constant 30 : index
    %35 = vector.load %arg11[%c0_44, %c30] : memref<72x80xbf16, #tpu.memory_space<vmem>>, vector<24x10xbf16>
    tpu.vector_store %arg11[%c0_44, %c30], %34 {strides = array<i32>} : memref<72x80xbf16, #tpu.memory_space<vmem>>, vector<24x10xbf16>,
    %c4_45 = arith.constant 4 : index
    %c0_46 = arith.constant 0 : index
    %c0_47 = arith.constant 0 : index
    %36 = vector.load %arg0[%c4_45, %c0_46, %c0_47] : memref<8x24x12xbf16, #tpu.memory_space<vmem>>, vector<1x24x10xbf16>
    %37 = vector.shape_cast %36 : vector<1x24x10xbf16> to vector<24x10xbf16>
    %c24_48 = arith.constant 24 : index
    %c30_49 = arith.constant 30 : index
    %38 = vector.load %arg11[%c24_48, %c30_49] : memref<72x80xbf16, #tpu.memory_space<vmem>>, vector<24x10xbf16>
    tpu.vector_store %arg11[%c24_48, %c30_49], %37 {strides = array<i32>} : memref<72x80xbf16, #tpu.memory_space<vmem>>, vector<24x10xbf16>,
    %c5 = arith.constant 5 : index
    %c0_50 = arith.constant 0 : index
    %c0_51 = arith.constant 0 : index
    %39 = vector.load %arg0[%c5, %c0_50, %c0_51] : memref<8x24x12xbf16, #tpu.memory_space<vmem>>, vector<1x24x10xbf16>
    %40 = vector.shape_cast %39 : vector<1x24x10xbf16> to vector<24x10xbf16>
    %c48_52 = arith.constant 48 : index
    %c30_53 = arith.constant 30 : index
    %41 = vector.load %arg11[%c48_52, %c30_53] : memref<72x80xbf16, #tpu.memory_space<vmem>>, vector<24x10xbf16>
    tpu.vector_store %arg11[%c48_52, %c30_53], %40 {strides = array<i32>} : memref<72x80xbf16, #tpu.memory_space<vmem>>, vector<24x10xbf16>,
    %cst_54 = arith.constant 0.000000e+00 : bf16
    %42 = vector.broadcast %cst_54 : bf16 to vector<72x2xbf16>
    %c0_55 = arith.constant 0 : index
    %c38 = arith.constant 38 : index
    %43 = vector.load %arg11[%c0_55, %c38] : memref<72x80xbf16, #tpu.memory_space<vmem>>, vector<72x2xbf16>
    tpu.vector_store %arg11[%c0_55, %c38], %42 {strides = array<i32>} : memref<72x80xbf16, #tpu.memory_space<vmem>>, vector<72x2xbf16>,
    %c4_56 = arith.constant 4 : index
    %c0_57 = arith.constant 0 : index
    %c0_58 = arith.constant 0 : index
    %44 = vector.load %arg0[%c4_56, %c0_57, %c0_58] : memref<8x24x12xbf16, #tpu.memory_space<vmem>>, vector<1x24x10xbf16>
    %45 = vector.shape_cast %44 : vector<1x24x10xbf16> to vector<24x10xbf16>
    %c0_59 = arith.constant 0 : index
    %c40 = arith.constant 40 : index
    %46 = vector.load %arg11[%c0_59, %c40] : memref<72x80xbf16, #tpu.memory_space<vmem>>, vector<24x10xbf16>
    tpu.vector_store %arg11[%c0_59, %c40], %45 {strides = array<i32>} : memref<72x80xbf16, #tpu.memory_space<vmem>>, vector<24x10xbf16>,
    %c5_60 = arith.constant 5 : index
    %c0_61 = arith.constant 0 : index
    %c0_62 = arith.constant 0 : index
    %47 = vector.load %arg0[%c5_60, %c0_61, %c0_62] : memref<8x24x12xbf16, #tpu.memory_space<vmem>>, vector<1x24x10xbf16>
    %48 = vector.shape_cast %47 : vector<1x24x10xbf16> to vector<24x10xbf16>
    %c24_63 = arith.constant 24 : index
    %c40_64 = arith.constant 40 : index
    %49 = vector.load %arg11[%c24_63, %c40_64] : memref<72x80xbf16, #tpu.memory_space<vmem>>, vector<24x10xbf16>
    tpu.vector_store %arg11[%c24_63, %c40_64], %48 {strides = array<i32>} : memref<72x80xbf16, #tpu.memory_space<vmem>>, vector<24x10xbf16>,
    %c6 = arith.constant 6 : index
    %c0_65 = arith.constant 0 : index
    %c0_66 = arith.constant 0 : index
    %50 = vector.load %arg0[%c6, %c0_65, %c0_66] : memref<8x24x12xbf16, #tpu.memory_space<vmem>>, vector<1x24x10xbf16>
    %51 = vector.shape_cast %50 : vector<1x24x10xbf16> to vector<24x10xbf16>
    %c48_67 = arith.constant 48 : index
    %c40_68 = arith.constant 40 : index
    %52 = vector.load %arg11[%c48_67, %c40_68] : memref<72x80xbf16, #tpu.memory_space<vmem>>, vector<24x10xbf16>
    tpu.vector_store %arg11[%c48_67, %c40_68], %51 {strides = array<i32>} : memref<72x80xbf16, #tpu.memory_space<vmem>>, vector<24x10xbf16>,
    %cst_69 = arith.constant 0.000000e+00 : bf16
    %53 = vector.broadcast %cst_69 : bf16 to vector<72x2xbf16>
    %c0_70 = arith.constant 0 : index
    %c48_71 = arith.constant 48 : index
    %54 = vector.load %arg11[%c0_70, %c48_71] : memref<72x80xbf16, #tpu.memory_space<vmem>>, vector<72x2xbf16>
    tpu.vector_store %arg11[%c0_70, %c48_71], %53 {strides = array<i32>} : memref<72x80xbf16, #tpu.memory_space<vmem>>, vector<72x2xbf16>,
    %c5_72 = arith.constant 5 : index
    %c0_73 = arith.constant 0 : index
    %c0_74 = arith.constant 0 : index
    %55 = vector.load %arg0[%c5_72, %c0_73, %c0_74] : memref<8x24x12xbf16, #tpu.memory_space<vmem>>, vector<1x24x10xbf16>
    %56 = vector.shape_cast %55 : vector<1x24x10xbf16> to vector<24x10xbf16>
    %c0_75 = arith.constant 0 : index
    %c50 = arith.constant 50 : index
    %57 = vector.load %arg11[%c0_75, %c50] : memref<72x80xbf16, #tpu.memory_space<vmem>>, vector<24x10xbf16>
    tpu.vector_store %arg11[%c0_75, %c50], %56 {strides = array<i32>} : memref<72x80xbf16, #tpu.memory_space<vmem>>, vector<24x10xbf16>,
    %c6_76 = arith.constant 6 : index
    %c0_77 = arith.constant 0 : index
    %c0_78 = arith.constant 0 : index
    %58 = vector.load %arg0[%c6_76, %c0_77, %c0_78] : memref<8x24x12xbf16, #tpu.memory_space<vmem>>, vector<1x24x10xbf16>
    %59 = vector.shape_cast %58 : vector<1x24x10xbf16> to vector<24x10xbf16>
    %c24_79 = arith.constant 24 : index
    %c50_80 = arith.constant 50 : index
    %60 = vector.load %arg11[%c24_79, %c50_80] : memref<72x80xbf16, #tpu.memory_space<vmem>>, vector<24x10xbf16>
    tpu.vector_store %arg11[%c24_79, %c50_80], %59 {strides = array<i32>} : memref<72x80xbf16, #tpu.memory_space<vmem>>, vector<24x10xbf16>,
    %c7 = arith.constant 7 : index
    %c0_81 = arith.constant 0 : index
    %c0_82 = arith.constant 0 : index
    %61 = vector.load %arg0[%c7, %c0_81, %c0_82] : memref<8x24x12xbf16, #tpu.memory_space<vmem>>, vector<1x24x10xbf16>
    %62 = vector.shape_cast %61 : vector<1x24x10xbf16> to vector<24x10xbf16>
    %c48_83 = arith.constant 48 : index
    %c50_84 = arith.constant 50 : index
    %63 = vector.load %arg11[%c48_83, %c50_84] : memref<72x80xbf16, #tpu.memory_space<vmem>>, vector<24x10xbf16>
    tpu.vector_store %arg11[%c48_83, %c50_84], %62 {strides = array<i32>} : memref<72x80xbf16, #tpu.memory_space<vmem>>, vector<24x10xbf16>,
    %cst_85 = arith.constant 0.000000e+00 : bf16
    %64 = vector.broadcast %cst_85 : bf16 to vector<72x2xbf16>
    %c0_86 = arith.constant 0 : index
    %c58 = arith.constant 58 : index
    %65 = vector.load %arg11[%c0_86, %c58] : memref<72x80xbf16, #tpu.memory_space<vmem>>, vector<72x2xbf16>
    tpu.vector_store %arg11[%c0_86, %c58], %64 {strides = array<i32>} : memref<72x80xbf16, #tpu.memory_space<vmem>>, vector<72x2xbf16>,
    %c6_87 = arith.constant 6 : index
    %c0_88 = arith.constant 0 : index
    %c0_89 = arith.constant 0 : index
    %66 = vector.load %arg0[%c6_87, %c0_88, %c0_89] : memref<8x24x12xbf16, #tpu.memory_space<vmem>>, vector<1x24x10xbf16>
    %67 = vector.shape_cast %66 : vector<1x24x10xbf16> to vector<24x10xbf16>
    %c0_90 = arith.constant 0 : index
    %c60 = arith.constant 60 : index
    %68 = vector.load %arg11[%c0_90, %c60] : memref<72x80xbf16, #tpu.memory_space<vmem>>, vector<24x10xbf16>
    tpu.vector_store %arg11[%c0_90, %c60], %67 {strides = array<i32>} : memref<72x80xbf16, #tpu.memory_space<vmem>>, vector<24x10xbf16>,
    %c7_91 = arith.constant 7 : index
    %c0_92 = arith.constant 0 : index
    %c0_93 = arith.constant 0 : index
    %69 = vector.load %arg0[%c7_91, %c0_92, %c0_93] : memref<8x24x12xbf16, #tpu.memory_space<vmem>>, vector<1x24x10xbf16>
    %70 = vector.shape_cast %69 : vector<1x24x10xbf16> to vector<24x10xbf16>
    %c24_94 = arith.constant 24 : index
    %c60_95 = arith.constant 60 : index
    %71 = vector.load %arg11[%c24_94, %c60_95] : memref<72x80xbf16, #tpu.memory_space<vmem>>, vector<24x10xbf16>
    tpu.vector_store %arg11[%c24_94, %c60_95], %70 {strides = array<i32>} : memref<72x80xbf16, #tpu.memory_space<vmem>>, vector<24x10xbf16>,
    %c0_96 = arith.constant 0 : index
    %c0_97 = arith.constant 0 : index
    %c2_98 = arith.constant 2 : index
    %72 = vector.load %arg0[%c0_96, %c0_97, %c2_98] : memref<8x24x12xbf16, #tpu.memory_space<vmem>>, vector<1x24x10xbf16>
    %73 = vector.shape_cast %72 : vector<1x24x10xbf16> to vector<24x10xbf16>
    %c48_99 = arith.constant 48 : index
    %c60_100 = arith.constant 60 : index
    %74 = vector.load %arg11[%c48_99, %c60_100] : memref<72x80xbf16, #tpu.memory_space<vmem>>, vector<24x10xbf16>
    tpu.vector_store %arg11[%c48_99, %c60_100], %73 {strides = array<i32>} : memref<72x80xbf16, #tpu.memory_space<vmem>>, vector<24x10xbf16>,
    %cst_101 = arith.constant 0.000000e+00 : bf16
    %75 = vector.broadcast %cst_101 : bf16 to vector<72x4xbf16>
    %c0_102 = arith.constant 0 : index
    %c66 = arith.constant 66 : index
    %76 = vector.load %arg11[%c0_102, %c66] : memref<72x80xbf16, #tpu.memory_space<vmem>>, vector<72x4xbf16>
    tpu.vector_store %arg11[%c0_102, %c66], %75 {strides = array<i32>} : memref<72x80xbf16, #tpu.memory_space<vmem>>, vector<72x4xbf16>,
    %c7_103 = arith.constant 7 : index
    %c0_104 = arith.constant 0 : index
    %c0_105 = arith.constant 0 : index
    %77 = vector.load %arg0[%c7_103, %c0_104, %c0_105] : memref<8x24x12xbf16, #tpu.memory_space<vmem>>, vector<1x24x10xbf16>
    %78 = vector.shape_cast %77 : vector<1x24x10xbf16> to vector<24x10xbf16>
    %c0_106 = arith.constant 0 : index
    %c70 = arith.constant 70 : index
    %79 = vector.load %arg11[%c0_106, %c70] : memref<72x80xbf16, #tpu.memory_space<vmem>>, vector<24x10xbf16>
    tpu.vector_store %arg11[%c0_106, %c70], %78 {strides = array<i32>} : memref<72x80xbf16, #tpu.memory_space<vmem>>, vector<24x10xbf16>,
    %c0_107 = arith.constant 0 : index
    %c0_108 = arith.constant 0 : index
    %c2_109 = arith.constant 2 : index
    %80 = vector.load %arg0[%c0_107, %c0_108, %c2_109] : memref<8x24x12xbf16, #tpu.memory_space<vmem>>, vector<1x24x10xbf16>
    %81 = vector.shape_cast %80 : vector<1x24x10xbf16> to vector<24x10xbf16>
    %c24_110 = arith.constant 24 : index
    %c70_111 = arith.constant 70 : index
    %82 = vector.load %arg11[%c24_110, %c70_111] : memref<72x80xbf16, #tpu.memory_space<vmem>>, vector<24x10xbf16>
    tpu.vector_store %arg11[%c24_110, %c70_111], %81 {strides = array<i32>} : memref<72x80xbf16, #tpu.memory_space<vmem>>, vector<24x10xbf16>,
    %c1_112 = arith.constant 1 : index
    %c0_113 = arith.constant 0 : index
    %c2_114 = arith.constant 2 : index
    %83 = vector.load %arg0[%c1_112, %c0_113, %c2_114] : memref<8x24x12xbf16, #tpu.memory_space<vmem>>, vector<1x24x10xbf16>
    %84 = vector.shape_cast %83 : vector<1x24x10xbf16> to vector<24x10xbf16>
    %c48_115 = arith.constant 48 : index
    %c70_116 = arith.constant 70 : index
    %85 = vector.load %arg11[%c48_115, %c70_116] : memref<72x80xbf16, #tpu.memory_space<vmem>>, vector<24x10xbf16>
    tpu.vector_store %arg11[%c48_115, %c70_116], %84 {strides = array<i32>} : memref<72x80xbf16, #tpu.memory_space<vmem>>, vector<24x10xbf16>,
    %cst_117 = arith.constant 0.000000e+00 : bf16
    %86 = vector.broadcast %cst_117 : bf16 to vector<72x4xbf16>
    %c0_118 = arith.constant 0 : index
    %c76 = arith.constant 76 : index
    %87 = vector.load %arg11[%c0_118, %c76] : memref<72x80xbf16, #tpu.memory_space<vmem>>, vector<72x4xbf16>
    tpu.vector_store %arg11[%c0_118, %c76], %86 {strides = array<i32>} : memref<72x80xbf16, #tpu.memory_space<vmem>>, vector<72x4xbf16>,
    %c0_119 = arith.constant 0 : index
    %c0_120 = arith.constant 0 : index
    %88 = vector.load %arg1[%c0_119, %c0_120] : memref<56x72xbf16, #tpu.memory_space<vmem>>, vector<56x72xbf16>
    %c0_121 = arith.constant 0 : index
    %c0_122 = arith.constant 0 : index
    %89 = vector.load %arg11[%c0_121, %c0_122] : memref<72x80xbf16, #tpu.memory_space<vmem>>, vector<72x80xbf16>
    %cst_123 = arith.constant dense<0.000000e+00> : vector<56x80xf32>
    %90 = tpu.matmul %88, %89, %cst_123 {dimension_numbers = #tpu.dot_dimension_numbers<[1], [0], [0], [1], [0, 0, 1, 1], [], []>} : vector<56x72xbf16>, vector<72x80xbf16>, vector<56x80xf32> -> vector<56x80xf32>
    %cst_124 = arith.constant dense<0.000000e+00> : vector<56xf32>
    %91 = vector.multi_reduction <add>, %90, %cst_124 [1] : vector<56x80xf32> to vector<56xf32>
    %92 = vector.shape_cast %91 : vector<56xf32> to vector<56x1xf32>
    %cst_125 = arith.constant 0.0166666675 : f32
    %93 = vector.broadcast %cst_125 : f32 to vector<56x1xf32>
    %94 = arith.mulf %92, %93 : vector<56x1xf32>
    %95 = arith.mulf %90, %90 : vector<56x80xf32>
    %cst_126 = arith.constant dense<0.000000e+00> : vector<56xf32>
    %96 = vector.multi_reduction <add>, %95, %cst_126 [1] : vector<56x80xf32> to vector<56xf32>
    %97 = vector.shape_cast %96 : vector<56xf32> to vector<56x1xf32>
    %cst_127 = arith.constant 0.0166666675 : f32
    %98 = vector.broadcast %cst_127 : f32 to vector<56x1xf32>
    %99 = arith.mulf %97, %98 : vector<56x1xf32>
    %100 = arith.mulf %94, %94 : vector<56x1xf32>
    %101 = arith.subf %99, %100 : vector<56x1xf32>
    %cst_128 = arith.constant 0.000000e+00 : f32
    %102 = vector.broadcast %cst_128 : f32 to vector<56x1xf32>
    %103 = arith.maximumf %101, %102 : vector<56x1xf32>
    %c0_129 = arith.constant 0 : index
    %c0_130 = arith.constant 0 : index
    %104 = vector.load %arg2[%c0_129, %c0_130] : memref<56x1xf32, #tpu.memory_space<vmem>>, vector<56x1xf32>
    %cst_131 = arith.constant 9.99999974E-6 : f32
    %105 = vector.broadcast %cst_131 : f32 to vector<56x1xf32>
    %106 = arith.addf %103, %105 : vector<56x1xf32>
    %107 = math.rsqrt %106 : vector<56x1xf32>
    %108 = arith.mulf %104, %107 : vector<56x1xf32>
    %c0_132 = arith.constant 0 : index
    %c0_133 = arith.constant 0 : index
    %109 = vector.load %arg3[%c0_132, %c0_133] : memref<56x1xf32, #tpu.memory_space<vmem>>, vector<56x1xf32>
    %110 = arith.mulf %94, %108 : vector<56x1xf32>
    %111 = arith.subf %109, %110 : vector<56x1xf32>
    %112 = vector.broadcast %108 : vector<56x1xf32> to vector<56x80xf32>
    %113 = arith.mulf %90, %112 : vector<56x80xf32>
    %114 = vector.broadcast %111 : vector<56x1xf32> to vector<56x80xf32>
    %115 = arith.addf %113, %114 : vector<56x80xf32>
    %116 = vector.extract_strided_slice %115 {offsets = [0, 0], sizes = [56, 10], strides = [1, 1]} : vector<56x80xf32> to vector<56x10xf32>
    %117 = vector.extract_strided_slice %115 {offsets = [0, 10], sizes = [56, 10], strides = [1, 1]} : vector<56x80xf32> to vector<56x10xf32>
    %118 = arith.maximumf %116, %117 : vector<56x10xf32>
    %cst_134 = arith.constant 0.000000e+00 : f32
    %119 = vector.broadcast %cst_134 : f32 to vector<56x10xf32>
    %120 = arith.maximumf %118, %119 : vector<56x10xf32>
    %121 = arith.truncf %120 : vector<56x10xf32> to vector<56x10xbf16>
    %122 = vector.extract_strided_slice %115 {offsets = [0, 20], sizes = [56, 10], strides = [1, 1]} : vector<56x80xf32> to vector<56x10xf32>
    %123 = vector.extract_strided_slice %115 {offsets = [0, 30], sizes = [56, 10], strides = [1, 1]} : vector<56x80xf32> to vector<56x10xf32>
    %124 = arith.maximumf %122, %123 : vector<56x10xf32>
    %cst_135 = arith.constant 0.000000e+00 : f32
    %125 = vector.broadcast %cst_135 : f32 to vector<56x10xf32>
    %126 = arith.maximumf %124, %125 : vector<56x10xf32>
    %127 = arith.truncf %126 : vector<56x10xf32> to vector<56x10xbf16>
    %128 = vector.extract_strided_slice %115 {offsets = [0, 40], sizes = [56, 10], strides = [1, 1]} : vector<56x80xf32> to vector<56x10xf32>
    %129 = vector.extract_strided_slice %115 {offsets = [0, 50], sizes = [56, 10], strides = [1, 1]} : vector<56x80xf32> to vector<56x10xf32>
    %130 = arith.maximumf %128, %129 : vector<56x10xf32>
    %cst_136 = arith.constant 0.000000e+00 : f32
    %131 = vector.broadcast %cst_136 : f32 to vector<56x10xf32>
    %132 = arith.maximumf %130, %131 : vector<56x10xf32>
    %133 = arith.truncf %132 : vector<56x10xf32> to vector<56x10xbf16>
    %134 = vector.extract_strided_slice %115 {offsets = [0, 60], sizes = [56, 10], strides = [1, 1]} : vector<56x80xf32> to vector<56x10xf32>
    %135 = vector.extract_strided_slice %115 {offsets = [0, 70], sizes = [56, 10], strides = [1, 1]} : vector<56x80xf32> to vector<56x10xf32>
    %136 = arith.maximumf %134, %135 : vector<56x10xf32>
    %cst_137 = arith.constant 0.000000e+00 : f32
    %137 = vector.broadcast %cst_137 : f32 to vector<56x10xf32>
    %138 = arith.maximumf %136, %137 : vector<56x10xf32>
    %139 = arith.truncf %138 : vector<56x10xf32> to vector<56x10xbf16>
    %140 = vector.extract_strided_slice %121 {offsets = [0, 0], sizes = [56, 8], strides = [1, 1]} : vector<56x10xbf16> to vector<56x8xbf16>
    %c0_138 = arith.constant 0 : index
    %c0_139 = arith.constant 0 : index
    %141 = vector.load %arg12[%c0_138, %c0_139] : memref<168x32xbf16, #tpu.memory_space<vmem>>, vector<56x8xbf16>
    tpu.vector_store %arg12[%c0_138, %c0_139], %140 {strides = array<i32>} : memref<168x32xbf16, #tpu.memory_space<vmem>>, vector<56x8xbf16>,
    %142 = vector.extract_strided_slice %127 {offsets = [0, 0], sizes = [56, 8], strides = [1, 1]} : vector<56x10xbf16> to vector<56x8xbf16>
    %c56 = arith.constant 56 : index
    %c0_140 = arith.constant 0 : index
    %143 = vector.load %arg12[%c56, %c0_140] : memref<168x32xbf16, #tpu.memory_space<vmem>>, vector<56x8xbf16>
    tpu.vector_store %arg12[%c56, %c0_140], %142 {strides = array<i32>} : memref<168x32xbf16, #tpu.memory_space<vmem>>, vector<56x8xbf16>,
    %144 = vector.extract_strided_slice %133 {offsets = [0, 0], sizes = [56, 8], strides = [1, 1]} : vector<56x10xbf16> to vector<56x8xbf16>
    %c112 = arith.constant 112 : index
    %c0_141 = arith.constant 0 : index
    %145 = vector.load %arg12[%c112, %c0_141] : memref<168x32xbf16, #tpu.memory_space<vmem>>, vector<56x8xbf16>
    tpu.vector_store %arg12[%c112, %c0_141], %144 {strides = array<i32>} : memref<168x32xbf16, #tpu.memory_space<vmem>>, vector<56x8xbf16>,
    %146 = vector.extract_strided_slice %127 {offsets = [0, 0], sizes = [56, 8], strides = [1, 1]} : vector<56x10xbf16> to vector<56x8xbf16>
    %c0_142 = arith.constant 0 : index
    %c8_143 = arith.constant 8 : index
    %147 = vector.load %arg12[%c0_142, %c8_143] : memref<168x32xbf16, #tpu.memory_space<vmem>>, vector<56x8xbf16>
    tpu.vector_store %arg12[%c0_142, %c8_143], %146 {strides = array<i32>} : memref<168x32xbf16, #tpu.memory_space<vmem>>, vector<56x8xbf16>,
    %148 = vector.extract_strided_slice %133 {offsets = [0, 0], sizes = [56, 8], strides = [1, 1]} : vector<56x10xbf16> to vector<56x8xbf16>
    %c56_144 = arith.constant 56 : index
    %c8_145 = arith.constant 8 : index
    %149 = vector.load %arg12[%c56_144, %c8_145] : memref<168x32xbf16, #tpu.memory_space<vmem>>, vector<56x8xbf16>
    tpu.vector_store %arg12[%c56_144, %c8_145], %148 {strides = array<i32>} : memref<168x32xbf16, #tpu.memory_space<vmem>>, vector<56x8xbf16>,
    %150 = vector.extract_strided_slice %139 {offsets = [0, 0], sizes = [56, 8], strides = [1, 1]} : vector<56x10xbf16> to vector<56x8xbf16>
    %c112_146 = arith.constant 112 : index
    %c8_147 = arith.constant 8 : index
    %151 = vector.load %arg12[%c112_146, %c8_147] : memref<168x32xbf16, #tpu.memory_space<vmem>>, vector<56x8xbf16>
    tpu.vector_store %arg12[%c112_146, %c8_147], %150 {strides = array<i32>} : memref<168x32xbf16, #tpu.memory_space<vmem>>, vector<56x8xbf16>,
    %cst_148 = arith.constant 0.000000e+00 : bf16
    %152 = vector.broadcast %cst_148 : bf16 to vector<168x2xbf16>
    %c0_149 = arith.constant 0 : index
    %c14 = arith.constant 14 : index
    %153 = vector.load %arg12[%c0_149, %c14] : memref<168x32xbf16, #tpu.memory_space<vmem>>, vector<168x2xbf16>
    tpu.vector_store %arg12[%c0_149, %c14], %152 {strides = array<i32>} : memref<168x32xbf16, #tpu.memory_space<vmem>>, vector<168x2xbf16>,
    %154 = vector.extract_strided_slice %133 {offsets = [0, 0], sizes = [56, 8], strides = [1, 1]} : vector<56x10xbf16> to vector<56x8xbf16>
    %c0_150 = arith.constant 0 : index
    %c16 = arith.constant 16 : index
    %155 = vector.load %arg12[%c0_150, %c16] : memref<168x32xbf16, #tpu.memory_space<vmem>>, vector<56x8xbf16>
    tpu.vector_store %arg12[%c0_150, %c16], %154 {strides = array<i32>} : memref<168x32xbf16, #tpu.memory_space<vmem>>, vector<56x8xbf16>,
    %156 = vector.extract_strided_slice %139 {offsets = [0, 0], sizes = [56, 8], strides = [1, 1]} : vector<56x10xbf16> to vector<56x8xbf16>
    %c56_151 = arith.constant 56 : index
    %c16_152 = arith.constant 16 : index
    %157 = vector.load %arg12[%c56_151, %c16_152] : memref<168x32xbf16, #tpu.memory_space<vmem>>, vector<56x8xbf16>
    tpu.vector_store %arg12[%c56_151, %c16_152], %156 {strides = array<i32>} : memref<168x32xbf16, #tpu.memory_space<vmem>>, vector<56x8xbf16>,
    %158 = vector.extract_strided_slice %121 {offsets = [0, 2], sizes = [56, 8], strides = [1, 1]} : vector<56x10xbf16> to vector<56x8xbf16>
    %c112_153 = arith.constant 112 : index
    %c16_154 = arith.constant 16 : index
    %159 = vector.load %arg12[%c112_153, %c16_154] : memref<168x32xbf16, #tpu.memory_space<vmem>>, vector<56x8xbf16>
    tpu.vector_store %arg12[%c112_153, %c16_154], %158 {strides = array<i32>} : memref<168x32xbf16, #tpu.memory_space<vmem>>, vector<56x8xbf16>,
    %cst_155 = arith.constant 0.000000e+00 : bf16
    %160 = vector.broadcast %cst_155 : bf16 to vector<168x2xbf16>
    %c0_156 = arith.constant 0 : index
    %c22 = arith.constant 22 : index
    %161 = vector.load %arg12[%c0_156, %c22] : memref<168x32xbf16, #tpu.memory_space<vmem>>, vector<168x2xbf16>
    tpu.vector_store %arg12[%c0_156, %c22], %160 {strides = array<i32>} : memref<168x32xbf16, #tpu.memory_space<vmem>>, vector<168x2xbf16>,
    %162 = vector.extract_strided_slice %139 {offsets = [0, 0], sizes = [56, 8], strides = [1, 1]} : vector<56x10xbf16> to vector<56x8xbf16>
    %c0_157 = arith.constant 0 : index
    %c24_158 = arith.constant 24 : index
    %163 = vector.load %arg12[%c0_157, %c24_158] : memref<168x32xbf16, #tpu.memory_space<vmem>>, vector<56x8xbf16>
    tpu.vector_store %arg12[%c0_157, %c24_158], %162 {strides = array<i32>} : memref<168x32xbf16, #tpu.memory_space<vmem>>, vector<56x8xbf16>,
    %164 = vector.extract_strided_slice %121 {offsets = [0, 2], sizes = [56, 8], strides = [1, 1]} : vector<56x10xbf16> to vector<56x8xbf16>
    %c56_159 = arith.constant 56 : index
    %c24_160 = arith.constant 24 : index
    %165 = vector.load %arg12[%c56_159, %c24_160] : memref<168x32xbf16, #tpu.memory_space<vmem>>, vector<56x8xbf16>
    tpu.vector_store %arg12[%c56_159, %c24_160], %164 {strides = array<i32>} : memref<168x32xbf16, #tpu.memory_space<vmem>>, vector<56x8xbf16>,
    %166 = vector.extract_strided_slice %127 {offsets = [0, 2], sizes = [56, 8], strides = [1, 1]} : vector<56x10xbf16> to vector<56x8xbf16>
    %c112_161 = arith.constant 112 : index
    %c24_162 = arith.constant 24 : index
    %167 = vector.load %arg12[%c112_161, %c24_162] : memref<168x32xbf16, #tpu.memory_space<vmem>>, vector<56x8xbf16>
    tpu.vector_store %arg12[%c112_161, %c24_162], %166 {strides = array<i32>} : memref<168x32xbf16, #tpu.memory_space<vmem>>, vector<56x8xbf16>,
    %cst_163 = arith.constant 0.000000e+00 : bf16
    %168 = vector.broadcast %cst_163 : bf16 to vector<168x2xbf16>
    %c0_164 = arith.constant 0 : index
    %c30_165 = arith.constant 30 : index
    %169 = vector.load %arg12[%c0_164, %c30_165] : memref<168x32xbf16, #tpu.memory_space<vmem>>, vector<168x2xbf16>
    tpu.vector_store %arg12[%c0_164, %c30_165], %168 {strides = array<i32>} : memref<168x32xbf16, #tpu.memory_space<vmem>>, vector<168x2xbf16>,
    %c0_166 = arith.constant 0 : index
    %c0_167 = arith.constant 0 : index
    %170 = vector.load %arg4[%c0_166, %c0_167] : memref<72x168xbf16, #tpu.memory_space<vmem>>, vector<72x168xbf16>
    %c0_168 = arith.constant 0 : index
    %c0_169 = arith.constant 0 : index
    %171 = vector.load %arg12[%c0_168, %c0_169] : memref<168x32xbf16, #tpu.memory_space<vmem>>, vector<168x32xbf16>
    %cst_170 = arith.constant dense<0.000000e+00> : vector<72x32xf32>
    %172 = tpu.matmul %170, %171, %cst_170 {dimension_numbers = #tpu.dot_dimension_numbers<[1], [0], [0], [1], [0, 0, 1, 1], [], []>} : vector<72x168xbf16>, vector<168x32xbf16>, vector<72x32xf32> -> vector<72x32xf32>
    %cst_171 = arith.constant dense<0.000000e+00> : vector<72xf32>
    %173 = vector.multi_reduction <add>, %172, %cst_171 [1] : vector<72x32xf32> to vector<72xf32>
    %174 = vector.shape_cast %173 : vector<72xf32> to vector<72x1xf32>
    %cst_172 = arith.constant 0.0384615399 : f32
    %175 = vector.broadcast %cst_172 : f32 to vector<72x1xf32>
    %176 = arith.mulf %174, %175 : vector<72x1xf32>
    %177 = arith.mulf %172, %172 : vector<72x32xf32>
    %cst_173 = arith.constant dense<0.000000e+00> : vector<72xf32>
    %178 = vector.multi_reduction <add>, %177, %cst_173 [1] : vector<72x32xf32> to vector<72xf32>
    %179 = vector.shape_cast %178 : vector<72xf32> to vector<72x1xf32>
    %cst_174 = arith.constant 0.0384615399 : f32
    %180 = vector.broadcast %cst_174 : f32 to vector<72x1xf32>
    %181 = arith.mulf %179, %180 : vector<72x1xf32>
    %182 = arith.mulf %176, %176 : vector<72x1xf32>
    %183 = arith.subf %181, %182 : vector<72x1xf32>
    %cst_175 = arith.constant 0.000000e+00 : f32
    %184 = vector.broadcast %cst_175 : f32 to vector<72x1xf32>
    %185 = arith.maximumf %183, %184 : vector<72x1xf32>
    %c0_176 = arith.constant 0 : index
    %c0_177 = arith.constant 0 : index
    %186 = vector.load %arg5[%c0_176, %c0_177] : memref<72x1xf32, #tpu.memory_space<vmem>>, vector<72x1xf32>
    %cst_178 = arith.constant 9.99999974E-6 : f32
    %187 = vector.broadcast %cst_178 : f32 to vector<72x1xf32>
    %188 = arith.addf %185, %187 : vector<72x1xf32>
    %189 = math.rsqrt %188 : vector<72x1xf32>
    %190 = arith.mulf %186, %189 : vector<72x1xf32>
    %c0_179 = arith.constant 0 : index
    %c0_180 = arith.constant 0 : index
    %191 = vector.load %arg6[%c0_179, %c0_180] : memref<72x1xf32, #tpu.memory_space<vmem>>, vector<72x1xf32>
    %192 = arith.mulf %176, %190 : vector<72x1xf32>
    %193 = arith.subf %191, %192 : vector<72x1xf32>
    %194 = vector.broadcast %190 : vector<72x1xf32> to vector<72x32xf32>
    %195 = arith.mulf %172, %194 : vector<72x32xf32>
    %196 = vector.broadcast %193 : vector<72x1xf32> to vector<72x32xf32>
    %197 = arith.addf %195, %196 : vector<72x32xf32>
    %198 = vector.extract_strided_slice %197 {offsets = [0, 0], sizes = [72, 8], strides = [1, 1]} : vector<72x32xf32> to vector<72x8xf32>
    %199 = vector.extract_strided_slice %197 {offsets = [0, 8], sizes = [72, 8], strides = [1, 1]} : vector<72x32xf32> to vector<72x8xf32>
    %200 = arith.maximumf %198, %199 : vector<72x8xf32>
    %cst_181 = arith.constant 0.000000e+00 : f32
    %201 = vector.broadcast %cst_181 : f32 to vector<72x8xf32>
    %202 = arith.maximumf %200, %201 : vector<72x8xf32>
    %203 = arith.truncf %202 : vector<72x8xf32> to vector<72x8xbf16>
    %204 = vector.extract_strided_slice %197 {offsets = [0, 16], sizes = [72, 8], strides = [1, 1]} : vector<72x32xf32> to vector<72x8xf32>
    %205 = vector.extract_strided_slice %197 {offsets = [0, 24], sizes = [72, 8], strides = [1, 1]} : vector<72x32xf32> to vector<72x8xf32>
    %206 = arith.maximumf %204, %205 : vector<72x8xf32>
    %cst_182 = arith.constant 0.000000e+00 : f32
    %207 = vector.broadcast %cst_182 : f32 to vector<72x8xf32>
    %208 = arith.maximumf %206, %207 : vector<72x8xf32>
    %209 = arith.truncf %208 : vector<72x8xf32> to vector<72x8xbf16>
    %210 = vector.extract_strided_slice %203 {offsets = [0, 0], sizes = [72, 4], strides = [1, 1]} : vector<72x8xbf16> to vector<72x4xbf16>
    %c0_183 = arith.constant 0 : index
    %c0_184 = arith.constant 0 : index
    %211 = vector.load %arg13[%c0_183, %c0_184] : memref<216x8xbf16, #tpu.memory_space<vmem>>, vector<72x4xbf16>
    tpu.vector_store %arg13[%c0_183, %c0_184], %210 {strides = array<i32>} : memref<216x8xbf16, #tpu.memory_space<vmem>>, vector<72x4xbf16>,
    %212 = vector.extract_strided_slice %209 {offsets = [0, 0], sizes = [72, 4], strides = [1, 1]} : vector<72x8xbf16> to vector<72x4xbf16>
    %c72 = arith.constant 72 : index
    %c0_185 = arith.constant 0 : index
    %213 = vector.load %arg13[%c72, %c0_185] : memref<216x8xbf16, #tpu.memory_space<vmem>>, vector<72x4xbf16>
    tpu.vector_store %arg13[%c72, %c0_185], %212 {strides = array<i32>} : memref<216x8xbf16, #tpu.memory_space<vmem>>, vector<72x4xbf16>,
    %214 = vector.extract_strided_slice %203 {offsets = [0, 2], sizes = [72, 4], strides = [1, 1]} : vector<72x8xbf16> to vector<72x4xbf16>
    %c144 = arith.constant 144 : index
    %c0_186 = arith.constant 0 : index
    %215 = vector.load %arg13[%c144, %c0_186] : memref<216x8xbf16, #tpu.memory_space<vmem>>, vector<72x4xbf16>
    tpu.vector_store %arg13[%c144, %c0_186], %214 {strides = array<i32>} : memref<216x8xbf16, #tpu.memory_space<vmem>>, vector<72x4xbf16>,
    %216 = vector.extract_strided_slice %209 {offsets = [0, 0], sizes = [72, 4], strides = [1, 1]} : vector<72x8xbf16> to vector<72x4xbf16>
    %c0_187 = arith.constant 0 : index
    %c4_188 = arith.constant 4 : index
    %217 = vector.load %arg13[%c0_187, %c4_188] : memref<216x8xbf16, #tpu.memory_space<vmem>>, vector<72x4xbf16>
    tpu.vector_store %arg13[%c0_187, %c4_188], %216 {strides = array<i32>} : memref<216x8xbf16, #tpu.memory_space<vmem>>, vector<72x4xbf16>,
    %218 = vector.extract_strided_slice %203 {offsets = [0, 2], sizes = [72, 4], strides = [1, 1]} : vector<72x8xbf16> to vector<72x4xbf16>
    %c72_189 = arith.constant 72 : index
    %c4_190 = arith.constant 4 : index
    %219 = vector.load %arg13[%c72_189, %c4_190] : memref<216x8xbf16, #tpu.memory_space<vmem>>, vector<72x4xbf16>
    tpu.vector_store %arg13[%c72_189, %c4_190], %218 {strides = array<i32>} : memref<216x8xbf16, #tpu.memory_space<vmem>>, vector<72x4xbf16>,
    %220 = vector.extract_strided_slice %209 {offsets = [0, 2], sizes = [72, 4], strides = [1, 1]} : vector<72x8xbf16> to vector<72x4xbf16>
    %c144_191 = arith.constant 144 : index
    %c4_192 = arith.constant 4 : index
    %221 = vector.load %arg13[%c144_191, %c4_192] : memref<216x8xbf16, #tpu.memory_space<vmem>>, vector<72x4xbf16>
    tpu.vector_store %arg13[%c144_191, %c4_192], %220 {strides = array<i32>} : memref<216x8xbf16, #tpu.memory_space<vmem>>, vector<72x4xbf16>,
    %c0_193 = arith.constant 0 : index
    %c0_194 = arith.constant 0 : index
    %222 = vector.load %arg7[%c0_193, %c0_194] : memref<72x216xbf16, #tpu.memory_space<vmem>>, vector<72x216xbf16>
    %c0_195 = arith.constant 0 : index
    %c0_196 = arith.constant 0 : index
    %223 = vector.load %arg13[%c0_195, %c0_196] : memref<216x8xbf16, #tpu.memory_space<vmem>>, vector<216x8xbf16>
    %cst_197 = arith.constant dense<0.000000e+00> : vector<72x8xf32>
    %224 = tpu.matmul %222, %223, %cst_197 {dimension_numbers = #tpu.dot_dimension_numbers<[1], [0], [0], [1], [0, 0, 1, 1], [], []>} : vector<72x216xbf16>, vector<216x8xbf16>, vector<72x8xf32> -> vector<72x8xf32>
    %cst_198 = arith.constant dense<0.000000e+00> : vector<72xf32>
    %225 = vector.multi_reduction <add>, %224, %cst_198 [1] : vector<72x8xf32> to vector<72xf32>
    %226 = vector.shape_cast %225 : vector<72xf32> to vector<72x1xf32>
    %cst_199 = arith.constant 1.250000e-01 : f32
    %227 = vector.broadcast %cst_199 : f32 to vector<72x1xf32>
    %228 = arith.mulf %226, %227 : vector<72x1xf32>
    %229 = arith.mulf %224, %224 : vector<72x8xf32>
    %cst_200 = arith.constant dense<0.000000e+00> : vector<72xf32>
    %230 = vector.multi_reduction <add>, %229, %cst_200 [1] : vector<72x8xf32> to vector<72xf32>
    %231 = vector.shape_cast %230 : vector<72xf32> to vector<72x1xf32>
    %cst_201 = arith.constant 1.250000e-01 : f32
    %232 = vector.broadcast %cst_201 : f32 to vector<72x1xf32>
    %233 = arith.mulf %231, %232 : vector<72x1xf32>
    %234 = arith.mulf %228, %228 : vector<72x1xf32>
    %235 = arith.subf %233, %234 : vector<72x1xf32>
    %cst_202 = arith.constant 0.000000e+00 : f32
    %236 = vector.broadcast %cst_202 : f32 to vector<72x1xf32>
    %237 = arith.maximumf %235, %236 : vector<72x1xf32>
    %c0_203 = arith.constant 0 : index
    %c0_204 = arith.constant 0 : index
    %238 = vector.load %arg8[%c0_203, %c0_204] : memref<72x1xf32, #tpu.memory_space<vmem>>, vector<72x1xf32>
    %cst_205 = arith.constant 9.99999974E-6 : f32
    %239 = vector.broadcast %cst_205 : f32 to vector<72x1xf32>
    %240 = arith.addf %237, %239 : vector<72x1xf32>
    %241 = math.rsqrt %240 : vector<72x1xf32>
    %242 = arith.mulf %238, %241 : vector<72x1xf32>
    %c0_206 = arith.constant 0 : index
    %c0_207 = arith.constant 0 : index
    %243 = vector.load %arg9[%c0_206, %c0_207] : memref<72x1xf32, #tpu.memory_space<vmem>>, vector<72x1xf32>
    %244 = arith.mulf %228, %242 : vector<72x1xf32>
    %245 = arith.subf %243, %244 : vector<72x1xf32>
    %246 = vector.broadcast %242 : vector<72x1xf32> to vector<72x8xf32>
    %247 = arith.mulf %224, %246 : vector<72x8xf32>
    %248 = vector.broadcast %245 : vector<72x1xf32> to vector<72x8xf32>
    %249 = arith.addf %247, %248 : vector<72x8xf32>
    %250 = vector.extract_strided_slice %249 {offsets = [0, 0], sizes = [72, 4], strides = [1, 1]} : vector<72x8xf32> to vector<72x4xf32>
    %251 = vector.extract_strided_slice %249 {offsets = [0, 4], sizes = [72, 4], strides = [1, 1]} : vector<72x8xf32> to vector<72x4xf32>
    %252 = arith.maximumf %250, %251 : vector<72x4xf32>
    %cst_208 = arith.constant 0.000000e+00 : f32
    %253 = vector.broadcast %cst_208 : f32 to vector<72x4xf32>
    %254 = arith.maximumf %252, %253 : vector<72x4xf32>
    %c0_209 = arith.constant 0 : index
    %c0_210 = arith.constant 0 : index
    %255 = vector.load %arg10[%c0_209, %c0_210] : memref<72x4xf32, #tpu.memory_space<vmem>>, vector<72x4xf32>
    tpu.vector_store %arg10[%c0_209, %c0_210], %254 {strides = array<i32>} : memref<72x4xf32, #tpu.memory_space<vmem>>, vector<72x4xf32>,
    return
  }
}

</mosaic_0001>

<bundles_post_ra>
// kernel: tpu_custom_call.1
= control target key start
LH: loop header
LB: loop body
LE: loop exit
PB: predicated region body
PF: predicated region fallthrough
CT: control target
= control target key end

     0   :  { %v3096_v2 = vmov 0   ;;  %s3097_s17 = smov 10   ;;  %s3098_s22 = smov 20   ;;  %vm39_vm0 = vcmask 76800   ;;  %vm57_vm1 = vcmask 76864   ;;  %vm82_vm2 = vcmask 158800   ;;  %s4751_s0 = inlined_call_operand.vmem [shape: bf16[8,24,12], index: 0, kind: input, shape index: {}]   ;;  %s4752_s1 = inlined_call_operand.vmem [shape: bf16[56,72], index: 1, kind: input, shape index: {}]   ;;  %s4753_s2 = inlined_call_operand.vmem [shape: f32[56,1], index: 2, kind: input, shape index: {}]   ;;  %s4754_s3 = inlined_call_operand.vmem [shape: f32[56,1], index: 3, kind: input, shape index: {}]   ;;  %s4755_s4 = inlined_call_operand.vmem [shape: bf16[72,168], index: 4, kind: input, shape index: {}]   ;;  %s4756_s5 = inlined_call_operand.vmem [shape: f32[72,1], index: 5, kind: input, shape index: {}]   ;;  %s4757_s6 = inlined_call_operand.vmem [shape: f32[72,1], index: 6, kind: input, shape index: {}]   ;;  %s4758_s7 = inlined_call_operand.vmem [shape: bf16[72,216], index: 7, kind: input, shape index: {}]   ;;  %s4759_s8 = inlined_call_operand.vmem [shape: f32[72,1], index: 8, kind: input, shape index: {}]   ;;  %s4760_s9 = inlined_call_operand.vmem [shape: f32[72,1], index: 9, kind: input, shape index: {}]   ;;  %s4761_s10 = inlined_call_operand.vmem [shape: f32[72,4], index: 10, kind: output, shape index: {}]  }
   0x1   :  { %v2743_v0 = vld [vmem:[%s4751_s0 + $0x2c] sm:$0xf]  ;;  %v2741_v1 = vld [vmem:[%s4751_s0 + $0x24] sm:$0xf]  ;;  %2947 = vset.pattern.permute.xlu0 %v3096_v2  ;;  %2948 = vset.pattern.permute.xlu1 %v3096_v2  ;;  %v2752_v3 = vld [vmem:[%s4751_s0 + $0x38] sm:$0xf] }
   0x2   :  { %115 = vrot.lane.b32.xlu0 %v2743_v0, %s3097_s17  ;;  %111 = vrot.lane.b32.xlu1 %v2741_v1, %s3097_s17  ;;  %v2742_v4 = vld [vmem:[%s4751_s0 + $0x28] sm:$0xf]  ;;  %v2761_v5 = vld [vmem:[%s4751_s0 + $0x44] sm:$0xf]  ;;  %s3099_s27 = smov 30   ;;  %s3100_s12 = smov 40  }
   0x3   :  { %2309 = vmatprep.subr.bf16.mxu0 %v3096_v2  ;;  %v2750_v6 = vld [vmem:[%s4751_s0 + $0x30] sm:$0xf]  ;;  %v2751_v7 = vld [vmem:[%s4751_s0 + $0x34] sm:$0xf]  ;;  %v2739_v9 = vld [vmem:[%s4751_s0 + $0x1c] sm:$0xf] }
   0x4   :  { %v2770_v8 = vld [vmem:[%s4751_s0 + $0x50] sm:$0xf]  ;;  %v2740_v10 = vld [vmem:[%s4751_s0 + $0x20] sm:$0xf]  ;;  %v2759_v11 = vld [vmem:[%s4751_s0 + $0x3c] sm:$0xf] }
   0x5   :  { %v2760_v12 = vld [vmem:[%s4751_s0 + $0x40] sm:$0xf]  ;;  %v2779_v14 = vld [vmem:[%s4751_s0 + $0x5c] sm:$0xf]  ;;  %v2748_v15 = vld [vmem:[%s4751_s0 + $0x28] sm:$0xf] }
   0x6   :  { %181 = vrot.lane.b32.xlu0 %v2752_v3, %s3098_s22  ;;  %113 = vrot.lane.b32.xlu1 %v2742_v4, %s3097_s17  ;;  %v2734_v13 = vld [vmem:[%s4751_s0 + $0x20] sm:$0xf]  ;;  %v2732_v16 = vld [vmem:[%s4751_s0 + $0x18] sm:$0xf]  ;;  %s3101_s20 = smov 50   ;;  %s3102_s16 = smov 58  }
   0x7   :  { %56 = vst.msk [vmem:[#allocation2 + $0x20] sm:$0xf] %vm39_vm0, %v2734_v13  ;;  %54 = vst.msk [vmem:[#allocation2 + $0x18] sm:$0xf] %vm39_vm0, %v2732_v16  ;;  %v2733_v17 = vld [vmem:[%s4751_s0 + $0x1c] sm:$0xf] }
   0x8   :  { %66 = vst.msk [vmem:[#allocation2 + $0x20] sm:$0xf] %vm57_vm1, %v3096_v2  ;;  %64 = vst.msk [vmem:[#allocation2 + $0x18] sm:$0xf] %vm57_vm1, %v3096_v2  ;;  %v2730_v18 = vld [vmem:[%s4751_s0 + $0x10] sm:$0xf] }
   0x9   :  { %55 = vst.msk [vmem:[#allocation2 + $0x1c] sm:$0xf] %vm39_vm0, %v2733_v17  ;;  %v2731_v19 = vld [vmem:[%s4751_s0 + $0x14] sm:$0xf]  ;;  %48 = vst.msk [vmem:[#allocation2 + $0x10] sm:$0xf] %vm39_vm0, %v2730_v18 }
   0xa   :  { %247 = vrot.lane.b32.xlu0 %v2761_v5, %s3099_s27  ;;  %177 = vrot.lane.b32.xlu1 %v2750_v6, %s3098_s22  ;;  %65 = vst.msk [vmem:[#allocation2 + $0x1c] sm:$0xf] %vm57_vm1, %v3096_v2  ;;  %v38_v20 = vld [vmem:[%s4751_s0 + $0x8] sm:$0xf]  ;;  %v2749_v21 = vld [vmem:[%s4751_s0 + $0x2c] sm:$0xf] }
   0xb   :  { %49 = vst.msk [vmem:[#allocation2 + $0x14] sm:$0xf] %vm39_vm0, %v2731_v19  ;;  %v2768_v22 = vld [vmem:[%s4751_s0 + $0x48] sm:$0xf]  ;;  %42 = vst.msk [vmem:[#allocation2 + $0x8] sm:$0xf] %vm39_vm0, %v38_v20 }
   0xc   :  { %62 = vst.msk [vmem:[#allocation2 + $0x10] sm:$0xf] %vm57_vm1, %v3096_v2  ;;  %63 = vst.msk [vmem:[#allocation2 + $0x14] sm:$0xf] %vm57_vm1, %v3096_v2  ;;  %v2729_v23 = vld [vmem:[%s4751_s0 + $0xc] sm:$0xf] }
   0xd   :  { %60 = vst.msk [vmem:[#allocation2 + $0x8] sm:$0xf] %vm57_vm1, %v3096_v2  ;;  %v2769_v24 = vld [vmem:[%s4751_s0 + $0x4c] sm:$0xf]  ;;  %v436_v25 = vld [vmem:[%s4751_s0 + $0x8] sm:$0xf] }
   0xe   :  { %179 = vrot.lane.b32.xlu0 %v2751_v7, %s3098_s22  ;;  %313 = vrot.lane.b32.xlu1 %v2770_v8, %s3100_s12  ;;  %47 = vst.msk [vmem:[#allocation2 + $0xc] sm:$0xf] %vm39_vm0, %v2729_v23  ;;  %v2737_v26 = vld [vmem:[%s4751_s0 + $0x14] sm:$0xf]  ;;  %v2738_v27 = vld [vmem:[%s4751_s0 + $0x18] sm:$0xf] }
   0xf   :  { %61 = vst.msk [vmem:[#allocation2 + $0xc] sm:$0xf] %vm57_vm1, %v3096_v2  ;;  %v2757_v28 = vld [vmem:[%s4751_s0 + $0x34] sm:$0xf]  ;;  %v2758_v29 = vld [vmem:[%s4751_s0 + $0x38] sm:$0xf] }
  0x10   :  { %v2777_v30 = vld [vmem:[%s4751_s0 + $0x54] sm:$0xf]  ;;  %v2778_v31 = vld [vmem:[%s4751_s0 + $0x58] sm:$0xf]  ;;  %v2746_v33 = vld [vmem:[%s4751_s0 + $0x20] sm:$0xf] }
  0x11   :  { %v2791_v32 = vld [vmem:[%s4751_s0 + $0x14] sm:$0xf]  ;;  %s3103_s21 = smov 68   ;;  %v37_v34 = vld [vmem:[%s4751_s0 + $0x4] sm:$0xf]  ;;  %s3104_s18 = smov 60  }
  0x12   :  { %94 = vrot.lane.b32.xlu0 %v2739_v9, %s3097_s17  ;;  %96 = vrot.lane.b32.xlu1 %v2740_v10, %s3097_s17  ;;  %v36_v35 = vld [vmem:[%s4751_s0] sm:$0xf]  ;;  %v2747_v36 = vld [vmem:[%s4751_s0 + $0x24] sm:$0xf]  ;;  %41 = vst.msk [vmem:[#allocation2 + $0x4] sm:$0xf] %vm39_vm0, %v37_v34 }
  0x13   :  { %v2766_v37 = vld [vmem:[%s4751_s0 + $0x40] sm:$0xf]  ;;  %40 = vst.msk [vmem:[#allocation2] sm:$0xf] %vm39_vm0, %v36_v35  ;;  %v2767_v38 = vld [vmem:[%s4751_s0 + $0x44] sm:$0xf] }
  0x14   :  { %59 = vst.msk [vmem:[#allocation2 + $0x4] sm:$0xf] %vm57_vm1, %v3096_v2  ;;  %58 = vst.msk [vmem:[#allocation2] sm:$0xf] %vm57_vm1, %v3096_v2  ;;  %v434_v39 = vld [vmem:[%s4751_s0] sm:$0xf] }
  0x15   :  { %v435_v40 = vld [vmem:[%s4751_s0 + $0x4] sm:$0xf]  ;;  %v2735_v41 = vld [vmem:[%s4751_s0 + $0xc] sm:$0xf]  ;;  %v2736_v42 = vld [vmem:[%s4751_s0 + $0x10] sm:$0xf] }
  0x16   :  { %243 = vrot.lane.b32.xlu0 %v2759_v11, %s3099_s27  ;;  %245 = vrot.lane.b32.xlu1 %v2760_v12, %s3099_s27  ;;  %v2755_v43 = vld [vmem:[%s4751_s0 + $0x2c] sm:$0xf]  ;;  %v2756_v44 = vld [vmem:[%s4751_s0 + $0x30] sm:$0xf]  ;;  %s3105_s13 = smov 70   ;;  %vm123_vm3 = vcmask 158864  }
  0x17   :  { %v2775_v45 = vld [vmem:[%s4751_s0 + $0x4c] sm:$0xf]  ;;  %v2776_v46 = vld [vmem:[%s4751_s0 + $0x50] sm:$0xf]  ;;  %v2744_v49 = vld [vmem:[%s4751_s0 + $0x18] sm:$0xf] }
  0x18   :  { %v2789_v47 = vld [vmem:[%s4751_s0 + $0xc] sm:$0xf]  ;;  %v2790_v48 = vld [vmem:[%s4751_s0 + $0x10] sm:$0xf]  ;;  %v2745_v50 = vld [vmem:[%s4751_s0 + $0x1c] sm:$0xf] }
  0x19   :  { %v2764_v51 = vld [vmem:[%s4751_s0 + $0x38] sm:$0xf]  ;;  %v2765_v52 = vld [vmem:[%s4751_s0 + $0x3c] sm:$0xf]  ;;  %v2753_v55 = vld [vmem:[%s4751_s0 + $0x24] sm:$0xf] }
  0x1a   :  { %379 = vrot.lane.b32.xlu0 %v2779_v14, %s3101_s20  ;;  %160 = vrot.lane.b32.xlu1 %v2748_v15, %s3098_s22  ;;  %v2784_v53 = vld [vmem:[%s4751_s0 + $0x58] sm:$0xf]  ;;  %v2785_v54 = vld [vmem:[%s4751_s0 + $0x5c] sm:$0xf]  ;;  %vm148_vm4 = vcmask 240800   ;;  %vm189_vm5 = vcmask 240864  }
  0x1b   :  { %v2754_v56 = vld [vmem:[%s4751_s0 + $0x28] sm:$0xf]  ;;  %v2773_v57 = vld [vmem:[%s4751_s0 + $0x44] sm:$0xf]  ;;  %v2762_v61 = vld [vmem:[%s4751_s0 + $0x30] sm:$0xf] }
  0x1c   :  { %v2774_v58 = vld [vmem:[%s4751_s0 + $0x48] sm:$0xf]  ;;  %v482_v59 = vld [vmem:[%s4751_s0 + $0x4] sm:$0xf]  ;;  %v2763_v62 = vld [vmem:[%s4751_s0 + $0x34] sm:$0xf] }
  0x1d   :  { %v483_v60 = vld [vmem:[%s4751_s0 + $0x8] sm:$0xf]  ;;  %v2782_v63 = vld [vmem:[%s4751_s0 + $0x50] sm:$0xf]  ;;  %v2783_v0 = vld [vmem:[%s4751_s0 + $0x54] sm:$0xf] }
  0x1e   :  { %162 = vrot.lane.b32.xlu0 %v2749_v21, %s3098_s22  ;;  %309 = vrot.lane.b32.xlu1 %v2768_v22, %s3100_s12  ;;  %v2771_v1 = vld [vmem:[%s4751_s0 + $0x3c] sm:$0xf]  ;;  %v2772_v3 = vld [vmem:[%s4751_s0 + $0x40] sm:$0xf]  ;;  %vm214_vm6 = vcmask 322800   ;;  %vm255_vm7 = vcmask 322864  }
  0x1f   :  { %v2788_v4 = vld [vmem:[%s4751_s0 + $0x5c] sm:$0xf]  ;;  %v481_v5 = vld [vmem:[%s4751_s0] sm:$0xf]  ;;  %v2780_v6 = vld [vmem:[%s4751_s0 + $0x48] sm:$0xf] }
  0x20   :  { %v2781_v9 = vld [vmem:[%s4751_s0 + $0x4c] sm:$0xf]  ;;  %v2786_v10 = vld [vmem:[%s4751_s0 + $0x54] sm:$0xf]  ;;  %v2787_v13 = vld [vmem:[%s4751_s0 + $0x58] sm:$0xf] }
  0x21   :  { %v2989_v16 = vld [vmem:[%s4752_s1] sm:$0xff]   ;;  %vm588_vm8 = vcmask 588800   ;;  %vm280_vm9 = vcmask 404800   ;;  %vm321_vm10 = vcmask 404864   ;;  %vm346_vm11 = vcmask 486800   ;;  %s3108_s15 = smov 108  }
  0x22   :  { %311 = vrot.lane.b32.xlu0 %v2769_v24, %s3100_s12  ;;  %444 = vrot.lane.b32.xlu1 %v436_v25, %s3102_s16  ;;  %vm387_vm12 = vcmask 486864   ;;  %vm412_vm13 = vcmask 568800   ;;  %vm452_vm14 = vcmask 568848   ;;  %vm477_vm15 = vcmask 650800   ;;  %s3111_s19 = smov 76   ;;  %s3115_s23 = smov 2  }
  0x23   :  { %2911 = vmatprep.mubr.msk.bf16.mxu1 %vm588_vm8, %v2989_v16  ;;  %vm517_vm0 = vcmask 650848   ;;  %vm601_vm1 = vcmask 1043456   ;;  %s3116_s24 = smov 104   ;;  %s3117_s25 = smov 92  }
  0x26   :  { %77 = vrot.lane.b32.xlu0 %v2737_v26, %s3097_s17  ;;  %92 = vrot.lane.b32.xlu1 %v2738_v27, %s3097_s17 }
  0x2a   :  { %226 = vrot.lane.b32.xlu0 %v2757_v28, %s3099_s27  ;;  %228 = vrot.lane.b32.xlu1 %v2758_v29, %s3099_s27 }
  0x2e   :  { %375 = vrot.lane.b32.xlu0 %v2777_v30, %s3101_s20  ;;  %377 = vrot.lane.b32.xlu1 %v2778_v31, %s3101_s20 }
  0x32   :  { %509 = vrot.lane.b32.xlu0 %v2791_v32, %s3103_s21  ;;  %143 = vrot.lane.b32.xlu1 %v2746_v33, %s3098_s22 }
  0x36   :  { %158 = vrot.lane.b32.xlu0 %v2747_v36, %s3098_s22  ;;  %292 = vrot.lane.b32.xlu1 %v2766_v37, %s3100_s12 }
  0x3a   :  { %294 = vrot.lane.b32.xlu0 %v2767_v38, %s3100_s12  ;;  %440 = vrot.lane.b32.xlu1 %v434_v39, %s3102_s16 }
  0x3e   :  { %442 = vrot.lane.b32.xlu0 %v435_v40, %s3102_s16  ;;  %73 = vrot.lane.b32.xlu1 %v2735_v41, %s3097_s17 }
  0x42   :  { %75 = vrot.lane.b32.xlu0 %v2736_v42, %s3097_s17  ;;  %209 = vrot.lane.b32.xlu1 %v2755_v43, %s3099_s27  ;;  %s3112_s17 = smov 84  }
  0x46   :  { %224 = vrot.lane.b32.xlu0 %v2756_v44, %s3099_s27  ;;  %358 = vrot.lane.b32.xlu1 %v2775_v45, %s3101_s20 }
  0x4a   :  { %360 = vrot.lane.b32.xlu0 %v2776_v46, %s3101_s20  ;;  %505 = vrot.lane.b32.xlu1 %v2789_v47, %s3103_s21 }
  0x4e   :  { %507 = vrot.lane.b32.xlu0 %v2790_v48, %s3103_s21  ;;  %139 = vrot.lane.b32.xlu1 %v2744_v49, %s3098_s22 }
  0x52   :  { %141 = vrot.lane.b32.xlu0 %v2745_v50, %s3098_s22  ;;  %275 = vrot.lane.b32.xlu1 %v2764_v51, %s3100_s12  ;;  %s3113_s22 = smov 14  }
  0x56   :  { %290 = vrot.lane.b32.xlu0 %v2765_v52, %s3100_s12  ;;  %424 = vrot.lane.b32.xlu1 %v2784_v53, %s3104_s18 }
  0x5a   :  { %426 = vrot.lane.b32.xlu0 %v2785_v54, %s3104_s18  ;;  %205 = vrot.lane.b32.xlu1 %v2753_v55, %s3099_s27 }
  0x5e   :  { %207 = vrot.lane.b32.xlu0 %v2754_v56, %s3099_s27  ;;  %341 = vrot.lane.b32.xlu1 %v2773_v57, %s3101_s20  ;;  %s3109_s27 = smov 88  }
  0x62   :  { %356 = vrot.lane.b32.xlu0 %v2774_v58, %s3101_s20  ;;  %489 = vrot.lane.b32.xlu1 %v482_v59, %s3103_s21 }
  0x66   :  { %491 = vrot.lane.b32.xlu0 %v483_v60, %s3103_s21  ;;  %271 = vrot.lane.b32.xlu1 %v2762_v61, %s3100_s12 }
  0x6a   :  { %273 = vrot.lane.b32.xlu0 %v2763_v62, %s3100_s12  ;;  %407 = vrot.lane.b32.xlu1 %v2782_v63, %s3104_s18  ;;  %s3120_s12 = smov 126  }
  0x6e   :  { %422 = vrot.lane.b32.xlu0 %v2783_v0, %s3104_s18  ;;  %337 = vrot.lane.b32.xlu1 %v2771_v1, %s3101_s20 }
  0x72   :  { %339 = vrot.lane.b32.xlu0 %v2772_v3, %s3101_s20  ;;  %472 = vrot.lane.b32.xlu1 %v2788_v4, %s3105_s13  ;;  %s3110_s20 = smov 96  }
  0x74   :  { %v116_v7 = vpop.permute.xlu0 %115  ;;  %v112_v8 = vpop.permute.xlu1 %111 }
  0x75   :  { %122 = vst.msk [vmem:[#allocation2 + $0x20] sm:$0xf] %vm82_vm2, %v116_v7  ;;  %120 = vst.msk [vmem:[#allocation2 + $0x18] sm:$0xf] %vm82_vm2, %v112_v8 }
  0x76   :  { %487 = vrot.lane.b32.xlu0 %v481_v5, %s3103_s21  ;;  %132 = vst.msk [vmem:[#allocation2 + $0x20] sm:$0xf] %vm123_vm3, %v3096_v2  ;;  %130 = vst.msk [vmem:[#allocation2 + $0x18] sm:$0xf] %vm123_vm3, %v3096_v2  ;;  %403 = vrot.lane.b32.xlu1 %v2780_v6, %s3104_s18  ;;  %s3114_s21 = smov 116  }
  0x78   :  { %v182_v11 = vpop.permute.xlu0 %181  ;;  %v114_v12 = vpop.permute.xlu1 %113 }
  0x79   :  { %188 = vst.msk [vmem:[#allocation2 + $0x20] sm:$0xf] %vm148_vm4, %v182_v11 }
  0x7a   :  { %121 = vst.msk [vmem:[#allocation2 + $0x1c] sm:$0xf] %vm82_vm2, %v114_v12  ;;  %405 = vrot.lane.b32.xlu0 %v2781_v9, %s3104_s18  ;;  %468 = vrot.lane.b32.xlu1 %v2786_v10, %s3105_s13 }
  0x7b   :  { %198 = vst.msk [vmem:[#allocation2 + $0x20] sm:$0xf] %vm189_vm5, %v3096_v2 }
  0x7c   :  { %131 = vst.msk [vmem:[#allocation2 + $0x1c] sm:$0xf] %vm123_vm3, %v3096_v2  ;;  %v248_v14 = vpop.permute.xlu0 %247  ;;  %v178_v15 = vpop.permute.xlu1 %177 }
  0x7d   :  { %254 = vst.msk [vmem:[#allocation2 + $0x20] sm:$0xf] %vm214_vm6, %v248_v14 }
  0x7e   :  { %186 = vst.msk [vmem:[#allocation2 + $0x18] sm:$0xf] %vm148_vm4, %v178_v15  ;;  %470 = vrot.lane.b32.xlu0 %v2787_v13, %s3105_s13  ;;  %s3121_s13 = smov 114  }
  0x7f   :  { %196 = vst.msk [vmem:[#allocation2 + $0x18] sm:$0xf] %vm189_vm5, %v3096_v2 }
  0x80   :  { %264 = vst.msk [vmem:[#allocation2 + $0x20] sm:$0xf] %vm255_vm7, %v3096_v2  ;;  %v180_v17 = vpop.permute.xlu0 %179  ;;  %v314_v18 = vpop.permute.xlu1 %313 }
  0x81   :  { %187 = vst.msk [vmem:[#allocation2 + $0x1c] sm:$0xf] %vm148_vm4, %v180_v17  ;;  %v2990_v17 = vld [vmem:[%s4752_s1 + $0x8] sm:$0xff]  }
  0x82   :  { %320 = vst.msk [vmem:[#allocation2 + $0x20] sm:$0xf] %vm280_vm9, %v314_v18  ;;  %v2991_v18 = vld [vmem:[%s4752_s1 + $0x10] sm:$0xff]  }
  0x83   :  { %197 = vst.msk [vmem:[#allocation2 + $0x1c] sm:$0xf] %vm189_vm5, %v3096_v2 }
  0x84   :  { %330 = vst.msk [vmem:[#allocation2 + $0x20] sm:$0xf] %vm321_vm10, %v3096_v2  ;;  %v95_v19 = vpop.permute.xlu0 %94  ;;  %v97_v20 = vpop.permute.xlu1 %96 }
  0x85   :  { %102 = vst.msk [vmem:[#allocation2 + $0x10] sm:$0xf] %vm82_vm2, %v95_v19  ;;  %103 = vst.msk [vmem:[#allocation2 + $0x14] sm:$0xf] %vm82_vm2, %v97_v20  ;;  %v2992_v19 = vld [vmem:[%s4752_s1 + $0x18] ss:$0 sps:$4 sm:$0xff]  }
  0x86   :  { %128 = vst.msk [vmem:[#allocation2 + $0x10] sm:$0xf] %vm123_vm3, %v3096_v2  ;;  %129 = vst.msk [vmem:[#allocation2 + $0x14] sm:$0xf] %vm123_vm3, %v3096_v2 }
  0x88   :  { %v244_v21 = vpop.permute.xlu0 %243  ;;  %v246_v22 = vpop.permute.xlu1 %245 }
  0x89   :  { %252 = vst.msk [vmem:[#allocation2 + $0x18] sm:$0xf] %vm214_vm6, %v244_v21  ;;  %253 = vst.msk [vmem:[#allocation2 + $0x1c] sm:$0xf] %vm214_vm6, %v246_v22 }
  0x8a   :  { %262 = vst.msk [vmem:[#allocation2 + $0x18] sm:$0xf] %vm255_vm7, %v3096_v2  ;;  %263 = vst.msk [vmem:[#allocation2 + $0x1c] sm:$0xf] %vm255_vm7, %v3096_v2 }
  0x8c   :  { %v380_v23 = vpop.permute.xlu0 %379  ;;  %v161_v24 = vpop.permute.xlu1 %160 }
  0x8d   :  { %386 = vst.msk [vmem:[#allocation2 + $0x20] sm:$0xf] %vm346_vm11, %v380_v23 }
  0x8e   :  { %168 = vst.msk [vmem:[#allocation2 + $0x10] sm:$0xf] %vm148_vm4, %v161_v24 }
  0x8f   :  { %194 = vst.msk [vmem:[#allocation2 + $0x10] sm:$0xf] %vm189_vm5, %v3096_v2 }
  0x90   :  { %396 = vst.msk [vmem:[#allocation2 + $0x20] sm:$0xf] %vm387_vm12, %v3096_v2  ;;  %v163_v25 = vpop.permute.xlu0 %162  ;;  %v310_v26 = vpop.permute.xlu1 %309 }
  0x91   :  { %169 = vst.msk [vmem:[#allocation2 + $0x14] sm:$0xf] %vm148_vm4, %v163_v25 }
  0x92   :  { %318 = vst.msk [vmem:[#allocation2 + $0x18] sm:$0xf] %vm280_vm9, %v310_v26 }
  0x93   :  { %195 = vst.msk [vmem:[#allocation2 + $0x14] sm:$0xf] %vm189_vm5, %v3096_v2 }
  0x94   :  { %328 = vst.msk [vmem:[#allocation2 + $0x18] sm:$0xf] %vm321_vm10, %v3096_v2  ;;  %v312_v27 = vpop.permute.xlu0 %311  ;;  %v445_v28 = vpop.permute.xlu1 %444 }
  0x95   :  { %319 = vst.msk [vmem:[#allocation2 + $0x1c] sm:$0xf] %vm280_vm9, %v312_v27 }
  0x96   :  { %451 = vst.msk [vmem:[#allocation2 + $0x20] sm:$0xf] %vm412_vm13, %v445_v28 }
  0x97   :  { %329 = vst.msk [vmem:[#allocation2 + $0x1c] sm:$0xf] %vm321_vm10, %v3096_v2 }
  0x98   :  { %461 = vst.msk [vmem:[#allocation2 + $0x20] sm:$0xf] %vm452_vm14, %v3096_v2  ;;  %v78_v29 = vpop.permute.xlu0 %77  ;;  %v93_v30 = vpop.permute.xlu1 %92 }
  0x99   :  { %85 = vst.msk [vmem:[#allocation2 + $0x8] sm:$0xf] %vm82_vm2, %v78_v29  ;;  %101 = vst.msk [vmem:[#allocation2 + $0xc] sm:$0xf] %vm82_vm2, %v93_v30 }
  0x9a   :  { %126 = vst.msk [vmem:[#allocation2 + $0x8] sm:$0xf] %vm123_vm3, %v3096_v2  ;;  %127 = vst.msk [vmem:[#allocation2 + $0xc] sm:$0xf] %vm123_vm3, %v3096_v2 }
  0x9c   :  { %v227_v31 = vpop.permute.xlu0 %226  ;;  %v229_v32 = vpop.permute.xlu1 %228 }
  0x9d   :  { %234 = vst.msk [vmem:[#allocation2 + $0x10] sm:$0xf] %vm214_vm6, %v227_v31  ;;  %235 = vst.msk [vmem:[#allocation2 + $0x14] sm:$0xf] %vm214_vm6, %v229_v32 }
  0x9e   :  { %260 = vst.msk [vmem:[#allocation2 + $0x10] sm:$0xf] %vm255_vm7, %v3096_v2  ;;  %261 = vst.msk [vmem:[#allocation2 + $0x14] sm:$0xf] %vm255_vm7, %v3096_v2 }
  0xa0   :  { %v376_v33 = vpop.permute.xlu0 %375  ;;  %v378_v34 = vpop.permute.xlu1 %377 }
  0xa1   :  { %384 = vst.msk [vmem:[#allocation2 + $0x18] sm:$0xf] %vm346_vm11, %v376_v33  ;;  %385 = vst.msk [vmem:[#allocation2 + $0x1c] sm:$0xf] %vm346_vm11, %v378_v34 }
  0xa2   :  { %394 = vst.msk [vmem:[#allocation2 + $0x18] sm:$0xf] %vm387_vm12, %v3096_v2  ;;  %395 = vst.msk [vmem:[#allocation2 + $0x1c] sm:$0xf] %vm387_vm12, %v3096_v2 }
  0xa4   :  { %v510_v35 = vpop.permute.xlu0 %509  ;;  %v144_v36 = vpop.permute.xlu1 %143 }
  0xa5   :  { %516 = vst.msk [vmem:[#allocation2 + $0x20] sm:$0xf] %vm477_vm15, %v510_v35 }
  0xa6   :  { %151 = vst.msk [vmem:[#allocation2 + $0x8] sm:$0xf] %vm148_vm4, %v144_v36 }
  0xa7   :  { %526 = vst.msk [vmem:[#allocation2 + $0x20] sm:$0xf] %vm517_vm0, %v3096_v2 }
  0xa8   :  { %192 = vst.msk [vmem:[#allocation2 + $0x8] sm:$0xf] %vm189_vm5, %v3096_v2  ;;  %v159_v37 = vpop.permute.xlu0 %158  ;;  %v293_v38 = vpop.permute.xlu1 %292 }
  0xa9   :  { %167 = vst.msk [vmem:[#allocation2 + $0xc] sm:$0xf] %vm148_vm4, %v159_v37 }
  0xaa   :  { %300 = vst.msk [vmem:[#allocation2 + $0x10] sm:$0xf] %vm280_vm9, %v293_v38 }
  0xab   :  { %193 = vst.msk [vmem:[#allocation2 + $0xc] sm:$0xf] %vm189_vm5, %v3096_v2 }
  0xac   :  { %326 = vst.msk [vmem:[#allocation2 + $0x10] sm:$0xf] %vm321_vm10, %v3096_v2  ;;  %v295_v39 = vpop.permute.xlu0 %294  ;;  %v441_v40 = vpop.permute.xlu1 %440 }
  0xad   :  { %301 = vst.msk [vmem:[#allocation2 + $0x14] sm:$0xf] %vm280_vm9, %v295_v39 }
  0xae   :  { %449 = vst.msk [vmem:[#allocation2 + $0x18] sm:$0xf] %vm412_vm13, %v441_v40  ;;  %v2984_v41 = vld [vmem:[#allocation2 + $0x20] ss:$0 sps:$4 sm:$0xff]  }
  0xaf   :  { %327 = vst.msk [vmem:[#allocation2 + $0x14] sm:$0xf] %vm321_vm10, %v3096_v2  ;;  %2919 = vmatprep.subr.msk.bf16.mxu1 %vm601_vm1, %v2984_v41  ;;  %v603_v42 = vsel %vm601_vm1, %v2984_v41, 0 }
  0xb0   :  { %459 = vst.msk [vmem:[#allocation2 + $0x18] sm:$0xf] %vm452_vm14, %v3096_v2  ;;  %v443_v43 = vpop.permute.xlu0 %442  ;;  %v74_v44 = vpop.permute.xlu1 %73  ;;  %2902 = vmatpush3.bf16.msra.mxu1 %v603_v42 }
  0xb1   :  { %450 = vst.msk [vmem:[#allocation2 + $0x1c] sm:$0xf] %vm412_vm13, %v443_v43 }
  0xb2   :  { %83 = vst.msk [vmem:[#allocation2] sm:$0xf] %vm82_vm2, %v74_v44 }
  0xb3   :  { %460 = vst.msk [vmem:[#allocation2 + $0x1c] sm:$0xf] %vm452_vm14, %v3096_v2 }
  0xb4   :  { %124 = vst.msk [vmem:[#allocation2] sm:$0xf] %vm123_vm3, %v3096_v2  ;;  %v76_v45 = vpop.permute.xlu0 %75  ;;  %v210_v46 = vpop.permute.xlu1 %209 }
  0xb5   :  { %84 = vst.msk [vmem:[#allocation2 + $0x4] sm:$0xf] %vm82_vm2, %v76_v45  ;;  %vm669_vm2 = vcmask 654336  }
  0xb6   :  { %217 = vst.msk [vmem:[#allocation2 + $0x8] sm:$0xf] %vm214_vm6, %v210_v46 }
  0xb7   :  { %125 = vst.msk [vmem:[#allocation2 + $0x4] sm:$0xf] %vm123_vm3, %v3096_v2  ;;  %vm958_vm3 = vcmask 60416  }
  0xb8   :  { %258 = vst.msk [vmem:[#allocation2 + $0x8] sm:$0xf] %vm255_vm7, %v3096_v2  ;;  %v225_v47 = vpop.permute.xlu0 %224  ;;  %v359_v48 = vpop.permute.xlu1 %358 }
  0xb9   :  { %233 = vst.msk [vmem:[#allocation2 + $0xc] sm:$0xf] %vm214_vm6, %v225_v47 }
  0xba   :  { %366 = vst.msk [vmem:[#allocation2 + $0x10] sm:$0xf] %vm346_vm11, %v359_v48 }
  0xbb   :  { %259 = vst.msk [vmem:[#allocation2 + $0xc] sm:$0xf] %vm255_vm7, %v3096_v2 }
  0xbc   :  { %392 = vst.msk [vmem:[#allocation2 + $0x10] sm:$0xf] %vm387_vm12, %v3096_v2  ;;  %v361_v49 = vpop.permute.xlu0 %360  ;;  %v506_v50 = vpop.permute.xlu1 %505 }
  0xbd   :  { %367 = vst.msk [vmem:[#allocation2 + $0x14] sm:$0xf] %vm346_vm11, %v361_v49 }
  0xbe   :  { %514 = vst.msk [vmem:[#allocation2 + $0x18] sm:$0xf] %vm477_vm15, %v506_v50 }
  0xbf   :  { %393 = vst.msk [vmem:[#allocation2 + $0x14] sm:$0xf] %vm387_vm12, %v3096_v2 }
  0xc0   :  { %524 = vst.msk [vmem:[#allocation2 + $0x18] sm:$0xf] %vm517_vm0, %v3096_v2  ;;  %v508_v51 = vpop.permute.xlu0 %507  ;;  %v140_v52 = vpop.permute.xlu1 %139 }
  0xc1   :  { %515 = vst.msk [vmem:[#allocation2 + $0x1c] sm:$0xf] %vm477_vm15, %v508_v51 }
  0xc2   :  { %149 = vst.msk [vmem:[#allocation2] sm:$0xf] %vm148_vm4, %v140_v52 }
  0xc3   :  { %525 = vst.msk [vmem:[#allocation2 + $0x1c] sm:$0xf] %vm517_vm0, %v3096_v2 }
  0xc4   :  { %190 = vst.msk [vmem:[#allocation2] sm:$0xf] %vm189_vm5, %v3096_v2  ;;  %v142_v53 = vpop.permute.xlu0 %141  ;;  %v276_v54 = vpop.permute.xlu1 %275 }
  0xc5   :  { %150 = vst.msk [vmem:[#allocation2 + $0x4] sm:$0xf] %vm148_vm4, %v142_v53  ;;  %vm1043_vm4 = vcmask 126016  }
  0xc6   :  { %283 = vst.msk [vmem:[#allocation2 + $0x8] sm:$0xf] %vm280_vm9, %v276_v54 }
  0xc7   :  { %191 = vst.msk [vmem:[#allocation2 + $0x4] sm:$0xf] %vm189_vm5, %v3096_v2  ;;  %vm1107_vm5 = vcmask 126064  }
  0xc8   :  { %324 = vst.msk [vmem:[#allocation2 + $0x8] sm:$0xf] %vm321_vm10, %v3096_v2  ;;  %v291_v55 = vpop.permute.xlu0 %290  ;;  %v425_v56 = vpop.permute.xlu1 %424 }
  0xc9   :  { %299 = vst.msk [vmem:[#allocation2 + $0xc] sm:$0xf] %vm280_vm9, %v291_v55 }
  0xca   :  { %432 = vst.msk [vmem:[#allocation2 + $0x10] sm:$0xf] %vm412_vm13, %v425_v56  ;;  %v2985_v57 = vld [vmem:[#allocation2 + $0x18] sm:$0xff]  }
  0xcb   :  { %325 = vst.msk [vmem:[#allocation2 + $0xc] sm:$0xf] %vm321_vm10, %v3096_v2  ;;  %2903 = vmatprep.subr.bf16.mxu1 %v2985_v57 }
  0xcc   :  { %457 = vst.msk [vmem:[#allocation2 + $0x10] sm:$0xf] %vm452_vm14, %v3096_v2  ;;  %v427_v58 = vpop.permute.xlu0 %426  ;;  %v206_v59 = vpop.permute.xlu1 %205  ;;  %2904 = vmatpush3.bf16.msra.mxu1 %v2985_v57 }
  0xcd   :  { %433 = vst.msk [vmem:[#allocation2 + $0x14] sm:$0xf] %vm412_vm13, %v427_v58 }
  0xce   :  { %215 = vst.msk [vmem:[#allocation2] sm:$0xf] %vm214_vm6, %v206_v59 }
  0xcf   :  { %458 = vst.msk [vmem:[#allocation2 + $0x14] sm:$0xf] %vm452_vm14, %v3096_v2 }
  0xd0   :  { %256 = vst.msk [vmem:[#allocation2] sm:$0xf] %vm255_vm7, %v3096_v2  ;;  %v208_v60 = vpop.permute.xlu0 %207  ;;  %v342_v61 = vpop.permute.xlu1 %341 }
  0xd1   :  { %216 = vst.msk [vmem:[#allocation2 + $0x4] sm:$0xf] %vm214_vm6, %v208_v60  ;;  %vm1150_vm6 = vcmask 191616  }
  0xd2   :  { %349 = vst.msk [vmem:[#allocation2 + $0x8] sm:$0xf] %vm346_vm11, %v342_v61 }
  0xd3   :  { %257 = vst.msk [vmem:[#allocation2 + $0x4] sm:$0xf] %vm255_vm7, %v3096_v2  ;;  %vm1214_vm7 = vcmask 191664  }
  0xd4   :  { %390 = vst.msk [vmem:[#allocation2 + $0x8] sm:$0xf] %vm387_vm12, %v3096_v2  ;;  %v357_v62 = vpop.permute.xlu0 %356  ;;  %v490_v63 = vpop.permute.xlu1 %489 }
  0xd5   :  { %365 = vst.msk [vmem:[#allocation2 + $0xc] sm:$0xf] %vm346_vm11, %v357_v62 }
  0xd6   :  { %497 = vst.msk [vmem:[#allocation2 + $0x10] sm:$0xf] %vm477_vm15, %v490_v63 }
  0xd7   :  { %391 = vst.msk [vmem:[#allocation2 + $0xc] sm:$0xf] %vm387_vm12, %v3096_v2 }
  0xd8   :  { %522 = vst.msk [vmem:[#allocation2 + $0x10] sm:$0xf] %vm517_vm0, %v3096_v2  ;;  %v492_v0 = vpop.permute.xlu0 %491  ;;  %v272_v1 = vpop.permute.xlu1 %271 }
  0xd9   :  { %498 = vst.msk [vmem:[#allocation2 + $0x14] sm:$0xf] %vm477_vm15, %v492_v0 }
  0xda   :  { %281 = vst.msk [vmem:[#allocation2] sm:$0xf] %vm280_vm9, %v272_v1 }
  0xdb   :  { %523 = vst.msk [vmem:[#allocation2 + $0x14] sm:$0xf] %vm517_vm0, %v3096_v2 }
  0xdc   :  { %322 = vst.msk [vmem:[#allocation2] sm:$0xf] %vm321_vm10, %v3096_v2  ;;  %v274_v3 = vpop.permute.xlu0 %273  ;;  %v408_v4 = vpop.permute.xlu1 %407 }
  0xdd   :  { %282 = vst.msk [vmem:[#allocation2 + $0x4] sm:$0xf] %vm280_vm9, %v274_v3  ;;  %vm1321_vm9 = vcmask 257264  }
  0xde   :  { %415 = vst.msk [vmem:[#allocation2 + $0x8] sm:$0xf] %vm412_vm13, %v408_v4 }
  0xdf   :  { %323 = vst.msk [vmem:[#allocation2 + $0x4] sm:$0xf] %vm321_vm10, %v3096_v2  ;;  %vm1478_vm10 = vcmask 326656  }
  0xe0   :  { %455 = vst.msk [vmem:[#allocation2 + $0x8] sm:$0xf] %vm452_vm14, %v3096_v2  ;;  %v423_v5 = vpop.permute.xlu0 %422  ;;  %v338_v6 = vpop.permute.xlu1 %337 }
  0xe1   :  { %431 = vst.msk [vmem:[#allocation2 + $0xc] sm:$0xf] %vm412_vm13, %v423_v5 }
  0xe2   :  { %347 = vst.msk [vmem:[#allocation2] sm:$0xf] %vm346_vm11, %v338_v6  ;;  %v2986_v7 = vld [vmem:[#allocation2 + $0x10] sm:$0xff]  }
  0xe3   :  { %456 = vst.msk [vmem:[#allocation2 + $0xc] sm:$0xf] %vm452_vm14, %v3096_v2  ;;  %2905 = vmatprep.subr.bf16.mxu1 %v2986_v7 }
  0xe4   :  { %388 = vst.msk [vmem:[#allocation2] sm:$0xf] %vm387_vm12, %v3096_v2  ;;  %v340_v8 = vpop.permute.xlu0 %339  ;;  %v473_v9 = vpop.permute.xlu1 %472  ;;  %2906 = vmatpush3.bf16.msra.mxu1 %v2986_v7 }
  0xe5   :  { %348 = vst.msk [vmem:[#allocation2 + $0x4] sm:$0xf] %vm346_vm11, %v340_v8  ;;  %vm1569_vm11 = vcmask 261120  }
  0xe6   :  { %480 = vst.msk [vmem:[#allocation2 + $0x8] sm:$0xf] %vm477_vm15, %v473_v9 }
  0xe7   :  { %389 = vst.msk [vmem:[#allocation2 + $0x4] sm:$0xf] %vm387_vm12, %v3096_v2  ;;  %vm1940_vm12 = vcmask 27648  }
  0xe8   :  { %520 = vst.msk [vmem:[#allocation2 + $0x8] sm:$0xf] %vm517_vm0, %v3096_v2  ;;  %v488_v10 = vpop.permute.xlu0 %487  ;;  %v404_v11 = vpop.permute.xlu1 %403 }
  0xe9   :  { %496 = vst.msk [vmem:[#allocation2 + $0xc] sm:$0xf] %vm477_vm15, %v488_v10  ;;  %v754_v10 = vld [vmem:[%s4753_s2] sm:$0xff] }
  0xea   :  { %413 = vst.msk [vmem:[#allocation2] sm:$0xf] %vm412_vm13, %v404_v11 }
  0xeb   :  { %521 = vst.msk [vmem:[#allocation2 + $0xc] sm:$0xf] %vm517_vm0, %v3096_v2 }
  0xec   :  { %453 = vst.msk [vmem:[#allocation2] sm:$0xf] %vm452_vm14, %v3096_v2  ;;  %v406_v12 = vpop.permute.xlu0 %405  ;;  %v469_v13 = vpop.permute.xlu1 %468 }
  0xed   :  { %414 = vst.msk [vmem:[#allocation2 + $0x4] sm:$0xf] %vm412_vm13, %v406_v12  ;;  %vm2290_vm13 = vcmask 719872  }
  0xee   :  { %478 = vst.msk [vmem:[#allocation2] sm:$0xf] %vm477_vm15, %v469_v13 }
  0xef   :  { %454 = vst.msk [vmem:[#allocation2 + $0x4] sm:$0xf] %vm452_vm14, %v3096_v2  ;;  %vm2049_vm14 = vcmask 60448  }
  0xf0   :  { %518 = vst.msk [vmem:[#allocation2] sm:$0xf] %vm517_vm0, %v3096_v2  ;;  %v471_v14 = vpop.permute.xlu0 %470 }
  0xf1   :  { %479 = vst.msk [vmem:[#allocation2 + $0x4] sm:$0xf] %vm477_vm15, %v471_v14  ;;  %vm2381_vm15 = vcmask 64512  }
  0xf2   :  { %v2987_v15 = vld [vmem:[#allocation2 + $0x8] sm:$0xff]   ;;  %519 = vst.msk [vmem:[#allocation2 + $0x4] sm:$0xf] %vm517_vm0, %v3096_v2  ;;  %vm2715_vm0 = vcmask 31744  }
  0xf3   :  { %2907 = vmatprep.subr.bf16.mxu1 %v2987_v15 }
  0xf4   :  { %2908 = vmatpush3.bf16.msra.mxu1 %v2987_v15 }
  0xf9   :  { %v2988_v16 = vld [vmem:[#allocation2] sm:$0xff]  }
  0xfa   :  { %2909 = vmatprep.subr.bf16.mxu1 %v2988_v16 }
  0xfb   :  { %2910 = vmatpush3.bf16.msra.mxu1 %v2988_v16 }
  0xfc   :  { %1497 = vmatprep.subr.bf16.mxu1 %v3096_v2 }
  0xfe   :  { %2912 = vmatmul.mubr.msk.bf16.vlgmr.msra.gmra.mxu1 %vm588_vm8, %v2990_v17 }
  0xff   :  { %2915 = vmatprep.mubr.msk.bf16.mxu1 %vm588_vm8, %v2991_v18 }
 0x106   :  { %2916 = vmatmul.mubr.msk.bf16.gmra.mxu1 %vm588_vm8, %v2992_v19  ;;  %vm1257_vm8 = vcmask 257216  }
 0x1be   :  { %v3695_v20 = vpop.f32.mrf.mxu1 }
 0x1bf   :  { %v700_v46 = vmul.f32 %v3695_v20, %v3695_v20  ;;  %v676_v48 = vsel %vm669_vm2, %v3695_v20, 0.0 }
 0x1c0   :  { %v3697_v21 = vpop.f32.mrf.mxu1 }
 0x1c1   :  { %v670_v22 = vsel %vm669_vm2, %v3697_v21, 0.0  ;;  %v698_v23 = vmul.f32 %v3697_v21, %v3697_v21  ;;  %v711_v47 = vsel %vm669_vm2, %v700_v46, 0.0 }
 0x1c2   :  { %671 = vadd.xlane.f32.xlu1 %v670_v22  ;;  %v3703_v24 = vpop.f32.mrf.mxu1 }
 0x1c3   :  { %v705_v25 = vsel %vm669_vm2, %v698_v23, 0.0  ;;  %v679_v29 = vsel %vm669_vm2, %v3703_v24, 0.0  ;;  %v701_v43 = vmul.f32 %v3703_v24, %v3703_v24 }
 0x1c4   :  { %706 = vadd.xlane.f32.xlu0 %v705_v25  ;;  %v3706_v26 = vpop.f32.mrf.mxu1 }
 0x1c5   :  { %v699_v27 = vmul.f32 %v3706_v26, %v3706_v26  ;;  %v673_v33 = vsel %vm669_vm2, %v3706_v26, 0.0  ;;  %v714_v45 = vsel %vm669_vm2, %v701_v43, 0.0 }
 0x1c6   :  { %v3710_v28 = vpop.f32.mrf.mxu1 }
 0x1c7   :  { %v708_v30 = vsel %vm669_vm2, %v699_v27, 0.0  ;;  %v688_v34 = vsel %vm669_vm2, %v3710_v28, 0.0  ;;  %v704_v35 = vmul.f32 %v3710_v28, %v3710_v28 }
 0x1c8   :  { %680 = vadd.xlane.f32.xlu0 %v679_v29  ;;  %709 = vadd.xlane.f32.xlu1 %v708_v30  ;;  %v3715_v31 = vpop.f32.mrf.mxu1 }
 0x1c9   :  { %v723_v37 = vsel %vm669_vm2, %v704_v35, 0.0  ;;  %v682_v40 = vsel %vm669_vm2, %v3715_v31, 0.0  ;;  %v702_v42 = vmul.f32 %v3715_v31, %v3715_v31 }
 0x1ca   :  { %v2918_v32 = vpop.f32.mrf.mxu1 }
 0x1cb   :  { %v717_v44 = vsel %vm669_vm2, %v702_v42, 0.0 }
 0x1cc   :  { %674 = vadd.xlane.f32.xlu0 %v673_v33  ;;  %689 = vadd.xlane.f32.xlu1 %v688_v34  ;;  %v3723_v36 = vpop.f32.mrf.mxu1 }
 0x1cd   :  { %v685_v38 = vsel %vm669_vm2, %v3723_v36, 0.0  ;;  %v703_v39 = vmul.f32 %v3723_v36, %v3723_v36 }
 0x1cf   :  { %v720_v41 = vsel %vm669_vm2, %v703_v39, 0.0 }
 0x1d0   :  { %724 = vadd.xlane.f32.xlu1 %v723_v37  ;;  %686 = vadd.xlane.f32.xlu0 %v685_v38 }
 0x1d4   :  { %683 = vadd.xlane.f32.xlu1 %v682_v40  ;;  %721 = vadd.xlane.f32.xlu0 %v720_v41 }
 0x1d8   :  { %718 = vadd.xlane.f32.xlu1 %v717_v44  ;;  %715 = vadd.xlane.f32.xlu0 %v714_v45 }
 0x1dc   :  { %712 = vadd.xlane.f32.xlu1 %v711_v47  ;;  %677 = vadd.xlane.f32.xlu0 %v676_v48 }
 0x24b   :  { %v672_v49 = vpop.xlane.xlu1 %671 }
 0x24c   :  { %v3744_v50 = vmul.f32 0.016666668, %v672_v49 }
 0x24d   :  { %v707_v51 = vpop.xlane.xlu0 %706 }
 0x24e   :  { %v733_v52 = vmul.f32 %v3744_v50, %v3744_v50  ;;  %v726_v53 = vmul.f32 0.016666668, %v707_v51 }
 0x250   :  { %v740_v54 = vsub.f32 %v726_v53, %v733_v52  ;;  %v758_v52 = vld [vmem:[%s4753_s2 + $0x20] sm:$0xff]  ;;  %v757_v53 = vld [vmem:[%s4753_s2 + $0x18] sm:$0xff] }
 0x251   :  { %v681_v55 = vpop.xlane.xlu0 %680  ;;  %v710_v56 = vpop.xlane.xlu1 %709 }
 0x252   :  { %v747_v57 = vmax.f32 %v740_v54, 0.0  ;;  %v3752_v4 = vmul.f32 0.016666668, %v681_v55  ;;  %v727_v6 = vmul.f32 0.016666668, %v710_v56 }
 0x254   :  { %v761_v58 = vadd.f32 1e-05, %v747_v57  ;;  %v736_v11 = vmul.f32 %v3752_v4, %v3752_v4 }
 0x255   :  { %v675_v59 = vpop.xlane.xlu0 %674  ;;  %v690_v60 = vpop.xlane.xlu1 %689 }
 0x256   :  { %3046 = vrsqrt.f32 %v761_v58  ;;  %v3748_v61 = vmul.f32 0.016666668, %v675_v59  ;;  %v3759_v16 = vmul.f32 0.016666668, %v690_v60  ;;  %v786_v59 = vld [vmem:[%s4754_s3 + $0x20] sm:$0xff] }
 0x258   :  { %v734_v0 = vmul.f32 %v3748_v61, %v3748_v61  ;;  %v739_v33 = vmul.f32 %v3759_v16, %v3759_v16 }
 0x259   :  { %v725_v62 = vpop.xlane.xlu1 %724  ;;  %v687_v63 = vpop.xlane.xlu0 %686 }
 0x25a   :  { %v741_v7 = vsub.f32 %v727_v6, %v734_v0  ;;  %v732_v23 = vmul.f32 0.016666668, %v725_v62  ;;  %v696_v42 = vmul.f32 0.016666668, %v687_v63  ;;  %v755_v62 = vld [vmem:[%s4753_s2 + $0x8] sm:$0xff]  ;;  %v756_v0 = vld [vmem:[%s4753_s2 + $0x10] sm:$0xff] }
 0x25c   :  { %v748_v22 = vmax.f32 %v741_v7, 0.0  ;;  %v746_v40 = vsub.f32 %v732_v23, %v739_v33  ;;  %v738_v47 = vmul.f32 %v696_v42, %v696_v42  ;;  %v788_v23 = vld [vmem:[%s4754_s3 + $0x30] sm:$0xff]  ;;  %v785_v33 = vld [vmem:[%s4754_s3 + $0x18] sm:$0xff] }
 0x25d   :  { %v684_v1 = vpop.xlane.xlu1 %683  ;;  %v722_v3 = vpop.xlane.xlu0 %721 }
 0x25e   :  { %v695_v5 = vmul.f32 0.016666668, %v684_v1  ;;  %v762_v39 = vadd.f32 1e-05, %v748_v22  ;;  %v753_v44 = vmax.f32 %v746_v40, 0.0 }
 0x25f   :  { %v731_v45 = vmul.f32 0.016666668, %v722_v3 }
 0x260   :  { %v737_v12 = vmul.f32 %v695_v5, %v695_v5  ;;  %v767_v48 = vadd.f32 1e-05, %v753_v44 }
 0x261   :  { %v719_v8 = vpop.xlane.xlu1 %718  ;;  %v716_v9 = vpop.xlane.xlu0 %715  ;;  %v745_v49 = vsub.f32 %v731_v45, %v738_v47 }
 0x262   :  { %v730_v13 = vmul.f32 0.016666668, %v719_v8  ;;  %v729_v14 = vmul.f32 0.016666668, %v716_v9  ;;  %v782_v9 = vld [vmem:[%s4754_s3] sm:$0xff] }
 0x263   :  { %v3047_v15 = vpop.eup %3046  ;;  %v752_v51 = vmax.f32 %v745_v49, 0.0 }
 0x264   :  { %v744_v17 = vsub.f32 %v730_v13, %v737_v12  ;;  %v743_v18 = vsub.f32 %v729_v14, %v736_v11  ;;  %v775_v19 = vmul.f32 %v3047_v15, %v754_v10  ;;  %v760_v14 = vld [vmem:[%s4753_s2 + $0x30] sm:$0xff] }
 0x265   :  { %v713_v25 = vpop.xlane.xlu1 %712  ;;  %v678_v27 = vpop.xlane.xlu0 %677  ;;  %v766_v57 = vadd.f32 1e-05, %v752_v51 }
 0x266   :  { %v751_v29 = vmax.f32 %v744_v17, 0.0  ;;  %v750_v30 = vmax.f32 %v743_v18, 0.0  ;;  %v693_v32 = vmul.f32 0.016666668, %v678_v27  ;;  %805 = vperm.xlu0 %2947, %v775_v19   ;;  %v728_v37 = vmul.f32 0.016666668, %v713_v25 }
 0x267   :  { %v789_v7 = vmul.f32 %v775_v19, %v3744_v50  ;;  %v783_v17 = vld [vmem:[%s4754_s3 + $0x8] sm:$0xff] }
 0x268   :  { %v765_v34 = vadd.f32 1e-05, %v751_v29  ;;  %v764_v35 = vadd.f32 1e-05, %v750_v30  ;;  %v735_v38 = vmul.f32 %v693_v32, %v693_v32  ;;  %v759_v25 = vld [vmem:[%s4753_s2 + $0x28] sm:$0xff]  ;;  %s3106_s2 = smov 118  }
 0x269   :  { %v796_v11 = vsub.f32 %v782_v9, %v789_v7  ;;  %v787_v30 = vld [vmem:[%s4754_s3 + $0x28] sm:$0xff] }
 0x26a   :  { %3048 = vrsqrt.f32 %v765_v34  ;;  %v742_v41 = vsub.f32 %v728_v37, %v735_v38 }
 0x26b   :  { %3050 = vrsqrt.f32 %v764_v35 }
 0x26c   :  { %v749_v43 = vmax.f32 %v742_v41, 0.0  ;;  %3052 = vrsqrt.f32 %v762_v39 }
 0x26e   :  { %v763_v46 = vadd.f32 1e-05, %v749_v43 }
 0x270   :  { %3054 = vrsqrt.f32 %v763_v46 }
 0x271   :  { %3056 = vrsqrt.f32 %v767_v48 }
 0x272   :  { %3058 = vrsqrt.f32 %v766_v57 }
 0x277   :  { %v3049_v54 = vpop.eup %3048 }
 0x278   :  { %v3051_v55 = vpop.eup %3050  ;;  %v779_v56 = vmul.f32 %v3049_v54, %v758_v52 }
 0x279   :  { %v778_v58 = vmul.f32 %v3051_v55, %v757_v53  ;;  %v3053_v60 = vpop.eup %3052 }
 0x27a   :  { %825 = vperm.xlu0 %2947, %v779_v56   ;;  %v793_v63 = vmul.f32 %v779_v56, %v695_v5  ;;  %v776_v6 = vmul.f32 %v3053_v60, %v755_v62  ;;  %v784_v5 = vld [vmem:[%s4754_s3 + $0x10] sm:$0xff]  ;;  %s3107_s3 = smov 22  }
 0x27b   :  { %820 = vperm.xlu1 %2948, %v778_v58  }
 0x27c   :  { %v800_v1 = vsub.f32 %v786_v59, %v793_v63  ;;  %v790_v50 = vmul.f32 %v776_v6, %v3748_v61 }
 0x27d   :  { %v3055_v3 = vpop.eup %3054 }
 0x27e   :  { %v777_v8 = vmul.f32 %v3055_v3, %v756_v0  ;;  %867 = vperm.xlu0 %2947, %v800_v1   ;;  %v3057_v12 = vpop.eup %3056  ;;  %v797_v18 = vsub.f32 %v783_v17, %v790_v50 }
 0x27f   :  { %810 = vperm.xlu1 %2948, %v776_v6   ;;  %v781_v15 = vmul.f32 %v3057_v12, %v760_v14  ;;  %v3059_v22 = vpop.eup %3058 }
 0x280   :  { %v791_v10 = vmul.f32 %v777_v8, %v693_v32  ;;  %v780_v27 = vmul.f32 %v3059_v22, %v759_v25  ;;  %v792_v32 = vmul.f32 %v778_v58, %v3752_v4 }
 0x281   :  { %v795_v19 = vmul.f32 %v781_v15, %v3759_v16 }
 0x282   :  { %v798_v13 = vsub.f32 %v784_v5, %v791_v10  ;;  %v794_v29 = vmul.f32 %v780_v27, %v696_v42  ;;  %v799_v34 = vsub.f32 %v785_v33, %v792_v32 }
 0x283   :  { %847 = vperm.xlu1 %2948, %v796_v11   ;;  %v802_v61 = vsub.f32 %v788_v23, %v795_v19 }
 0x284   :  { %857 = vperm.xlu0 %2947, %v798_v13   ;;  %v801_v16 = vsub.f32 %v787_v30, %v794_v29 }
 0x287   :  { %835 = vperm.xlu1 %2948, %v781_v15  }
 0x28b   :  { %852 = vperm.xlu1 %2948, %v797_v18  }
 0x28f   :  { %877 = vperm.xlu1 %2948, %v802_v61  }
 0x293   :  { %830 = vperm.xlu1 %2948, %v780_v27  }
 0x297   :  { %872 = vperm.xlu1 %2948, %v801_v16  }
 0x29b   :  { %862 = vperm.xlu1 %2948, %v799_v34  }
 0x29f   :  { %815 = vperm.xlu1 %2948, %v777_v8  }
 0x2e1   :  { %v806_v39 = vpop.permute.xlu0 %805 }
 0x2e2   :  { %v838_v41 = vmul.f32 %v806_v39, %v3697_v21 }
 0x2f5   :  { %v826_v47 = vpop.permute.xlu0 %825 }
 0x2f6   :  { %v821_v35 = vpop.permute.xlu1 %820  ;;  %v842_v53 = vmul.f32 %v826_v47, %v3715_v31 }
 0x2f7   :  { %v841_v52 = vmul.f32 %v3703_v24, %v821_v35 }
 0x2f9   :  { %v868_v51 = vpop.permute.xlu0 %867 }
 0x2fa   :  { %v811_v37 = vpop.permute.xlu1 %810  ;;  %v884_v55 = vadd.f32 %v868_v51, %v842_v53 }
 0x2fb   :  { %v839_v42 = vmul.f32 %v811_v37, %v3706_v26 }
 0x2fe   :  { %v848_v38 = vpop.permute.xlu1 %847 }
 0x2ff   :  { %v880_v44 = vadd.f32 %v848_v38, %v838_v41  ;;  %v858_v59 = vpop.permute.xlu0 %857 }
 0x302   :  { %v836_v40 = vpop.permute.xlu1 %835 }
 0x303   :  { %v844_v60 = vmul.f32 %v3710_v28, %v836_v40 }
 0x306   :  { %v853_v43 = vpop.permute.xlu1 %852 }
 0x307   :  { %v881_v4 = vadd.f32 %v853_v43, %v839_v42 }
 0x309   :  { %v2949_v45 = vpack.i.bf16 %v881_v4, %v880_v44 }
 0x30a   :  { %v878_v46 = vpop.permute.xlu1 %877 }
 0x30b   :  { %2950 = vrot.lane.b32.xlu1 %v2949_v45, %s3106_s2  ;;  %v886_v0 = vadd.f32 %v878_v46, %v844_v60 }
 0x30e   :  { %v831_v48 = vpop.permute.xlu1 %830 }
 0x30f   :  { %v843_v57 = vmul.f32 %v831_v48, %v3723_v36 }
 0x312   :  { %v873_v49 = vpop.permute.xlu1 %872 }
 0x313   :  { %v885_v62 = vadd.f32 %v873_v49, %v843_v57 }
 0x315   :  { %v2959_v24 = vpack.i.bf16 %v886_v0, %v885_v62 }
 0x316   :  { %v863_v54 = vpop.permute.xlu1 %862 }
 0x317   :  { %v883_v21 = vadd.f32 %v863_v54, %v841_v52 }
 0x319   :  { %v2954_v56 = vpack.i.bf16 %v884_v55, %v883_v21 }
 0x31a   :  { %v816_v26 = vpop.permute.xlu1 %815 }
 0x31b   :  { %v840_v58 = vmul.f32 %v3695_v20, %v816_v26  ;;  %2955 = vrot.lane.b32.xlu1 %v2954_v56, %s3106_s2 }
 0x31d   :  { %v882_v63 = vadd.f32 %v858_v59, %v840_v58 }
 0x31f   :  { %898 = vrot.lane.b32.xlu0 %v882_v63, %s3106_s2 }
 0x323   :  { %2960 = vrot.lane.b32.xlu0 %v2959_v24, %s3106_s2 }
 0x37d   :  { %v2951_v31 = vpop.permute.xlu1 %2950 }
 0x37e   :  { %v2953_v1 = vunpack.i.h.bf16 %v2951_v31  ;;  %v2952_v3 = vunpack.i.l.bf16 %v2951_v31 }
 0x380   :  { %v916_v6 = vmax.f32 %v881_v4, %v2953_v1  ;;  %v915_v7 = vmax.f32 %v880_v44, %v2952_v3 }
 0x382   :  { %v923_v8 = vmax.f32 %v916_v6, 0.0  ;;  %v922_v9 = vmax.f32 %v915_v7, 0.0 }
 0x384   :  { %v3813_v36 = vpack.c.bf16 %v923_v8, %v923_v8  ;;  %v2876_v20 = vpack.c.bf16 %v922_v9, %v922_v9 }
 0x386   :  { %959 = vst.msk [vmem:[#allocation3] sm:$0xf] %vm958_vm3, %v2876_v20  ;;  %960 = vst.msk [vmem:[#allocation3 + $0x4] sm:$0xf] %vm958_vm3, %v3813_v36 }
 0x38d   :  { %v2956_v28 = vpop.permute.xlu1 %2955 }
 0x38e   :  { %v2958_v5 = vunpack.i.h.bf16 %v2956_v28  ;;  %v2957_v10 = vunpack.i.l.bf16 %v2956_v28 }
 0x390   :  { %v919_v11 = vmax.f32 %v884_v55, %v2958_v5  ;;  %v918_v12 = vmax.f32 %v883_v21, %v2957_v10  ;;  %v3006_v55 = vld [vmem:[%s4755_s4 + $0x4] ss:$8 sps:$4 sm:$0xff]  }
 0x391   :  { %v899_v13 = vpop.permute.xlu0 %898  ;;  %2833 = vmatprep.mubr.msk.bf16.mxu1 %vm1478_vm10, %v3006_v55 }
 0x392   :  { %v926_v14 = vmax.f32 %v919_v11, 0.0  ;;  %v925_v50 = vmax.f32 %v918_v12, 0.0  ;;  %v917_v15 = vmax.f32 %v882_v63, %v899_v13 }
 0x394   :  { %v3818_v17 = vpack.c.bf16 %v926_v14, %v926_v14  ;;  %v3820_v18 = vpack.c.bf16 %v925_v50, %v925_v50  ;;  %v924_v19 = vmax.f32 %v917_v15, 0.0 }
 0x395   :  { %v2961_v22 = vpop.permute.xlu0 %2960 }
 0x396   :  { %v3822_v23 = vpack.c.bf16 %v924_v19, %v924_v19  ;;  %v2963_v25 = vunpack.i.h.bf16 %v2961_v22  ;;  %v2962_v61 = vunpack.i.l.bf16 %v2961_v22  ;;  %962 = vst.msk [vmem:[#allocation3 + $0xc] sm:$0xf] %vm958_vm3, %v3820_v18  ;;  %963 = vst.msk [vmem:[#allocation3 + $0x10] sm:$0xf] %vm958_vm3, %v3818_v17 }
 0x398   :  { %v921_v27 = vmax.f32 %v886_v0, %v2963_v25  ;;  %v920_v29 = vmax.f32 %v885_v62, %v2962_v61  ;;  %1269 = vrot.lane.b32.xlu1 %v3822_v23, %s3107_s3  ;;  %970 = vrot.lane.b32.xlu0 %v3822_v23, %s3108_s15  ;;  %961 = vst.msk [vmem:[#allocation3 + $0x8] sm:$0xf] %vm958_vm3, %v3822_v23 }
 0x39a   :  { %v928_v30 = vmax.f32 %v921_v27, 0.0  ;;  %v927_v16 = vmax.f32 %v920_v29, 0.0 }
 0x39c   :  { %v2882_v32 = vpack.c.bf16 %v928_v30, %v928_v30  ;;  %v3834_v33 = vpack.c.bf16 %v927_v16, %v927_v16  ;;  %994 = vrot.lane.b32.xlu1 %v2876_v20, %s3109_s27  ;;  %1055 = vrot.lane.b32.xlu0 %v3822_v23, %s3110_s20 }
 0x39e   :  { %964 = vst.msk [vmem:[#allocation3 + $0x14] sm:$0xf] %vm958_vm3, %v3834_v33  ;;  %965 = vst.msk [vmem:[#allocation3 + $0x18] sm:$0xf] %vm958_vm3, %v2882_v32 }
 0x3a0   :  { %1079 = vrot.lane.b32.xlu1 %v2876_v20, %s3111_s19  ;;  %1162 = vrot.lane.b32.xlu0 %v3822_v23, %s3112_s17 }
 0x3a4   :  { %1186 = vrot.lane.b32.xlu1 %v2876_v20, %s3113_s22  ;;  %1026 = vrot.lane.b32.xlu0 %v3822_v23, %s3114_s21 }
 0x3a8   :  { %1293 = vrot.lane.b32.xlu1 %v2876_v20, %s3115_s23  ;;  %1133 = vrot.lane.b32.xlu0 %v3822_v23, %s3116_s24 }
 0x3ac   :  { %966 = vrot.lane.b32.xlu1 %v2876_v20, %s3108_s15  ;;  %1240 = vrot.lane.b32.xlu0 %v3822_v23, %s3117_s25 }
 0x3b0   :  { %1051 = vrot.lane.b32.xlu1 %v2876_v20, %s3110_s20  ;;  %998 = vrot.lane.b32.xlu0 %v3822_v23, %s3109_s27 }
 0x3b4   :  { %1158 = vrot.lane.b32.xlu1 %v2876_v20, %s3112_s17  ;;  %1083 = vrot.lane.b32.xlu0 %v3822_v23, %s3111_s19 }
 0x3b8   :  { %1265 = vrot.lane.b32.xlu1 %v2876_v20, %s3107_s3  ;;  %1022 = vrot.lane.b32.xlu0 %v2876_v20, %s3114_s21 }
 0x3bc   :  { %1129 = vrot.lane.b32.xlu1 %v2876_v20, %s3116_s24  ;;  %1236 = vrot.lane.b32.xlu0 %v2876_v20, %s3117_s25 }
 0x3c0   :  { %972 = vrot.lane.b32.xlu1 %v3820_v18, %s3108_s15  ;;  %996 = vrot.lane.b32.xlu0 %v3813_v36, %s3109_s27 }
 0x3c4   :  { %1057 = vrot.lane.b32.xlu1 %v3820_v18, %s3110_s20  ;;  %1081 = vrot.lane.b32.xlu0 %v3813_v36, %s3111_s19 }
 0x3c8   :  { %1164 = vrot.lane.b32.xlu1 %v3820_v18, %s3112_s17  ;;  %1188 = vrot.lane.b32.xlu0 %v3813_v36, %s3113_s22 }
 0x3cc   :  { %1271 = vrot.lane.b32.xlu1 %v3820_v18, %s3107_s3  ;;  %1295 = vrot.lane.b32.xlu0 %v3813_v36, %s3115_s23 }
 0x3d0   :  { %1028 = vrot.lane.b32.xlu1 %v3820_v18, %s3114_s21  ;;  %1267 = vrot.lane.b32.xlu0 %v3813_v36, %s3107_s3 }
 0x3d4   :  { %1135 = vrot.lane.b32.xlu1 %v3820_v18, %s3116_s24  ;;  %1131 = vrot.lane.b32.xlu0 %v3813_v36, %s3116_s24 }
 0x3d8   :  { %1242 = vrot.lane.b32.xlu1 %v3820_v18, %s3117_s25  ;;  %978 = vrot.lane.b32.xlu0 %v2882_v32, %s3108_s15 }
 0x3dc   :  { %1000 = vrot.lane.b32.xlu1 %v3820_v18, %s3109_s27  ;;  %1063 = vrot.lane.b32.xlu0 %v2882_v32, %s3110_s20 }
 0x3e0   :  { %968 = vrot.lane.b32.xlu1 %v3813_v36, %s3108_s15  ;;  %1170 = vrot.lane.b32.xlu0 %v2882_v32, %s3112_s17 }
 0x3e4   :  { %1053 = vrot.lane.b32.xlu1 %v3813_v36, %s3110_s20  ;;  %1277 = vrot.lane.b32.xlu0 %v2882_v32, %s3107_s3 }
 0x3e8   :  { %1160 = vrot.lane.b32.xlu1 %v3813_v36, %s3112_s17  ;;  %1034 = vrot.lane.b32.xlu0 %v2882_v32, %s3114_s21 }
 0x3ec   :  { %1024 = vrot.lane.b32.xlu1 %v3813_v36, %s3114_s21  ;;  %1141 = vrot.lane.b32.xlu0 %v2882_v32, %s3116_s24 }
 0x3f0   :  { %1238 = vrot.lane.b32.xlu1 %v3813_v36, %s3117_s25  ;;  %1248 = vrot.lane.b32.xlu0 %v2882_v32, %s3117_s25 }
 0x3f4   :  { %1091 = vrot.lane.b32.xlu1 %v2882_v32, %s3111_s19  ;;  %1006 = vrot.lane.b32.xlu0 %v2882_v32, %s3109_s27 }
 0x3f8   :  { %1305 = vrot.lane.b32.xlu1 %v2882_v32, %s3115_s23  ;;  %1198 = vrot.lane.b32.xlu0 %v2882_v32, %s3113_s22 }
 0x3fc   :  { %1002 = vrot.lane.b32.xlu1 %v3818_v17, %s3109_s27  ;;  %974 = vrot.lane.b32.xlu0 %v3818_v17, %s3108_s15 }
 0x400   :  { %1059 = vrot.lane.b32.xlu0 %v3818_v17, %s3110_s20  ;;  %976 = vrot.lane.b32.xlu1 %v3834_v33, %s3108_s15 }
 0x404   :  { %1166 = vrot.lane.b32.xlu0 %v3818_v17, %s3112_s17  ;;  %1061 = vrot.lane.b32.xlu1 %v3834_v33, %s3110_s20 }
 0x408   :  { %1273 = vrot.lane.b32.xlu0 %v3818_v17, %s3107_s3  ;;  %1168 = vrot.lane.b32.xlu1 %v3834_v33, %s3112_s17 }
 0x40a   :  { %v1270_v34 = vpop.permute.xlu1 %1269  ;;  %v971_v35 = vpop.permute.xlu0 %970 }
 0x40b   :  { %989 = vst.msk [vmem:[#allocation3 + $0x24] sm:$0xf] %vm958_vm3, %v971_v35 }
 0x40c   :  { %1030 = vrot.lane.b32.xlu0 %v3818_v17, %s3114_s21  ;;  %1275 = vrot.lane.b32.xlu1 %v3834_v33, %s3107_s3 }
 0x40e   :  { %v995_v37 = vpop.permute.xlu1 %994  ;;  %v1056_v38 = vpop.permute.xlu0 %1055 }
 0x40f   :  { %1015 = vst.msk [vmem:[#allocation3 + $0x38] sm:$0xf] %vm958_vm3, %v995_v37 }
 0x410   :  { %1074 = vst.msk [vmem:[#allocation3 + $0x24] sm:$0xf] %vm1043_vm4, %v1056_v38  ;;  %1137 = vrot.lane.b32.xlu0 %v3818_v17, %s3116_s24  ;;  %1085 = vrot.lane.b32.xlu1 %v3820_v18, %s3111_s19 }
 0x411   :  { %1117 = vst.msk [vmem:[#allocation3 + $0x24] sm:$0xf] %vm1107_vm5, %v3096_v2 }
 0x412   :  { %v1080_v39 = vpop.permute.xlu1 %1079  ;;  %v1163_v40 = vpop.permute.xlu0 %1162 }
 0x413   :  { %1100 = vst.msk [vmem:[#allocation3 + $0x38] sm:$0xf] %vm1043_vm4, %v1080_v39 }
 0x414   :  { %1181 = vst.msk [vmem:[#allocation3 + $0x24] sm:$0xf] %vm1150_vm6, %v1163_v40  ;;  %1244 = vrot.lane.b32.xlu0 %v3818_v17, %s3117_s25  ;;  %1032 = vrot.lane.b32.xlu1 %v3834_v33, %s3114_s21 }
 0x415   :  { %1224 = vst.msk [vmem:[#allocation3 + $0x24] sm:$0xf] %vm1214_vm7, %v3096_v2 }
 0x416   :  { %1122 = vst.msk [vmem:[#allocation3 + $0x38] sm:$0xf] %vm1107_vm5, %v3096_v2  ;;  %v1187_v41 = vpop.permute.xlu1 %1186  ;;  %v1027_v42 = vpop.permute.xlu0 %1026 }
 0x417   :  { %1288 = vst.msk [vmem:[#allocation3 + $0x24] sm:$0xf] %vm1257_vm8, %v1270_v34 }
 0x418   :  { %1331 = vst.msk [vmem:[#allocation3 + $0x24] sm:$0xf] %vm1321_vm9, %v3096_v2  ;;  %1087 = vrot.lane.b32.xlu0 %v3818_v17, %s3111_s19  ;;  %1139 = vrot.lane.b32.xlu1 %v3834_v33, %s3116_s24 }
 0x419   :  { %1207 = vst.msk [vmem:[#allocation3 + $0x38] sm:$0xf] %vm1150_vm6, %v1187_v41 }
 0x41a   :  { %1046 = vst.msk [vmem:[#allocation3 + $0x8] sm:$0xf] %vm1043_vm4, %v1027_v42  ;;  %v1294_v43 = vpop.permute.xlu1 %1293  ;;  %v1134_v44 = vpop.permute.xlu0 %1133 }
 0x41b   :  { %1229 = vst.msk [vmem:[#allocation3 + $0x38] sm:$0xf] %vm1214_vm7, %v3096_v2 }
 0x41c   :  { %1110 = vst.msk [vmem:[#allocation3 + $0x8] sm:$0xf] %vm1107_vm5, %v3096_v2  ;;  %1194 = vrot.lane.b32.xlu0 %v3818_v17, %s3113_s22  ;;  %1246 = vrot.lane.b32.xlu1 %v3834_v33, %s3117_s25 }
 0x41d   :  { %1314 = vst.msk [vmem:[#allocation3 + $0x38] sm:$0xf] %vm1257_vm8, %v1294_v43 }
 0x41e   :  { %1153 = vst.msk [vmem:[#allocation3 + $0x8] sm:$0xf] %vm1150_vm6, %v1134_v44  ;;  %v967_v4 = vpop.permute.xlu1 %966  ;;  %v1241_v45 = vpop.permute.xlu0 %1240 }
 0x41f   :  { %1336 = vst.msk [vmem:[#allocation3 + $0x38] sm:$0xf] %vm1321_vm9, %v3096_v2 }
 0x420   :  { %1217 = vst.msk [vmem:[#allocation3 + $0x8] sm:$0xf] %vm1214_vm7, %v3096_v2  ;;  %1004 = vrot.lane.b32.xlu0 %v3834_v33, %s3109_s27  ;;  %1192 = vrot.lane.b32.xlu1 %v3820_v18, %s3113_s22 }
 0x421   :  { %987 = vst.msk [vmem:[#allocation3 + $0x1c] sm:$0xf] %vm958_vm3, %v967_v4 }
 0x422   :  { %1260 = vst.msk [vmem:[#allocation3 + $0x8] sm:$0xf] %vm1257_vm8, %v1241_v45  ;;  %v1052_v46 = vpop.permute.xlu1 %1051  ;;  %v999_v47 = vpop.permute.xlu0 %998 }
 0x423   :  { %1324 = vst.msk [vmem:[#allocation3 + $0x8] sm:$0xf] %vm1321_vm9, %v3096_v2 }
 0x424   :  { %1072 = vst.msk [vmem:[#allocation3 + $0x1c] sm:$0xf] %vm1043_vm4, %v1052_v46  ;;  %1301 = vrot.lane.b32.xlu0 %v3818_v17, %s3115_s23  ;;  %1089 = vrot.lane.b32.xlu1 %v3834_v33, %s3111_s19 }
 0x425   :  { %1017 = vst.msk [vmem:[#allocation3 + $0x40] sm:$0xf] %vm958_vm3, %v999_v47 }
 0x426   :  { %1115 = vst.msk [vmem:[#allocation3 + $0x1c] sm:$0xf] %vm1107_vm5, %v3096_v2  ;;  %v1159_v48 = vpop.permute.xlu1 %1158  ;;  %v1084_v49 = vpop.permute.xlu0 %1083 }
 0x427   :  { %1179 = vst.msk [vmem:[#allocation3 + $0x1c] sm:$0xf] %vm1150_vm6, %v1159_v48 }
 0x428   :  { %1102 = vst.msk [vmem:[#allocation3 + $0x40] sm:$0xf] %vm1043_vm4, %v1084_v49  ;;  %1190 = vrot.lane.b32.xlu0 %v3822_v23, %s3113_s22  ;;  %1196 = vrot.lane.b32.xlu1 %v3834_v33, %s3113_s22 }
 0x429   :  { %1222 = vst.msk [vmem:[#allocation3 + $0x1c] sm:$0xf] %vm1214_vm7, %v3096_v2 }
 0x42a   :  { %1124 = vst.msk [vmem:[#allocation3 + $0x40] sm:$0xf] %vm1107_vm5, %v3096_v2  ;;  %v1266_v51 = vpop.permute.xlu1 %1265  ;;  %v1023_v52 = vpop.permute.xlu0 %1022 }
 0x42b   :  { %1286 = vst.msk [vmem:[#allocation3 + $0x1c] sm:$0xf] %vm1257_vm8, %v1266_v51 }
 0x42c   :  { %1044 = vst.msk [vmem:[#allocation3] sm:$0xf] %vm1043_vm4, %v1023_v52  ;;  %1297 = vrot.lane.b32.xlu0 %v3822_v23, %s3115_s23  ;;  %1303 = vrot.lane.b32.xlu1 %v3834_v33, %s3115_s23 }
 0x42d   :  { %1329 = vst.msk [vmem:[#allocation3 + $0x1c] sm:$0xf] %vm1321_vm9, %v3096_v2 }
 0x42e   :  { %1108 = vst.msk [vmem:[#allocation3] sm:$0xf] %vm1107_vm5, %v3096_v2  ;;  %v1130_v53 = vpop.permute.xlu1 %1129  ;;  %v1237_v54 = vpop.permute.xlu0 %1236 }
 0x42f   :  { %1151 = vst.msk [vmem:[#allocation3] sm:$0xf] %vm1150_vm6, %v1130_v53 }
 0x430   :  { %1215 = vst.msk [vmem:[#allocation3] sm:$0xf] %vm1214_vm7, %v3096_v2  ;;  %1299 = vrot.lane.b32.xlu1 %v3820_v18, %s3115_s23 }
 0x431   :  { %1258 = vst.msk [vmem:[#allocation3] sm:$0xf] %vm1257_vm8, %v1237_v54 }
 0x432   :  { %1322 = vst.msk [vmem:[#allocation3] sm:$0xf] %vm1321_vm9, %v3096_v2  ;;  %v973_v21 = vpop.permute.xlu1 %972  ;;  %v997_v56 = vpop.permute.xlu0 %996 }
 0x433   :  { %990 = vst.msk [vmem:[#allocation3 + $0x28] sm:$0xf] %vm958_vm3, %v973_v21  ;;  %1016 = vst.msk [vmem:[#allocation3 + $0x3c] sm:$0xf] %vm958_vm3, %v997_v56 }
 0x436   :  { %v1058_v26 = vpop.permute.xlu1 %1057  ;;  %v1082_v57 = vpop.permute.xlu0 %1081 }
 0x437   :  { %1075 = vst.msk [vmem:[#allocation3 + $0x28] sm:$0xf] %vm1043_vm4, %v1058_v26  ;;  %1101 = vst.msk [vmem:[#allocation3 + $0x3c] sm:$0xf] %vm1043_vm4, %v1082_v57 }
 0x438   :  { %1118 = vst.msk [vmem:[#allocation3 + $0x28] sm:$0xf] %vm1107_vm5, %v3096_v2  ;;  %1123 = vst.msk [vmem:[#allocation3 + $0x3c] sm:$0xf] %vm1107_vm5, %v3096_v2 }
 0x43a   :  { %v1165_v58 = vpop.permute.xlu1 %1164  ;;  %v1189_v59 = vpop.permute.xlu0 %1188 }
 0x43b   :  { %1182 = vst.msk [vmem:[#allocation3 + $0x28] sm:$0xf] %vm1150_vm6, %v1165_v58  ;;  %1208 = vst.msk [vmem:[#allocation3 + $0x3c] sm:$0xf] %vm1150_vm6, %v1189_v59 }
 0x43c   :  { %1225 = vst.msk [vmem:[#allocation3 + $0x28] sm:$0xf] %vm1214_vm7, %v3096_v2  ;;  %1230 = vst.msk [vmem:[#allocation3 + $0x3c] sm:$0xf] %vm1214_vm7, %v3096_v2 }
 0x43e   :  { %v1272_v60 = vpop.permute.xlu1 %1271  ;;  %v1296_v62 = vpop.permute.xlu0 %1295 }
 0x43f   :  { %1289 = vst.msk [vmem:[#allocation3 + $0x28] sm:$0xf] %vm1257_vm8, %v1272_v60  ;;  %1315 = vst.msk [vmem:[#allocation3 + $0x3c] sm:$0xf] %vm1257_vm8, %v1296_v62  ;;  %v3004_v60 = vld [vmem:[%s4755_s4] ss:$8 sps:$4 sm:$0xff]  }
 0x440   :  { %1332 = vst.msk [vmem:[#allocation3 + $0x28] sm:$0xf] %vm1321_vm9, %v3096_v2  ;;  %1337 = vst.msk [vmem:[#allocation3 + $0x3c] sm:$0xf] %vm1321_vm9, %v3096_v2  ;;  %v3007_v62 = vld [vmem:[%s4755_s4 + $0x14] ss:$8 sps:$4 sm:$0xff]  }
 0x442   :  { %v1029_v63 = vpop.permute.xlu1 %1028  ;;  %v1268_v0 = vpop.permute.xlu0 %1267 }
 0x443   :  { %1047 = vst.msk [vmem:[#allocation3 + $0xc] sm:$0xf] %vm1043_vm4, %v1029_v63  ;;  %v3009_v63 = vld [vmem:[%s4755_s4 + $0x10] ss:$8 sps:$4 sm:$0xff]  }
 0x444   :  { %1111 = vst.msk [vmem:[#allocation3 + $0xc] sm:$0xf] %vm1107_vm5, %v3096_v2 }
 0x446   :  { %v1136_v24 = vpop.permute.xlu1 %1135  ;;  %v1132_v31 = vpop.permute.xlu0 %1131 }
 0x447   :  { %1154 = vst.msk [vmem:[#allocation3 + $0xc] sm:$0xf] %vm1150_vm6, %v1136_v24  ;;  %v2993_v1 = vld [vmem:[#allocation3 + $0x38] sm:$0xff]  }
 0x448   :  { %1218 = vst.msk [vmem:[#allocation3 + $0xc] sm:$0xf] %vm1214_vm7, %v3096_v2  ;;  %1498 = vmatpush1.bf16.msra.mxu1 %v2993_v1  ;;  %v3012_v24 = vld [vmem:[%s4755_s4 + $0x20] ss:$8 sps:$4 sm:$0xff]  }
 0x449   :  { %1499 = vmatprep.subr.bf16.mxu1 %v3096_v2  ;;  %v1351_v1 = vld [vmem:[%s4755_s4 + $0x40] sm:$0xff] }
 0x44a   :  { %v1243_v3 = vpop.permute.xlu1 %1242  ;;  %v979_v6 = vpop.permute.xlu0 %978 }
 0x44b   :  { %1261 = vst.msk [vmem:[#allocation3 + $0xc] sm:$0xf] %vm1257_vm8, %v1243_v3  ;;  %v3015_v3 = vld [vmem:[%s4755_s4 + $0x30] ss:$8 sps:$4 sm:$0xff]  }
 0x44c   :  { %993 = vst.msk [vmem:[#allocation3 + $0x34] sm:$0xf] %vm958_vm3, %v979_v6  ;;  %v2821_v6 = vcombine.high %v1351_v1, %v1351_v1 }
 0x44d   :  { %1325 = vst.msk [vmem:[#allocation3 + $0xc] sm:$0xf] %vm1321_vm9, %v3096_v2 }
 0x44e   :  { %v1001_v7 = vpop.permute.xlu1 %1000  ;;  %v1064_v8 = vpop.permute.xlu0 %1063 }
 0x44f   :  { %1018 = vst.msk [vmem:[#allocation3 + $0x44] sm:$0xf] %vm958_vm3, %v1001_v7  ;;  %v2820_v7 = vcombine.low %v1351_v1, %v1351_v1 }
 0x450   :  { %1078 = vst.msk [vmem:[#allocation3 + $0x34] sm:$0xf] %vm1043_vm4, %v1064_v8 }
 0x451   :  { %1121 = vst.msk [vmem:[#allocation3 + $0x34] sm:$0xf] %vm1107_vm5, %v3096_v2 }
 0x452   :  { %v969_v9 = vpop.permute.xlu1 %968  ;;  %v1171_v36 = vpop.permute.xlu0 %1170 }
 0x453   :  { %988 = vst.msk [vmem:[#allocation3 + $0x20] sm:$0xf] %vm958_vm3, %v969_v9 }
 0x454   :  { %1185 = vst.msk [vmem:[#allocation3 + $0x34] sm:$0xf] %vm1150_vm6, %v1171_v36  ;;  %v2999_v51 = vld [vmem:[#allocation3 + $0x8] sm:$0xff]  }
 0x455   :  { %1228 = vst.msk [vmem:[#allocation3 + $0x34] sm:$0xf] %vm1214_vm7, %v3096_v2 }
 0x456   :  { %v1054_v20 = vpop.permute.xlu1 %1053  ;;  %v1278_v28 = vpop.permute.xlu0 %1277 }
 0x457   :  { %1073 = vst.msk [vmem:[#allocation3 + $0x20] sm:$0xf] %vm1043_vm4, %v1054_v20 }
 0x458   :  { %1292 = vst.msk [vmem:[#allocation3 + $0x34] sm:$0xf] %vm1257_vm8, %v1278_v28 }
 0x459   :  { %1116 = vst.msk [vmem:[#allocation3 + $0x20] sm:$0xf] %vm1107_vm5, %v3096_v2 }
 0x45a   :  { %1335 = vst.msk [vmem:[#allocation3 + $0x34] sm:$0xf] %vm1321_vm9, %v3096_v2  ;;  %v1161_v5 = vpop.permute.xlu1 %1160  ;;  %v1035_v10 = vpop.permute.xlu0 %1034 }
 0x45b   :  { %1180 = vst.msk [vmem:[#allocation3 + $0x20] sm:$0xf] %vm1150_vm6, %v1161_v5 }
 0x45c   :  { %1050 = vst.msk [vmem:[#allocation3 + $0x18] sm:$0xf] %vm1043_vm4, %v1035_v10 }
 0x45d   :  { %1223 = vst.msk [vmem:[#allocation3 + $0x20] sm:$0xf] %vm1214_vm7, %v3096_v2 }
 0x45e   :  { %1114 = vst.msk [vmem:[#allocation3 + $0x18] sm:$0xf] %vm1107_vm5, %v3096_v2  ;;  %v1025_v11 = vpop.permute.xlu1 %1024  ;;  %v1142_v12 = vpop.permute.xlu0 %1141 }
 0x45f   :  { %1287 = vst.msk [vmem:[#allocation3 + $0x20] sm:$0xf] %vm1257_vm8, %v1268_v0  ;;  %v3010_v0 = vld [vmem:[%s4755_s4 + $0x24] ss:$8 sps:$4 sm:$0xff]  }
 0x460   :  { %1330 = vst.msk [vmem:[#allocation3 + $0x20] sm:$0xf] %vm1321_vm9, %v3096_v2 }
 0x461   :  { %1045 = vst.msk [vmem:[#allocation3 + $0x4] sm:$0xf] %vm1043_vm4, %v1025_v11 }
 0x462   :  { %1157 = vst.msk [vmem:[#allocation3 + $0x18] sm:$0xf] %vm1150_vm6, %v1142_v12  ;;  %v1239_v13 = vpop.permute.xlu1 %1238  ;;  %v1249_v14 = vpop.permute.xlu0 %1248 }
 0x463   :  { %1109 = vst.msk [vmem:[#allocation3 + $0x4] sm:$0xf] %vm1107_vm5, %v3096_v2 }
 0x464   :  { %1221 = vst.msk [vmem:[#allocation3 + $0x18] sm:$0xf] %vm1214_vm7, %v3096_v2 }
 0x465   :  { %1152 = vst.msk [vmem:[#allocation3 + $0x4] sm:$0xf] %vm1150_vm6, %v1132_v31  ;;  %v3013_v31 = vld [vmem:[%s4755_s4 + $0x34] ss:$8 sps:$4 sm:$0xff]  }
 0x466   :  { %1216 = vst.msk [vmem:[#allocation3 + $0x4] sm:$0xf] %vm1214_vm7, %v3096_v2  ;;  %v1092_v50 = vpop.permute.xlu1 %1091  ;;  %v1007_v15 = vpop.permute.xlu0 %1006 }
 0x467   :  { %1259 = vst.msk [vmem:[#allocation3 + $0x4] sm:$0xf] %vm1257_vm8, %v1239_v13  ;;  %1264 = vst.msk [vmem:[#allocation3 + $0x18] sm:$0xf] %vm1257_vm8, %v1249_v14  ;;  %v2996_v42 = vld [vmem:[#allocation3 + $0x20] sm:$0xff]  }
 0x468   :  { %1323 = vst.msk [vmem:[#allocation3 + $0x4] sm:$0xf] %vm1321_vm9, %v3096_v2  ;;  %1328 = vst.msk [vmem:[#allocation3 + $0x18] sm:$0xf] %vm1321_vm9, %v3096_v2 }
 0x469   :  { %1021 = vst.msk [vmem:[#allocation3 + $0x50] sm:$0xf] %vm958_vm3, %v1007_v15 }
 0x46a   :  { %1106 = vst.msk [vmem:[#allocation3 + $0x50] sm:$0xf] %vm1043_vm4, %v1092_v50  ;;  %v1306_v17 = vpop.permute.xlu1 %1305  ;;  %v1199_v18 = vpop.permute.xlu0 %1198 }
 0x46b   :  { %1128 = vst.msk [vmem:[#allocation3 + $0x50] sm:$0xf] %vm1107_vm5, %v3096_v2 }
 0x46c   :  { %1213 = vst.msk [vmem:[#allocation3 + $0x50] sm:$0xf] %vm1150_vm6, %v1199_v18 }
 0x46d   :  { %1235 = vst.msk [vmem:[#allocation3 + $0x50] sm:$0xf] %vm1214_vm7, %v3096_v2 }
 0x46e   :  { %1320 = vst.msk [vmem:[#allocation3 + $0x50] sm:$0xf] %vm1257_vm8, %v1306_v17  ;;  %v1003_v19 = vpop.permute.xlu1 %1002  ;;  %v975_v22 = vpop.permute.xlu0 %974 }
 0x46f   :  { %1342 = vst.msk [vmem:[#allocation3 + $0x50] sm:$0xf] %vm1321_vm9, %v3096_v2  ;;  %v2997_v4 = vld [vmem:[#allocation3 + $0x18] sm:$0xff]   ;;  %v3000_v54 = vld [vmem:[#allocation3] sm:$0xff]  }
 0x470   :  { %1019 = vst.msk [vmem:[#allocation3 + $0x48] sm:$0xf] %vm958_vm3, %v1003_v19  ;;  %991 = vst.msk [vmem:[#allocation3 + $0x2c] sm:$0xf] %vm958_vm3, %v975_v22 }
 0x472   :  { %v1060_v23 = vpop.permute.xlu0 %1059  ;;  %v977_v25 = vpop.permute.xlu1 %976 }
 0x473   :  { %1076 = vst.msk [vmem:[#allocation3 + $0x2c] sm:$0xf] %vm1043_vm4, %v1060_v23 }
 0x474   :  { %992 = vst.msk [vmem:[#allocation3 + $0x30] sm:$0xf] %vm958_vm3, %v977_v25 }
 0x475   :  { %1119 = vst.msk [vmem:[#allocation3 + $0x2c] sm:$0xf] %vm1107_vm5, %v3096_v2 }
 0x476   :  { %v1167_v61 = vpop.permute.xlu0 %1166  ;;  %v1062_v27 = vpop.permute.xlu1 %1061  ;;  %v3001_v56 = vld [vmem:[#allocation3 + $0x50] ss:$0 sps:$4 sm:$0xff]  }
 0x477   :  { %1183 = vst.msk [vmem:[#allocation3 + $0x2c] sm:$0xf] %vm1150_vm6, %v1167_v61  ;;  %v1495_v57 = vsel %vm601_vm1, %v3001_v56, 0 }
 0x478   :  { %1077 = vst.msk [vmem:[#allocation3 + $0x30] sm:$0xf] %vm1043_vm4, %v1062_v27 }
 0x479   :  { %1226 = vst.msk [vmem:[#allocation3 + $0x2c] sm:$0xf] %vm1214_vm7, %v3096_v2 }
 0x47a   :  { %1120 = vst.msk [vmem:[#allocation3 + $0x30] sm:$0xf] %vm1107_vm5, %v3096_v2  ;;  %v1274_v29 = vpop.permute.xlu0 %1273  ;;  %v1169_v30 = vpop.permute.xlu1 %1168 }
 0x47b   :  { %1290 = vst.msk [vmem:[#allocation3 + $0x2c] sm:$0xf] %vm1257_vm8, %v1274_v29 }
 0x47c   :  { %1184 = vst.msk [vmem:[#allocation3 + $0x30] sm:$0xf] %vm1150_vm6, %v1169_v30 }
 0x47d   :  { %1333 = vst.msk [vmem:[#allocation3 + $0x2c] sm:$0xf] %vm1321_vm9, %v3096_v2 }
 0x47e   :  { %1227 = vst.msk [vmem:[#allocation3 + $0x30] sm:$0xf] %vm1214_vm7, %v3096_v2  ;;  %v1031_v16 = vpop.permute.xlu0 %1030  ;;  %v1276_v32 = vpop.permute.xlu1 %1275 }
 0x47f   :  { %1048 = vst.msk [vmem:[#allocation3 + $0x10] sm:$0xf] %vm1043_vm4, %v1031_v16 }
 0x480   :  { %1291 = vst.msk [vmem:[#allocation3 + $0x30] sm:$0xf] %vm1257_vm8, %v1276_v32 }
 0x481   :  { %1112 = vst.msk [vmem:[#allocation3 + $0x10] sm:$0xf] %vm1107_vm5, %v3096_v2 }
 0x482   :  { %1334 = vst.msk [vmem:[#allocation3 + $0x30] sm:$0xf] %vm1321_vm9, %v3096_v2  ;;  %v1138_v33 = vpop.permute.xlu0 %1137  ;;  %v1086_v34 = vpop.permute.xlu1 %1085 }
 0x483   :  { %1155 = vst.msk [vmem:[#allocation3 + $0x10] sm:$0xf] %vm1150_vm6, %v1138_v33 }
 0x484   :  { %1103 = vst.msk [vmem:[#allocation3 + $0x44] sm:$0xf] %vm1043_vm4, %v1086_v34  ;;  %v2995_v39 = vld [vmem:[#allocation3 + $0x28] sm:$0xff]  }
 0x485   :  { %1219 = vst.msk [vmem:[#allocation3 + $0x10] sm:$0xf] %vm1214_vm7, %v3096_v2 }
 0x486   :  { %1125 = vst.msk [vmem:[#allocation3 + $0x44] sm:$0xf] %vm1107_vm5, %v3096_v2  ;;  %v1245_v35 = vpop.permute.xlu0 %1244  ;;  %v1033_v37 = vpop.permute.xlu1 %1032 }
 0x487   :  { %1262 = vst.msk [vmem:[#allocation3 + $0x10] sm:$0xf] %vm1257_vm8, %v1245_v35 }
 0x488   :  { %1049 = vst.msk [vmem:[#allocation3 + $0x14] sm:$0xf] %vm1043_vm4, %v1033_v37 }
 0x489   :  { %v2994_v38 = vld [vmem:[#allocation3 + $0x30] sm:$0xff]   ;;  %1326 = vst.msk [vmem:[#allocation3 + $0x10] sm:$0xf] %vm1321_vm9, %v3096_v2 }
 0x48a   :  { %1113 = vst.msk [vmem:[#allocation3 + $0x14] sm:$0xf] %vm1107_vm5, %v3096_v2  ;;  %1500 = vmatpush1.bf16.msra.mxu1 %v2994_v38  ;;  %v1088_v40 = vpop.permute.xlu0 %1087  ;;  %v1140_v41 = vpop.permute.xlu1 %1139 }
 0x48b   :  { %1501 = vmatprep.subr.bf16.mxu1 %v3096_v2  ;;  %1104 = vst.msk [vmem:[#allocation3 + $0x48] sm:$0xf] %vm1043_vm4, %v1088_v40 }
 0x48c   :  { %1156 = vst.msk [vmem:[#allocation3 + $0x14] sm:$0xf] %vm1150_vm6, %v1140_v41 }
 0x48d   :  { %1126 = vst.msk [vmem:[#allocation3 + $0x48] sm:$0xf] %vm1107_vm5, %v3096_v2 }
 0x48e   :  { %1220 = vst.msk [vmem:[#allocation3 + $0x14] sm:$0xf] %vm1214_vm7, %v3096_v2  ;;  %1502 = vmatpush1.bf16.msra.mxu1 %v2995_v39  ;;  %v1195_v43 = vpop.permute.xlu0 %1194  ;;  %v1247_v44 = vpop.permute.xlu1 %1246 }
 0x48f   :  { %1503 = vmatprep.subr.bf16.mxu1 %v3096_v2  ;;  %1211 = vst.msk [vmem:[#allocation3 + $0x48] sm:$0xf] %vm1150_vm6, %v1195_v43 }
 0x490   :  { %1263 = vst.msk [vmem:[#allocation3 + $0x14] sm:$0xf] %vm1257_vm8, %v1247_v44 }
 0x491   :  { %1233 = vst.msk [vmem:[#allocation3 + $0x48] sm:$0xf] %vm1214_vm7, %v3096_v2 }
 0x492   :  { %1327 = vst.msk [vmem:[#allocation3 + $0x14] sm:$0xf] %vm1321_vm9, %v3096_v2  ;;  %1504 = vmatpush1.bf16.msra.mxu1 %v2996_v42  ;;  %v1005_v45 = vpop.permute.xlu0 %1004  ;;  %v1193_v46 = vpop.permute.xlu1 %1192 }
 0x493   :  { %1505 = vmatprep.subr.bf16.mxu1 %v3096_v2  ;;  %1020 = vst.msk [vmem:[#allocation3 + $0x4c] sm:$0xf] %vm958_vm3, %v1005_v45 }
 0x494   :  { %1210 = vst.msk [vmem:[#allocation3 + $0x44] sm:$0xf] %vm1150_vm6, %v1193_v46 }
 0x495   :  { %1232 = vst.msk [vmem:[#allocation3 + $0x44] sm:$0xf] %vm1214_vm7, %v3096_v2 }
 0x496   :  { %1506 = vmatpush1.bf16.msra.mxu1 %v2997_v4  ;;  %v1302_v47 = vpop.permute.xlu0 %1301  ;;  %v1090_v48 = vpop.permute.xlu1 %1089 }
 0x497   :  { %1507 = vmatprep.subr.bf16.mxu1 %v3096_v2  ;;  %1318 = vst.msk [vmem:[#allocation3 + $0x48] sm:$0xf] %vm1257_vm8, %v1302_v47 }
 0x498   :  { %1105 = vst.msk [vmem:[#allocation3 + $0x4c] sm:$0xf] %vm1043_vm4, %v1090_v48 }
 0x499   :  { %v2998_v49 = vld [vmem:[#allocation3 + $0x10] sm:$0xff]   ;;  %1340 = vst.msk [vmem:[#allocation3 + $0x48] sm:$0xf] %vm1321_vm9, %v3096_v2 }
 0x49a   :  { %1127 = vst.msk [vmem:[#allocation3 + $0x4c] sm:$0xf] %vm1107_vm5, %v3096_v2  ;;  %1508 = vmatpush1.bf16.msra.mxu1 %v2998_v49  ;;  %v1191_v52 = vpop.permute.xlu0 %1190  ;;  %v1197_v53 = vpop.permute.xlu1 %1196 }
 0x49b   :  { %1509 = vmatprep.subr.bf16.mxu1 %v3096_v2  ;;  %1209 = vst.msk [vmem:[#allocation3 + $0x40] sm:$0xf] %vm1150_vm6, %v1191_v52  ;;  %1212 = vst.msk [vmem:[#allocation3 + $0x4c] sm:$0xf] %vm1150_vm6, %v1197_v53 }
 0x49c   :  { %1231 = vst.msk [vmem:[#allocation3 + $0x40] sm:$0xf] %vm1214_vm7, %v3096_v2  ;;  %1234 = vst.msk [vmem:[#allocation3 + $0x4c] sm:$0xf] %vm1214_vm7, %v3096_v2 }
 0x49e   :  { %1510 = vmatpush1.bf16.msra.mxu1 %v2999_v51  ;;  %v1298_v55 = vpop.permute.xlu0 %1297  ;;  %v1304_v21 = vpop.permute.xlu1 %1303 }
 0x49f   :  { %1511 = vmatprep.subr.bf16.mxu1 %v3096_v2  ;;  %1316 = vst.msk [vmem:[#allocation3 + $0x40] sm:$0xf] %vm1257_vm8, %v1298_v55  ;;  %1319 = vst.msk [vmem:[#allocation3 + $0x4c] sm:$0xf] %vm1257_vm8, %v1304_v21 }
 0x4a0   :  { %1338 = vst.msk [vmem:[#allocation3 + $0x40] sm:$0xf] %vm1321_vm9, %v3096_v2  ;;  %1341 = vst.msk [vmem:[#allocation3 + $0x4c] sm:$0xf] %vm1321_vm9, %v3096_v2 }
 0x4a2   :  { %1512 = vmatpush1.bf16.msra.mxu1 %v3000_v54  ;;  %v1300_v26 = vpop.permute.xlu1 %1299 }
 0x4a3   :  { %1523 = vmatprep.subr.bf16.mxu1 %v3096_v2  ;;  %1317 = vst.msk [vmem:[#allocation3 + $0x44] sm:$0xf] %vm1257_vm8, %v1300_v26 }
 0x4a4   :  { %1339 = vst.msk [vmem:[#allocation3 + $0x44] sm:$0xf] %vm1321_vm9, %v3096_v2 }
 0x4a6   :  { %1524 = vmatpush2.bf16.msra.mxu1 %v1495_v57 }
 0x4a7   :  { %1525 = vmatprep.subr.bf16.mxu1 %v3096_v2  ;;  %v3002_v58 = vld [vmem:[#allocation3 + $0x48] sm:$0xff]  }
 0x4aa   :  { %1526 = vmatpush2.bf16.msra.mxu1 %v3002_v58 }
 0x4ab   :  { %1527 = vmatprep.subr.bf16.mxu1 %v3096_v2  ;;  %v3003_v59 = vld [vmem:[#allocation3 + $0x40] sm:$0xff]  }
 0x4ae   :  { %1528 = vmatpush2.bf16.msra.mxu1 %v3003_v59 }
 0x4b1   :  { %1530 = vmatmul.mubr.bf16.vlgmr.msra.gmra.mxu1 %v3004_v60 }
 0x4b2   :  { %2834 = vmatprep.mubr.msk.bf16.mxu1 %vm1478_vm10, %v3007_v62 }
 0x4b9   :  { %1538 = vmatmul.mubr.bf16.gmra.mxu1 %v3009_v63 }
 0x4ba   :  { %2835 = vmatprep.mubr.msk.bf16.mxu1 %vm1478_vm10, %v3010_v0 }
 0x4c1   :  { %1546 = vmatmul.mubr.bf16.gmra.mxu1 %v3012_v24 }
 0x4c2   :  { %2836 = vmatprep.mubr.msk.bf16.mxu1 %vm1478_vm10, %v3013_v31 }
 0x4c9   :  { %1554 = vmatmul.mubr.bf16.gmra.mxu1 %v3015_v3 }
 0x4ca   :  { %2837 = vmatprep.mubr.msk.bf16.mxu1 %vm1478_vm10, %v2821_v6 }
 0x4d1   :  { %1562 = vmatmul.mubr.bf16.gmra.mxu1 %v2820_v7 }
 0x571   :  { %v4213_v8 = vpop.f32.mrf.mxu1 }
 0x572   :  { %v1606_v43 = vmul.f32 %v4213_v8, %v4213_v8  ;;  %v1570_v45 = vsel %vm1569_vm11, %v4213_v8, 0.0 }
 0x573   :  { %v1533_v9 = vpop.f32.mrf.mxu1 }
 0x574   :  { %v1615_v48 = vsel %vm1569_vm11, %v1606_v43, 0.0 }
 0x575   :  { %v4215_v36 = vpop.f32.mrf.mxu1 }
 0x576   :  { %v1607_v33 = vmul.f32 %v4215_v36, %v4215_v36  ;;  %v1573_v35 = vsel %vm1569_vm11, %v4215_v36, 0.0 }
 0x577   :  { %v1536_v20 = vpop.f32.mrf.mxu1 }
 0x578   :  { %v1618_v40 = vsel %vm1569_vm11, %v1607_v33, 0.0 }
 0x579   :  { %v4217_v28 = vpop.f32.mrf.mxu1 }
 0x57a   :  { %v1608_v44 = vmul.f32 %v4217_v28, %v4217_v28  ;;  %v1576_v4 = vsel %vm1569_vm11, %v4217_v28, 0.0 }
 0x57b   :  { %v1541_v5 = vpop.f32.mrf.mxu1 }
 0x57c   :  { %v1621_v47 = vsel %vm1569_vm11, %v1608_v44, 0.0 }
 0x57d   :  { %v4219_v10 = vpop.f32.mrf.mxu1 }
 0x57e   :  { %v1609_v11 = vmul.f32 %v4219_v10, %v4219_v10  ;;  %v1579_v12 = vsel %vm1569_vm11, %v4219_v10, 0.0 }
 0x57f   :  { %1580 = vadd.xlane.f32.xlu1 %v1579_v12  ;;  %v1544_v13 = vpop.f32.mrf.mxu1 }
 0x580   :  { %v1624_v15 = vsel %vm1569_vm11, %v1609_v11, 0.0 }
 0x581   :  { %v4225_v14 = vpop.f32.mrf.mxu1 }
 0x582   :  { %v1610_v50 = vmul.f32 %v4225_v14, %v4225_v14  ;;  %v1582_v17 = vsel %vm1569_vm11, %v4225_v14, 0.0 }
 0x583   :  { %1625 = vadd.xlane.f32.xlu1 %v1624_v15  ;;  %1583 = vadd.xlane.f32.xlu0 %v1582_v17  ;;  %v1549_v18 = vpop.f32.mrf.mxu1 }
 0x584   :  { %v1627_v22 = vsel %vm1569_vm11, %v1610_v50, 0.0 }
 0x585   :  { %v4232_v19 = vpop.f32.mrf.mxu1 }
 0x586   :  { %v1611_v61 = vmul.f32 %v4232_v19, %v4232_v19  ;;  %v1585_v27 = vsel %vm1569_vm11, %v4232_v19, 0.0 }
 0x587   :  { %1628 = vadd.xlane.f32.xlu0 %v1627_v22  ;;  %v1552_v23 = vpop.f32.mrf.mxu1 }
 0x588   :  { %v1630_v34 = vsel %vm1569_vm11, %v1611_v61, 0.0 }
 0x589   :  { %v4235_v25 = vpop.f32.mrf.mxu1 }
 0x58a   :  { %v1588_v29 = vsel %vm1569_vm11, %v4235_v25, 0.0  ;;  %v1612_v16 = vmul.f32 %v4235_v25, %v4235_v25 }
 0x58b   :  { %1586 = vadd.xlane.f32.xlu0 %v1585_v27  ;;  %1589 = vadd.xlane.f32.xlu1 %v1588_v29  ;;  %v1557_v30 = vpop.f32.mrf.mxu1 }
 0x58c   :  { %v1633_v38 = vsel %vm1569_vm11, %v1612_v16, 0.0 }
 0x58d   :  { %v4245_v32 = vpop.f32.mrf.mxu1 }
 0x58e   :  { %v1591_v52 = vsel %vm1569_vm11, %v4245_v32, 0.0  ;;  %v1613_v54 = vmul.f32 %v4245_v32, %v4245_v32 }
 0x58f   :  { %1631 = vadd.xlane.f32.xlu0 %v1630_v34  ;;  %1574 = vadd.xlane.f32.xlu1 %v1573_v35  ;;  %v1560_v37 = vpop.f32.mrf.mxu1 }
 0x590   :  { %v1636_v55 = vsel %vm1569_vm11, %v1613_v54, 0.0  ;;  %v1717_v54 = vld [vmem:[%s4757_s6 + $0x18] sm:$0xff] }
 0x591   :  { %v4253_v39 = vpop.f32.mrf.mxu1 }
 0x592   :  { %v1614_v49 = vmul.f32 %v4253_v39, %v4253_v39  ;;  %v1594_v51 = vsel %vm1569_vm11, %v4253_v39, 0.0 }
 0x593   :  { %1634 = vadd.xlane.f32.xlu0 %v1633_v38  ;;  %1619 = vadd.xlane.f32.xlu1 %v1618_v40  ;;  %v1565_v41 = vpop.f32.mrf.mxu1  ;;  %v1681_v40 = vld [vmem:[%s4756_s5 + $0x18] sm:$0xff] }
 0x594   :  { %v1639_v53 = vsel %vm1569_vm11, %v1614_v49, 0.0 }
 0x595   :  { %v1566_v42 = vpop.f32.mrf.mxu1 }
 0x597   :  { %1577 = vadd.xlane.f32.xlu0 %v1576_v4  ;;  %1571 = vadd.xlane.f32.xlu1 %v1570_v45  ;;  %v1567_v46 = vpop.f32.mrf.mxu1 }
 0x59b   :  { %1622 = vadd.xlane.f32.xlu0 %v1621_v47  ;;  %1616 = vadd.xlane.f32.xlu1 %v1615_v48 }
 0x59f   :  { %1592 = vadd.xlane.f32.xlu1 %v1591_v52  ;;  %1595 = vadd.xlane.f32.xlu0 %v1594_v51 }
 0x5a3   :  { %1640 = vadd.xlane.f32.xlu0 %v1639_v53  ;;  %v1682_v53 = vld [vmem:[%s4756_s5 + $0x20] sm:$0xff] }
 0x5a7   :  { %1637 = vadd.xlane.f32.xlu0 %v1636_v55 }
 0x608   :  { %v1581_v21 = vpop.xlane.xlu1 %1580 }
 0x609   :  { %v1600_v56 = vmul.f32 0.03846154, %v1581_v21 }
 0x60b   :  { %v1654_v58 = vmul.f32 %v1600_v56, %v1600_v56 }
 0x60c   :  { %v1626_v26 = vpop.xlane.xlu1 %1625  ;;  %v1584_v57 = vpop.xlane.xlu0 %1583 }
 0x60d   :  { %v1645_v59 = vmul.f32 0.03846154, %v1626_v26  ;;  %v4276_v60 = vmul.f32 0.03846154, %v1584_v57 }
 0x60f   :  { %v1663_v62 = vsub.f32 %v1645_v59, %v1654_v58  ;;  %v1655_v24 = vmul.f32 %v4276_v60, %v4276_v60 }
 0x610   :  { %v1629_v63 = vpop.xlane.xlu0 %1628 }
 0x611   :  { %v1672_v0 = vmax.f32 %v1663_v62, 0.0  ;;  %v1646_v31 = vmul.f32 0.03846154, %v1629_v63 }
 0x613   :  { %v1690_v1 = vadd.f32 1e-05, %v1672_v0  ;;  %v1664_v3 = vsub.f32 %v1646_v31, %v1655_v24 }
 0x614   :  { %v1587_v6 = vpop.xlane.xlu0 %1586  ;;  %v1590_v7 = vpop.xlane.xlu1 %1589 }
 0x615   :  { %3060 = vrsqrt.f32 %v1690_v1  ;;  %v1673_v9 = vmax.f32 %v1664_v3, 0.0  ;;  %v4280_v20 = vmul.f32 0.03846154, %v1587_v6  ;;  %v4282_v11 = vmul.f32 0.03846154, %v1590_v7 }
 0x617   :  { %v1691_v5 = vadd.f32 1e-05, %v1673_v9  ;;  %v1656_v50 = vmul.f32 %v4280_v20, %v4280_v20  ;;  %v1657_v18 = vmul.f32 %v4282_v11, %v4282_v11 }
 0x618   :  { %v1632_v12 = vpop.xlane.xlu0 %1631  ;;  %v1575_v13 = vpop.xlane.xlu1 %1574 }
 0x619   :  { %3062 = vrsqrt.f32 %v1691_v5  ;;  %v1647_v15 = vmul.f32 0.03846154, %v1632_v12  ;;  %v4286_v17 = vmul.f32 0.03846154, %v1575_v13  ;;  %v1683_v5 = vld [vmem:[%s4756_s5 + $0x28] sm:$0xff] }
 0x61b   :  { %v1665_v22 = vsub.f32 %v1647_v15, %v1656_v50  ;;  %v1652_v29 = vmul.f32 %v4286_v17, %v4286_v17 }
 0x61c   :  { %v1635_v23 = vpop.xlane.xlu0 %1634  ;;  %v1620_v61 = vpop.xlane.xlu1 %1619 }
 0x61d   :  { %v1674_v27 = vmax.f32 %v1665_v22, 0.0  ;;  %v1648_v30 = vmul.f32 0.03846154, %v1635_v23  ;;  %v1643_v16 = vmul.f32 0.03846154, %v1620_v61  ;;  %v1718_v23 = vld [vmem:[%s4757_s6 + $0x20] sm:$0xff] }
 0x61f   :  { %v1692_v33 = vadd.f32 1e-05, %v1674_v27  ;;  %v1666_v34 = vsub.f32 %v1648_v30, %v1657_v18  ;;  %v1661_v35 = vsub.f32 %v1643_v16, %v1652_v29  ;;  %v1684_v27 = vld [vmem:[%s4756_s5 + $0x30] sm:$0xff] }
 0x620   :  { %v1578_v37 = vpop.xlane.xlu0 %1577  ;;  %v1572_v38 = vpop.xlane.xlu1 %1571 }
 0x621   :  { %3064 = vrsqrt.f32 %v1692_v33  ;;  %v1675_v41 = vmax.f32 %v1666_v34, 0.0  ;;  %v1670_v42 = vmax.f32 %v1661_v35, 0.0  ;;  %v4295_v43 = vmul.f32 0.03846154, %v1578_v37 }
 0x622   :  { %v3061_v44 = vpop.eup %3060  ;;  %v4297_v4 = vmul.f32 0.03846154, %v1572_v38 }
 0x623   :  { %v1693_v45 = vadd.f32 1e-05, %v1675_v41  ;;  %v1688_v46 = vadd.f32 1e-05, %v1670_v42  ;;  %v1708_v47 = vmul.f32 %v3061_v44, %v1681_v40  ;;  %v1653_v48 = vmul.f32 %v4295_v43, %v4295_v43  ;;  %v1719_v42 = vld [vmem:[%s4757_s6 + $0x28] sm:$0xff] }
 0x624   :  { %v1651_v49 = vmul.f32 %v4297_v4, %v4297_v4  ;;  %v1623_v51 = vpop.xlane.xlu0 %1622  ;;  %v1617_v52 = vpop.xlane.xlu1 %1616 }
 0x625   :  { %3066 = vrsqrt.f32 %v1693_v45  ;;  %v1644_v55 = vmul.f32 0.03846154, %v1623_v51  ;;  %v1642_v21 = vmul.f32 0.03846154, %v1617_v52  ;;  %1758 = vperm.xlu0 %2947, %v1708_v47   ;;  %v1726_v26 = vmul.f32 %v1708_v47, %v1600_v56  ;;  %v1720_v51 = vld [vmem:[%s4757_s6 + $0x30] sm:$0xff] }
 0x626   :  { %v3063_v57 = vpop.eup %3062  ;;  %3068 = vrsqrt.f32 %v1688_v46  ;;  %v1680_v52 = vld [vmem:[%s4756_s5 + $0x10] sm:$0xff] }
 0x627   :  { %v1662_v58 = vsub.f32 %v1644_v55, %v1653_v48  ;;  %v1660_v59 = vsub.f32 %v1642_v21, %v1651_v49  ;;  %v1709_v62 = vmul.f32 %v3063_v57, %v1682_v53  ;;  %v1735_v63 = vsub.f32 %v1717_v54, %v1726_v26 }
 0x628   :  { %v1596_v0 = vpop.xlane.xlu0 %1595  ;;  %v1593_v3 = vpop.xlane.xlu1 %1592 }
 0x629   :  { %v1671_v24 = vmax.f32 %v1662_v58, 0.0  ;;  %v1669_v31 = vmax.f32 %v1660_v59, 0.0  ;;  %v4309_v1 = vmul.f32 0.03846154, %v1596_v0  ;;  %1763 = vperm.xlu1 %2948, %v1709_v62   ;;  %1812 = vperm.xlu0 %2947, %v1735_v63   ;;  %v4316_v12 = vmul.f32 0.03846154, %v1593_v3 }
 0x62a   :  { %v1727_v15 = vmul.f32 %v1709_v62, %v4276_v60  ;;  %v1679_v60 = vld [vmem:[%s4756_s5 + $0x8] sm:$0xff]  ;;  %v1716_v59 = vld [vmem:[%s4757_s6 + $0x10] sm:$0xff]  ;;  %v1714_v62 = vld [vmem:[%s4757_s6] sm:$0xff] }
 0x62b   :  { %v1689_v6 = vadd.f32 1e-05, %v1671_v24  ;;  %v1687_v7 = vadd.f32 1e-05, %v1669_v31  ;;  %v1659_v9 = vmul.f32 %v4309_v1, %v4309_v1  ;;  %v1658_v29 = vmul.f32 %v4316_v12, %v4316_v12  ;;  %v1686_v63 = vld [vmem:[%s4756_s5 + $0x40] sm:$0xff] }
 0x62c   :  { %v1641_v56 = vpop.xlane.xlu0 %1640  ;;  %v1736_v34 = vsub.f32 %v1718_v23, %v1727_v15 }
 0x62d   :  { %3070 = vrsqrt.f32 %v1689_v6  ;;  %v1650_v13 = vmul.f32 0.03846154, %v1641_v56 }
 0x62e   :  { %v3065_v50 = vpop.eup %3064  ;;  %3072 = vrsqrt.f32 %v1687_v7 }
 0x62f   :  { %v1668_v18 = vsub.f32 %v1650_v13, %v1659_v9  ;;  %v1710_v22 = vmul.f32 %v3065_v50, %v1683_v5  ;;  %v1722_v9 = vld [vmem:[%s4757_s6 + $0x40] sm:$0xff]  ;;  %v1721_v13 = vld [vmem:[%s4757_s6 + $0x38] sm:$0xff] }
 0x630   :  { %v1638_v61 = vpop.xlane.xlu0 %1637 }
 0x631   :  { %v1677_v30 = vmax.f32 %v1668_v18, 0.0  ;;  %v1649_v16 = vmul.f32 0.03846154, %v1638_v61  ;;  %1768 = vperm.xlu1 %2948, %v1710_v22   ;;  %v1728_v41 = vmul.f32 %v1710_v22, %v4280_v20  ;;  %v1715_v20 = vld [vmem:[%s4757_s6 + $0x8] sm:$0xff]  ;;  %s3119_s6 = smov 112  }
 0x632   :  { %v3067_v33 = vpop.eup %3066 }
 0x633   :  { %v3069_v35 = vpop.eup %3068  ;;  %v1695_v37 = vadd.f32 1e-05, %v1677_v30  ;;  %v1667_v38 = vsub.f32 %v1649_v16, %v1658_v29  ;;  %v1711_v40 = vmul.f32 %v3067_v33, %v1684_v27  ;;  %v1737_v47 = vsub.f32 %v1719_v42, %v1728_v41 }
 0x634   :  { %v1706_v44 = vmul.f32 %v3069_v35, %v1679_v60 }
 0x635   :  { %3074 = vrsqrt.f32 %v1695_v37  ;;  %v1676_v45 = vmax.f32 %v1667_v38, 0.0  ;;  %1817 = vperm.xlu1 %2948, %v1736_v34   ;;  %1773 = vperm.xlu0 %2947, %v1711_v40   ;;  %v1729_v48 = vmul.f32 %v1711_v40, %v4282_v11  ;;  %v1678_v11 = vld [vmem:[%s4756_s5] sm:$0xff] }
 0x636   :  { %v1724_v49 = vmul.f32 %v1706_v44, %v4286_v17 }
 0x637   :  { %v1694_v46 = vadd.f32 1e-05, %v1676_v45  ;;  %v1738_v54 = vsub.f32 %v1720_v51, %v1729_v48 }
 0x638   :  { %v1733_v55 = vsub.f32 %v1715_v20, %v1724_v49 }
 0x639   :  { %3076 = vrsqrt.f32 %v1694_v46  ;;  %1822 = vperm.xlu1 %2948, %v1737_v47   ;;  %1748 = vperm.xlu0 %2947, %v1706_v44  }
 0x63a   :  { %v3071_v17 = vpop.eup %3070 }
 0x63b   :  { %v3073_v53 = vpop.eup %3072  ;;  %v1707_v21 = vmul.f32 %v3071_v17, %v1680_v52 }
 0x63c   :  { %v1705_v26 = vmul.f32 %v3073_v53, %v1678_v11 }
 0x63d   :  { %1827 = vperm.xlu1 %2948, %v1738_v54   ;;  %1802 = vperm.xlu0 %2947, %v1733_v55   ;;  %v1725_v57 = vmul.f32 %v1707_v21, %v4295_v43 }
 0x63e   :  { %v1723_v58 = vmul.f32 %v1705_v26, %v4297_v4  ;;  %v1685_v4 = vld [vmem:[%s4756_s5 + $0x38] sm:$0xff]  ;;  %s3118_s5 = smov 120  }
 0x63f   :  { %v1734_v24 = vsub.f32 %v1716_v59, %v1725_v57 }
 0x640   :  { %v1732_v31 = vsub.f32 %v1714_v62, %v1723_v58 }
 0x641   :  { %1753 = vperm.xlu1 %2948, %v1707_v21   ;;  %1743 = vperm.xlu0 %2947, %v1705_v26  }
 0x642   :  { %v3075_v0 = vpop.eup %3074 }
 0x643   :  { %v1713_v43 = vmul.f32 %v3075_v0, %v1686_v63 }
 0x645   :  { %1807 = vperm.xlu1 %2948, %v1734_v24   ;;  %1797 = vperm.xlu0 %2947, %v1732_v31   ;;  %v1731_v7 = vmul.f32 %v1713_v43, %v4309_v1 }
 0x646   :  { %v3077_v3 = vpop.eup %3076 }
 0x647   :  { %v1712_v6 = vmul.f32 %v3077_v3, %v1685_v4  ;;  %v1740_v56 = vsub.f32 %v1722_v9, %v1731_v7 }
 0x649   :  { %1783 = vperm.xlu1 %2948, %v1713_v43   ;;  %1778 = vperm.xlu0 %2947, %v1712_v6   ;;  %v1730_v5 = vmul.f32 %v1712_v6, %v4316_v12 }
 0x64b   :  { %v1739_v50 = vsub.f32 %v1721_v13, %v1730_v5 }
 0x64d   :  { %1837 = vperm.xlu1 %2948, %v1740_v56  }
 0x651   :  { %1832 = vperm.xlu1 %2948, %v1739_v50  }
 0x6a0   :  { %v1759_v15 = vpop.permute.xlu0 %1758 }
 0x6a1   :  { %v1789_v23 = vmul.f32 %v1759_v15, %v4219_v10 }
 0x6a4   :  { %v1764_v18 = vpop.permute.xlu1 %1763  ;;  %v1813_v22 = vpop.permute.xlu0 %1812 }
 0x6a5   :  { %v1790_v61 = vmul.f32 %v1764_v18, %v4225_v14  ;;  %v1843_v30 = vadd.f32 %v1813_v22, %v1789_v23 }
 0x6ac   :  { %v1769_v1 = vpop.permute.xlu1 %1768 }
 0x6ad   :  { %v1791_v34 = vmul.f32 %v1769_v1, %v4232_v19 }
 0x6b0   :  { %v1818_v27 = vpop.permute.xlu1 %1817  ;;  %v1774_v29 = vpop.permute.xlu0 %1773 }
 0x6b1   :  { %v1844_v16 = vadd.f32 %v1818_v27, %v1790_v61  ;;  %v1792_v35 = vmul.f32 %v1774_v29, %v4235_v25 }
 0x6b3   :  { %v2969_v12 = vpack.i.bf16 %v1844_v16, %v1843_v30 }
 0x6b4   :  { %v1823_v60 = vpop.permute.xlu1 %1822  ;;  %v1749_v33 = vpop.permute.xlu0 %1748 }
 0x6b5   :  { %2970 = vrot.lane.b32.xlu1 %v2969_v12, %s3118_s5  ;;  %v1845_v40 = vadd.f32 %v1823_v60, %v1791_v34  ;;  %v1787_v44 = vmul.f32 %v1749_v33, %v4215_v36 }
 0x6b8   :  { %v1828_v37 = vpop.permute.xlu1 %1827  ;;  %v1803_v38 = vpop.permute.xlu0 %1802 }
 0x6b9   :  { %v1846_v10 = vadd.f32 %v1828_v37, %v1792_v35  ;;  %v1841_v47 = vadd.f32 %v1803_v38, %v1787_v44 }
 0x6bb   :  { %v2964_v41 = vpack.i.bf16 %v1846_v10, %v1845_v40 }
 0x6bc   :  { %v1754_v14 = vpop.permute.xlu1 %1753  ;;  %v1744_v42 = vpop.permute.xlu0 %1743 }
 0x6bd   :  { %2965 = vrot.lane.b32.xlu0 %v2964_v41, %s3118_s5  ;;  %v1788_v45 = vmul.f32 %v1754_v14, %v4217_v28  ;;  %v1786_v25 = vmul.f32 %v1744_v42, %v4213_v8 }
 0x6c0   :  { %v1808_v46 = vpop.permute.xlu1 %1807  ;;  %v1798_v49 = vpop.permute.xlu0 %1797 }
 0x6c1   :  { %v1842_v48 = vadd.f32 %v1808_v46, %v1788_v45  ;;  %v1840_v17 = vadd.f32 %v1798_v49, %v1786_v25 }
 0x6c3   :  { %v2974_v19 = vpack.i.bf16 %v1842_v48, %v1841_v47 }
 0x6c4   :  { %v1784_v51 = vpop.permute.xlu1 %1783  ;;  %v1779_v52 = vpop.permute.xlu0 %1778 }
 0x6c5   :  { %2975 = vrot.lane.b32.xlu0 %v2974_v19, %s3118_s5  ;;  %v1794_v20 = vmul.f32 %v1784_v51, %v4253_v39  ;;  %v1793_v36 = vmul.f32 %v1779_v52, %v4245_v32 }
 0x6c8   :  { %v1838_v11 = vpop.permute.xlu1 %1837 }
 0x6c9   :  { %v1848_v53 = vadd.f32 %v1838_v11, %v1794_v20 }
 0x6cb   :  { %v2979_v54 = vpack.i.bf16 %v1848_v53, %v1840_v17 }
 0x6cc   :  { %v1833_v28 = vpop.permute.xlu1 %1832 }
 0x6cd   :  { %v1847_v55 = vadd.f32 %v1833_v28, %v1793_v36  ;;  %2980 = vrot.lane.b32.xlu1 %v2979_v54, %s3118_s5 }
 0x6cf   :  { %1872 = vrot.lane.b32.xlu0 %v1847_v55, %s3118_s5 }
 0x727   :  { %v2971_v21 = vpop.permute.xlu1 %2970 }
 0x728   :  { %v2973_v26 = vunpack.i.h.bf16 %v2971_v21  ;;  %v2972_v57 = vunpack.i.l.bf16 %v2971_v21 }
 0x72a   :  { %v1889_v58 = vmax.f32 %v1844_v16, %v2973_v26  ;;  %v1888_v8 = vmax.f32 %v1843_v30, %v2972_v57 }
 0x72c   :  { %v1898_v59 = vmax.f32 %v1889_v58, 0.0  ;;  %v1897_v39 = vmax.f32 %v1888_v8, 0.0 }
 0x72e   :  { %v4384_v62 = vpack.c.bf16 %v1898_v59, %v1898_v59  ;;  %v4386_v63 = vpack.c.bf16 %v1897_v39, %v1897_v39 }
 0x72f   :  { %v2966_v32 = vpop.permute.xlu0 %2965 }
 0x730   :  { %v2968_v0 = vunpack.i.h.bf16 %v2966_v32  ;;  %v2967_v24 = vunpack.i.l.bf16 %v2966_v32  ;;  %1944 = vst.msk [vmem:[#allocation4 + $0xc] sm:$0xf] %vm1940_vm12, %v4386_v63  ;;  %1945 = vst.msk [vmem:[#allocation4 + $0x10] sm:$0xf] %vm1940_vm12, %v4384_v62 }
 0x732   :  { %v1891_v31 = vmax.f32 %v1846_v10, %v2968_v0  ;;  %v1890_v43 = vmax.f32 %v1845_v40, %v2967_v24  ;;  %v3034_v40 = vld [vmem:[%s4758_s7 + $0x4] ss:$8 sps:$4 sm:$0xff]  }
 0x733   :  { %2871 = vmatprep.mubr.msk.bf16.mxu0 %vm2290_vm13, %v3034_v40  ;;  %v3037_v40 = vld [vmem:[%s4758_s7 + $0x10] ss:$8 sps:$4 sm:$0xff]  }
 0x734   :  { %v1900_v4 = vmax.f32 %v1891_v31, 0.0  ;;  %v1899_v3 = vmax.f32 %v1890_v43, 0.0 }
 0x736   :  { %v2889_v6 = vpack.c.bf16 %v1900_v4, %v1900_v4  ;;  %v4392_v7 = vpack.c.bf16 %v1899_v3, %v1899_v3 }
 0x737   :  { %v2976_v9 = vpop.permute.xlu0 %2975 }
 0x738   :  { %v2978_v56 = vunpack.i.h.bf16 %v2976_v9  ;;  %v2977_v5 = vunpack.i.l.bf16 %v2976_v9  ;;  %1946 = vst.msk [vmem:[#allocation4 + $0x14] sm:$0xf] %vm1940_vm12, %v4392_v7  ;;  %1947 = vst.msk [vmem:[#allocation4 + $0x18] sm:$0xf] %vm1940_vm12, %v2889_v6 }
 0x73a   :  { %v1887_v13 = vmax.f32 %v1842_v48, %v2978_v56  ;;  %v1886_v50 = vmax.f32 %v1841_v47, %v2977_v5 }
 0x73c   :  { %v1896_v15 = vmax.f32 %v1887_v13, 0.0  ;;  %v1895_v18 = vmax.f32 %v1886_v50, 0.0 }
 0x73e   :  { %v2885_v22 = vpack.c.bf16 %v1896_v15, %v1896_v15  ;;  %v2884_v1 = vpack.c.bf16 %v1895_v18, %v1895_v18 }
 0x73f   :  { %v2981_v23 = vpop.permute.xlu1 %2980 }
 0x740   :  { %v2983_v61 = vunpack.i.h.bf16 %v2981_v23  ;;  %v2982_v27 = vunpack.i.l.bf16 %v2981_v23  ;;  %1942 = vst.msk [vmem:[#allocation4 + $0x4] sm:$0xf] %vm1940_vm12, %v2884_v1  ;;  %1943 = vst.msk [vmem:[#allocation4 + $0x8] sm:$0xf] %vm1940_vm12, %v2885_v22 }
 0x741   :  { %v1873_v29 = vpop.permute.xlu0 %1872 }
 0x742   :  { %v1893_v30 = vmax.f32 %v1848_v53, %v2983_v61  ;;  %v1885_v16 = vmax.f32 %v1840_v17, %v2982_v27  ;;  %v1892_v12 = vmax.f32 %v1847_v55, %v1873_v29 }
 0x744   :  { %v1902_v60 = vmax.f32 %v1893_v30, 0.0  ;;  %v1894_v33 = vmax.f32 %v1885_v16, 0.0  ;;  %v1901_v34 = vmax.f32 %v1892_v12, 0.0 }
 0x746   :  { %v2891_v35 = vpack.c.bf16 %v1902_v60, %v1902_v60  ;;  %v2883_v37 = vpack.c.bf16 %v1894_v33, %v1894_v33  ;;  %v2890_v38 = vpack.c.bf16 %v1901_v34, %v1901_v34 }
 0x748   :  { %1950 = vrot.lane.b32.xlu1 %v2883_v37, %s3119_s6  ;;  %2022 = vrot.lane.b32.xlu0 %v2883_v37, %s3114_s21  ;;  %1941 = vst.msk [vmem:[#allocation4] sm:$0xf] %vm1940_vm12, %v2883_v37  ;;  %1948 = vst.msk [vmem:[#allocation4 + $0x1c] sm:$0xf] %vm1940_vm12, %v2890_v38 }
 0x749   :  { %1949 = vst.msk [vmem:[#allocation4 + $0x20] sm:$0xf] %vm1940_vm12, %v2891_v35 }
 0x74c   :  { %2059 = vrot.lane.b32.xlu1 %v2883_v37, %s3115_s23  ;;  %1954 = vrot.lane.b32.xlu0 %v2885_v22, %s3119_s6 }
 0x750   :  { %2063 = vrot.lane.b32.xlu0 %v2885_v22, %s3115_s23  ;;  %1952 = vrot.lane.b32.xlu1 %v2884_v1, %s3119_s6 }
 0x754   :  { %2026 = vrot.lane.b32.xlu0 %v2885_v22, %s3114_s21  ;;  %2061 = vrot.lane.b32.xlu1 %v2884_v1, %s3115_s23 }
 0x758   :  { %1958 = vrot.lane.b32.xlu0 %v4384_v62, %s3119_s6  ;;  %2024 = vrot.lane.b32.xlu1 %v2884_v1, %s3114_s21 }
 0x75c   :  { %2067 = vrot.lane.b32.xlu0 %v4384_v62, %s3115_s23  ;;  %1956 = vrot.lane.b32.xlu1 %v4386_v63, %s3119_s6 }
 0x760   :  { %2030 = vrot.lane.b32.xlu0 %v4384_v62, %s3114_s21  ;;  %2065 = vrot.lane.b32.xlu1 %v4386_v63, %s3115_s23 }
 0x764   :  { %2028 = vrot.lane.b32.xlu1 %v4386_v63, %s3114_s21  ;;  %1962 = vrot.lane.b32.xlu0 %v2889_v6, %s3119_s6 }
 0x768   :  { %2071 = vrot.lane.b32.xlu0 %v2889_v6, %s3115_s23  ;;  %1960 = vrot.lane.b32.xlu1 %v4392_v7, %s3119_s6 }
 0x76c   :  { %2034 = vrot.lane.b32.xlu0 %v2889_v6, %s3114_s21  ;;  %2069 = vrot.lane.b32.xlu1 %v4392_v7, %s3115_s23 }
 0x770   :  { %1998 = vrot.lane.b32.xlu0 %v2889_v6, %s3120_s12  ;;  %2032 = vrot.lane.b32.xlu1 %v4392_v7, %s3114_s21 }
 0x774   :  { %2038 = vrot.lane.b32.xlu0 %v2891_v35, %s3114_s21  ;;  %2036 = vrot.lane.b32.xlu1 %v2890_v38, %s3114_s21 }
 0x778   :  { %2107 = vrot.lane.b32.xlu0 %v2889_v6, %s3121_s13  ;;  %2000 = vrot.lane.b32.xlu1 %v2890_v38, %s3120_s12 }
 0x77c   :  { %1994 = vrot.lane.b32.xlu0 %v4384_v62, %s3120_s12  ;;  %2109 = vrot.lane.b32.xlu1 %v2890_v38, %s3121_s13 }
 0x780   :  { %2103 = vrot.lane.b32.xlu0 %v4384_v62, %s3121_s13  ;;  %1996 = vrot.lane.b32.xlu1 %v4392_v7, %s3120_s12 }
 0x784   :  { %2002 = vrot.lane.b32.xlu0 %v2891_v35, %s3120_s12  ;;  %2105 = vrot.lane.b32.xlu1 %v4392_v7, %s3121_s13 }
 0x788   :  { %1990 = vrot.lane.b32.xlu0 %v2885_v22, %s3120_s12  ;;  %2111 = vrot.lane.b32.xlu1 %v2891_v35, %s3121_s13 }
 0x78c   :  { %2099 = vrot.lane.b32.xlu0 %v2885_v22, %s3121_s13  ;;  %1992 = vrot.lane.b32.xlu1 %v4386_v63, %s3120_s12 }
 0x790   :  { %1986 = vrot.lane.b32.xlu0 %v2883_v37, %s3120_s12  ;;  %2101 = vrot.lane.b32.xlu1 %v4386_v63, %s3121_s13 }
 0x794   :  { %2095 = vrot.lane.b32.xlu0 %v2883_v37, %s3121_s13  ;;  %1988 = vrot.lane.b32.xlu1 %v2884_v1, %s3120_s12  ;;  %v3032_v37 = vld [vmem:[%s4758_s7] ss:$8 sps:$4 sm:$0xff]  }
 0x798   :  { %1964 = vrot.lane.b32.xlu0 %v2890_v38, %s3119_s6  ;;  %2097 = vrot.lane.b32.xlu1 %v2884_v1, %s3121_s13 }
 0x79c   :  { %2073 = vrot.lane.b32.xlu0 %v2890_v38, %s3115_s23  ;;  %1966 = vrot.lane.b32.xlu1 %v2891_v35, %s3119_s6  ;;  %v3035_v38 = vld [vmem:[%s4758_s7 + $0x14] ss:$8 sps:$4 sm:$0xff]   ;;  %s3122_s6 = smov 124  }
 0x7a0   :  { %2075 = vrot.lane.b32.xlu1 %v2891_v35, %s3115_s23 }
 0x7ba   :  { %v1951_v10 = vpop.permute.xlu1 %1950  ;;  %v2023_v41 = vpop.permute.xlu0 %2022 }
 0x7bb   :  { %1977 = vst.msk [vmem:[#allocation4 + $0x24] sm:$0xf] %vm1940_vm12, %v1951_v10  ;;  %v3040_v10 = vld [vmem:[%s4758_s7 + $0x20] ss:$8 sps:$4 sm:$0xff]  }
 0x7bc   :  { %2050 = vst.msk [vmem:[#allocation4] sm:$0xf] %vm2049_vm14, %v2023_v41  ;;  %v3041_v41 = vld [vmem:[%s4758_s7 + $0x34] ss:$8 sps:$4 sm:$0xff]  }
 0x7be   :  { %v2060_v14 = vpop.permute.xlu1 %2059  ;;  %v1955_v42 = vpop.permute.xlu0 %1954 }
 0x7bf   :  { %2086 = vst.msk [vmem:[#allocation4 + $0x24] sm:$0xf] %vm2049_vm14, %v2060_v14  ;;  %v2139_v14 = vld [vmem:[%s4758_s7 + $0x40] sm:$0xff] }
 0x7c0   :  { %1979 = vst.msk [vmem:[#allocation4 + $0x2c] sm:$0xf] %vm1940_vm12, %v1955_v42  ;;  %v3043_v42 = vld [vmem:[%s4758_s7 + $0x30] ss:$8 sps:$4 sm:$0xff]  }
 0x7c2   :  { %v2064_v44 = vpop.permute.xlu0 %2063  ;;  %v1953_v45 = vpop.permute.xlu1 %1952 }
 0x7c3   :  { %2088 = vst.msk [vmem:[#allocation4 + $0x2c] sm:$0xf] %vm2049_vm14, %v2064_v44  ;;  %v2856_v44 = vcombine.high %v2139_v14, %v2139_v14 }
 0x7c4   :  { %1978 = vst.msk [vmem:[#allocation4 + $0x28] sm:$0xf] %vm1940_vm12, %v1953_v45  ;;  %v2855_v45 = vcombine.low %v2139_v14, %v2139_v14 }
 0x7c6   :  { %v2027_v46 = vpop.permute.xlu0 %2026  ;;  %v2062_v47 = vpop.permute.xlu1 %2061 }
 0x7c7   :  { %2052 = vst.msk [vmem:[#allocation4 + $0x8] sm:$0xf] %vm2049_vm14, %v2027_v46  ;;  %2087 = vst.msk [vmem:[#allocation4 + $0x28] sm:$0xf] %vm2049_vm14, %v2062_v47 }
 0x7ca   :  { %v1959_v48 = vpop.permute.xlu0 %1958  ;;  %v2025_v49 = vpop.permute.xlu1 %2024 }
 0x7cb   :  { %1981 = vst.msk [vmem:[#allocation4 + $0x34] sm:$0xf] %vm1940_vm12, %v1959_v48 }
 0x7cc   :  { %2051 = vst.msk [vmem:[#allocation4 + $0x4] sm:$0xf] %vm2049_vm14, %v2025_v49 }
 0x7ce   :  { %v2068_v19 = vpop.permute.xlu0 %2067  ;;  %v1957_v51 = vpop.permute.xlu1 %1956  ;;  %v3020_v63 = vld [vmem:[#allocation4 + $0x28] sm:$0xff]  }
 0x7cf   :  { %2090 = vst.msk [vmem:[#allocation4 + $0x34] sm:$0xf] %vm2049_vm14, %v2068_v19 }
 0x7d0   :  { %1980 = vst.msk [vmem:[#allocation4 + $0x30] sm:$0xf] %vm1940_vm12, %v1957_v51 }
 0x7d2   :  { %v2031_v25 = vpop.permute.xlu0 %2030  ;;  %v2066_v20 = vpop.permute.xlu1 %2065 }
 0x7d3   :  { %2054 = vst.msk [vmem:[#allocation4 + $0x10] sm:$0xf] %vm2049_vm14, %v2031_v25  ;;  %2089 = vst.msk [vmem:[#allocation4 + $0x30] sm:$0xf] %vm2049_vm14, %v2066_v20  ;;  %v3025_v15 = vld [vmem:[#allocation4] sm:$0xff]  }
 0x7d6   :  { %v2029_v52 = vpop.permute.xlu1 %2028  ;;  %v1963_v11 = vpop.permute.xlu0 %1962 }
 0x7d7   :  { %2053 = vst.msk [vmem:[#allocation4 + $0xc] sm:$0xf] %vm2049_vm14, %v2029_v52 }
 0x7d8   :  { %1983 = vst.msk [vmem:[#allocation4 + $0x3c] sm:$0xf] %vm1940_vm12, %v1963_v11 }
 0x7da   :  { %v2072_v17 = vpop.permute.xlu0 %2071  ;;  %v1961_v53 = vpop.permute.xlu1 %1960  ;;  %v3019_v59 = vld [vmem:[#allocation4 + $0x30] sm:$0xff]  }
 0x7db   :  { %2092 = vst.msk [vmem:[#allocation4 + $0x3c] sm:$0xf] %vm2049_vm14, %v2072_v17 }
 0x7dc   :  { %1982 = vst.msk [vmem:[#allocation4 + $0x38] sm:$0xf] %vm1940_vm12, %v1961_v53 }
 0x7de   :  { %v2035_v36 = vpop.permute.xlu0 %2034  ;;  %v2070_v54 = vpop.permute.xlu1 %2069  ;;  %v3024_v5 = vld [vmem:[#allocation4 + $0x8] sm:$0xff]  }
 0x7df   :  { %2056 = vst.msk [vmem:[#allocation4 + $0x18] sm:$0xf] %vm2049_vm14, %v2035_v36  ;;  %2091 = vst.msk [vmem:[#allocation4 + $0x38] sm:$0xf] %vm2049_vm14, %v2070_v54 }
 0x7e2   :  { %v1999_v28 = vpop.permute.xlu0 %1998  ;;  %v2033_v55 = vpop.permute.xlu1 %2032 }
 0x7e3   :  { %2019 = vst.msk [vmem:[#allocation4 + $0x60] sm:$0xf] %vm1940_vm12, %v1999_v28 }
 0x7e4   :  { %2055 = vst.msk [vmem:[#allocation4 + $0x14] sm:$0xf] %vm2049_vm14, %v2033_v55 }
 0x7e6   :  { %v2039_v21 = vpop.permute.xlu0 %2038  ;;  %v2037_v26 = vpop.permute.xlu1 %2036  ;;  %v3018_v57 = vld [vmem:[#allocation4 + $0x38] sm:$0xff]  }
 0x7e7   :  { %2058 = vst.msk [vmem:[#allocation4 + $0x20] sm:$0xf] %vm2049_vm14, %v2039_v21  ;;  %2057 = vst.msk [vmem:[#allocation4 + $0x1c] sm:$0xf] %vm2049_vm14, %v2037_v26  ;;  %2310 = vmatpush1.bf16.msra.mxu0 %v3018_v57 }
 0x7e8   :  { %2311 = vmatprep.subr.bf16.mxu0 %v3096_v2 }
 0x7ea   :  { %v2108_v58 = vpop.permute.xlu0 %2107  ;;  %v2001_v8 = vpop.permute.xlu1 %2000 }
 0x7eb   :  { %2128 = vst.msk [vmem:[#allocation4 + $0x60] sm:$0xf] %vm2049_vm14, %v2108_v58  ;;  %2312 = vmatpush1.bf16.msra.mxu0 %v3019_v59  ;;  %v3023_v7 = vld [vmem:[#allocation4 + $0x10] sm:$0xff]  }
 0x7ec   :  { %2020 = vst.msk [vmem:[#allocation4 + $0x64] sm:$0xf] %vm1940_vm12, %v2001_v8  ;;  %2313 = vmatprep.subr.bf16.mxu0 %v3096_v2 }
 0x7ee   :  { %v1995_v39 = vpop.permute.xlu0 %1994  ;;  %v2110_v62 = vpop.permute.xlu1 %2109  ;;  %v3021_v24 = vld [vmem:[#allocation4 + $0x20] sm:$0xff]   ;;  %v3022_v4 = vld [vmem:[#allocation4 + $0x18] sm:$0xff]  }
 0x7ef   :  { %2017 = vst.msk [vmem:[#allocation4 + $0x58] sm:$0xf] %vm1940_vm12, %v1995_v39  ;;  %2314 = vmatpush1.bf16.msra.mxu0 %v3020_v63 }
 0x7f0   :  { %2129 = vst.msk [vmem:[#allocation4 + $0x64] sm:$0xf] %vm2049_vm14, %v2110_v62  ;;  %2315 = vmatprep.subr.bf16.mxu0 %v3096_v2 }
 0x7f2   :  { %v2104_v32 = vpop.permute.xlu0 %2103  ;;  %v1997_v0 = vpop.permute.xlu1 %1996 }
 0x7f3   :  { %2126 = vst.msk [vmem:[#allocation4 + $0x58] sm:$0xf] %vm2049_vm14, %v2104_v32  ;;  %2316 = vmatpush1.bf16.msra.mxu0 %v3021_v24 }
 0x7f4   :  { %2018 = vst.msk [vmem:[#allocation4 + $0x5c] sm:$0xf] %vm1940_vm12, %v1997_v0  ;;  %2317 = vmatprep.subr.bf16.mxu0 %v3096_v2 }
 0x7f6   :  { %v2003_v31 = vpop.permute.xlu0 %2002  ;;  %v2106_v43 = vpop.permute.xlu1 %2105 }
 0x7f7   :  { %2021 = vst.msk [vmem:[#allocation4 + $0x68] sm:$0xf] %vm1940_vm12, %v2003_v31  ;;  %2318 = vmatpush1.bf16.msra.mxu0 %v3022_v4  ;;  %v3027_v29 = vld [vmem:[#allocation4 + $0x60] sm:$0xff]  }
 0x7f8   :  { %2127 = vst.msk [vmem:[#allocation4 + $0x5c] sm:$0xf] %vm2049_vm14, %v2106_v43  ;;  %2319 = vmatprep.subr.bf16.mxu0 %v3096_v2 }
 0x7fa   :  { %v1991_v3 = vpop.permute.xlu0 %1990  ;;  %v2112_v6 = vpop.permute.xlu1 %2111 }
 0x7fb   :  { %2015 = vst.msk [vmem:[#allocation4 + $0x50] sm:$0xf] %vm1940_vm12, %v1991_v3  ;;  %2320 = vmatpush1.bf16.msra.mxu0 %v3023_v7 }
 0x7fc   :  { %2130 = vst.msk [vmem:[#allocation4 + $0x68] sm:$0xf] %vm2049_vm14, %v2112_v6  ;;  %2321 = vmatprep.subr.bf16.mxu0 %v3096_v2 }
 0x7fe   :  { %v2100_v9 = vpop.permute.xlu0 %2099  ;;  %v1993_v56 = vpop.permute.xlu1 %1992 }
 0x7ff   :  { %2124 = vst.msk [vmem:[#allocation4 + $0x50] sm:$0xf] %vm2049_vm14, %v2100_v9  ;;  %2322 = vmatpush1.bf16.msra.mxu0 %v3024_v5  ;;  %v3028_v12 = vld [vmem:[#allocation4 + $0x58] sm:$0xff]  }
 0x800   :  { %2016 = vst.msk [vmem:[#allocation4 + $0x54] sm:$0xf] %vm1940_vm12, %v1993_v56  ;;  %2323 = vmatprep.subr.bf16.mxu0 %v3096_v2 }
 0x802   :  { %v1987_v13 = vpop.permute.xlu0 %1986  ;;  %v2102_v50 = vpop.permute.xlu1 %2101 }
 0x803   :  { %2013 = vst.msk [vmem:[#allocation4 + $0x48] sm:$0xf] %vm1940_vm12, %v1987_v13  ;;  %v3026_v18 = vld [vmem:[#allocation4 + $0x68] ss:$0 sps:$4 sm:$0xff]   ;;  %2324 = vmatpush1.bf16.msra.mxu0 %v3025_v15 }
 0x804   :  { %2125 = vst.msk [vmem:[#allocation4 + $0x54] sm:$0xf] %vm2049_vm14, %v2102_v50  ;;  %2329 = vmatprep.subr.bf16.mxu0 %v3096_v2  ;;  %v2307_v23 = vsel %vm601_vm1, %v3026_v18, 0 }
 0x806   :  { %v2096_v22 = vpop.permute.xlu0 %2095  ;;  %v1989_v1 = vpop.permute.xlu1 %1988 }
 0x807   :  { %2122 = vst.msk [vmem:[#allocation4 + $0x48] sm:$0xf] %vm2049_vm14, %v2096_v22  ;;  %2330 = vmatpush2.bf16.msra.mxu0 %v2307_v23 }
 0x808   :  { %2014 = vst.msk [vmem:[#allocation4 + $0x4c] sm:$0xf] %vm1940_vm12, %v1989_v1  ;;  %2331 = vmatprep.subr.bf16.mxu0 %v3096_v2 }
 0x80a   :  { %v1965_v61 = vpop.permute.xlu0 %1964  ;;  %v2098_v27 = vpop.permute.xlu1 %2097 }
 0x80b   :  { %1984 = vst.msk [vmem:[#allocation4 + $0x40] sm:$0xf] %vm1940_vm12, %v1965_v61  ;;  %2332 = vmatpush2.bf16.msra.mxu0 %v3027_v29  ;;  %v3029_v33 = vld [vmem:[#allocation4 + $0x50] sm:$0xff]  }
 0x80c   :  { %2123 = vst.msk [vmem:[#allocation4 + $0x4c] sm:$0xf] %vm2049_vm14, %v2098_v27  ;;  %2333 = vmatprep.subr.bf16.mxu0 %v3096_v2 }
 0x80e   :  { %v2074_v30 = vpop.permute.xlu0 %2073  ;;  %v1967_v16 = vpop.permute.xlu1 %1966 }
 0x80f   :  { %2093 = vst.msk [vmem:[#allocation4 + $0x40] sm:$0xf] %vm2049_vm14, %v2074_v30  ;;  %2334 = vmatpush2.bf16.msra.mxu0 %v3028_v12 }
 0x810   :  { %1985 = vst.msk [vmem:[#allocation4 + $0x44] sm:$0xf] %vm1940_vm12, %v1967_v16  ;;  %2335 = vmatprep.subr.bf16.mxu0 %v3096_v2 }
 0x812   :  { %v2076_v60 = vpop.permute.xlu1 %2075 }
 0x813   :  { %2094 = vst.msk [vmem:[#allocation4 + $0x44] sm:$0xf] %vm2049_vm14, %v2076_v60  ;;  %2336 = vmatpush2.bf16.msra.mxu0 %v3029_v33  ;;  %v3030_v34 = vld [vmem:[#allocation4 + $0x48] sm:$0xff]  }
 0x814   :  { %2337 = vmatprep.subr.bf16.mxu0 %v3096_v2 }
 0x817   :  { %2338 = vmatpush2.bf16.msra.mxu0 %v3030_v34 }
 0x818   :  { %2339 = vmatprep.subr.bf16.mxu0 %v3096_v2  ;;  %v3038_v2 = vld [vmem:[%s4758_s7 + $0x24] ss:$8 sps:$4 sm:$0xff]  }
 0x81a   :  { %v3031_v35 = vld [vmem:[#allocation4 + $0x40] sm:$0xff]  }
 0x81b   :  { %2340 = vmatpush2.bf16.msra.mxu0 %v3031_v35 }
 0x81e   :  { %2342 = vmatmul.mubr.bf16.vlgmr.msra.gmra.mxu0 %v3032_v37 }
 0x81f   :  { %2872 = vmatprep.mubr.msk.bf16.mxu0 %vm2290_vm13, %v3035_v38 }
 0x826   :  { %2350 = vmatmul.mubr.bf16.gmra.mxu0 %v3037_v40 }
 0x827   :  { %2873 = vmatprep.mubr.msk.bf16.mxu0 %vm2290_vm13, %v3038_v2 }
 0x82e   :  { %2358 = vmatmul.mubr.bf16.gmra.mxu0 %v3040_v10 }
 0x82f   :  { %2874 = vmatprep.mubr.msk.bf16.mxu0 %vm2290_vm13, %v3041_v41 }
 0x836   :  { %2366 = vmatmul.mubr.bf16.gmra.mxu0 %v3043_v42 }
 0x837   :  { %2875 = vmatprep.mubr.msk.bf16.mxu0 %vm2290_vm13, %v2856_v44 }
 0x83e   :  { %2374 = vmatmul.mubr.bf16.gmra.mxu0 %v2855_v45 }
 0x8de   :  { %v4535_v46 = vpop.f32.mrf.mxu0 }
 0x8df   :  { %v2418_v47 = vmul.f32 %v4535_v46, %v4535_v46  ;;  %v2382_v48 = vsel %vm2381_vm15, %v4535_v46, 0.0 }
 0x8e0   :  { %2383 = vadd.xlane.f32.xlu0 %v2382_v48  ;;  %v2345_v49 = vpop.f32.mrf.mxu0 }
 0x8e1   :  { %v2427_v25 = vsel %vm2381_vm15, %v2418_v47, 0.0 }
 0x8e2   :  { %v4541_v19 = vpop.f32.mrf.mxu0 }
 0x8e3   :  { %v2419_v51 = vmul.f32 %v4541_v19, %v4541_v19  ;;  %v2385_v20 = vsel %vm2381_vm15, %v4541_v19, 0.0 }
 0x8e4   :  { %2428 = vadd.xlane.f32.xlu0 %v2427_v25  ;;  %2386 = vadd.xlane.f32.xlu1 %v2385_v20  ;;  %v2348_v52 = vpop.f32.mrf.mxu0 }
 0x8e5   :  { %v2430_v53 = vsel %vm2381_vm15, %v2419_v51, 0.0 }
 0x8e6   :  { %v4548_v11 = vpop.f32.mrf.mxu0 }
 0x8e7   :  { %v2420_v17 = vmul.f32 %v4548_v11, %v4548_v11  ;;  %v2388_v36 = vsel %vm2381_vm15, %v4548_v11, 0.0 }
 0x8e8   :  { %2431 = vadd.xlane.f32.xlu1 %v2430_v53  ;;  %2389 = vadd.xlane.f32.xlu0 %v2388_v36  ;;  %v2353_v54 = vpop.f32.mrf.mxu0 }
 0x8e9   :  { %v2433_v21 = vsel %vm2381_vm15, %v2420_v17, 0.0 }
 0x8ea   :  { %v4555_v28 = vpop.f32.mrf.mxu0 }
 0x8eb   :  { %v2421_v55 = vmul.f32 %v4555_v28, %v4555_v28  ;;  %v2391_v59 = vsel %vm2381_vm15, %v4555_v28, 0.0 }
 0x8ec   :  { %2434 = vadd.xlane.f32.xlu0 %v2433_v21  ;;  %v2356_v26 = vpop.f32.mrf.mxu0 }
 0x8ed   :  { %v2436_v57 = vsel %vm2381_vm15, %v2421_v55, 0.0 }
 0x8ee   :  { %2437 = vadd.xlane.f32.xlu1 %v2436_v57  ;;  %v4561_v58 = vpop.f32.mrf.mxu0 }
 0x8ef   :  { %v2422_v8 = vmul.f32 %v4561_v58, %v4561_v58  ;;  %v2394_v62 = vsel %vm2381_vm15, %v4561_v58, 0.0 }
 0x8f0   :  { %2392 = vadd.xlane.f32.xlu0 %v2391_v59  ;;  %v2361_v39 = vpop.f32.mrf.mxu0 }
 0x8f1   :  { %v2439_v0 = vsel %vm2381_vm15, %v2422_v8, 0.0 }
 0x8f2   :  { %2395 = vadd.xlane.f32.xlu1 %v2394_v62  ;;  %v4569_v63 = vpop.f32.mrf.mxu0 }
 0x8f3   :  { %v2423_v32 = vmul.f32 %v4569_v63, %v4569_v63  ;;  %v2397_v3 = vsel %vm2381_vm15, %v4569_v63, 0.0 }
 0x8f4   :  { %2440 = vadd.xlane.f32.xlu0 %v2439_v0  ;;  %v2364_v24 = vpop.f32.mrf.mxu0 }
 0x8f5   :  { %v2442_v31 = vsel %vm2381_vm15, %v2423_v32, 0.0 }
 0x8f6   :  { %2443 = vadd.xlane.f32.xlu1 %v2442_v31  ;;  %v4575_v43 = vpop.f32.mrf.mxu0 }
 0x8f7   :  { %v2424_v4 = vmul.f32 %v4575_v43, %v4575_v43  ;;  %v2400_v7 = vsel %vm2381_vm15, %v4575_v43, 0.0 }
 0x8f8   :  { %2398 = vadd.xlane.f32.xlu0 %v2397_v3  ;;  %v2369_v6 = vpop.f32.mrf.mxu0 }
 0x8f9   :  { %v2445_v56 = vsel %vm2381_vm15, %v2424_v4, 0.0  ;;  %v2490_v6 = vld [vmem:[%s4759_s8] sm:$0xff] }
 0x8fa   :  { %2401 = vadd.xlane.f32.xlu1 %v2400_v7  ;;  %v4583_v9 = vpop.f32.mrf.mxu0 }
 0x8fb   :  { %v2425_v50 = vmul.f32 %v4583_v9, %v4583_v9  ;;  %v2403_v18 = vsel %vm2381_vm15, %v4583_v9, 0.0 }
 0x8fc   :  { %2446 = vadd.xlane.f32.xlu0 %v2445_v56  ;;  %v2372_v5 = vpop.f32.mrf.mxu0 }
 0x8fd   :  { %v2448_v27 = vsel %vm2381_vm15, %v2425_v50, 0.0 }
 0x8fe   :  { %v4586_v13 = vpop.f32.mrf.mxu0 }
 0x8ff   :  { %v2426_v15 = vmul.f32 %v4586_v13, %v4586_v13  ;;  %v2406_v22 = vsel %vm2381_vm15, %v4586_v13, 0.0 }
 0x900   :  { %2404 = vadd.xlane.f32.xlu0 %v2403_v18  ;;  %2407 = vadd.xlane.f32.xlu1 %v2406_v22  ;;  %v2377_v1 = vpop.f32.mrf.mxu0 }
 0x901   :  { %v2451_v61 = vsel %vm2381_vm15, %v2426_v15, 0.0 }
 0x902   :  { %v2378_v23 = vpop.f32.mrf.mxu0 }
 0x903   :  { %v2491_v23 = vld [vmem:[%s4759_s8 + $0x8] sm:$0xff] }
 0x904   :  { %2452 = vadd.xlane.f32.xlu0 %v2451_v61  ;;  %2449 = vadd.xlane.f32.xlu1 %v2448_v27  ;;  %v2379_v29 = vpop.f32.mrf.mxu0 }
 0x969   :  { %v2384_v30 = vpop.xlane.xlu0 %2383 }
 0x96a   :  { %v4598_v16 = vmul.f32 0.125, %v2384_v30  ;;  %v2526_v30 = vld [vmem:[%s4760_s9] sm:$0xff] }
 0x96c   :  { %v2463_v33 = vmul.f32 %v4598_v16, %v4598_v16 }
 0x96d   :  { %v2429_v12 = vpop.xlane.xlu0 %2428  ;;  %v2387_v60 = vpop.xlane.xlu1 %2386 }
 0x96e   :  { %v2454_v34 = vmul.f32 0.125, %v2429_v12  ;;  %v4602_v35 = vmul.f32 0.125, %v2387_v60 }
 0x970   :  { %v2472_v37 = vsub.f32 %v2454_v34, %v2463_v33  ;;  %v2464_v10 = vmul.f32 %v4602_v35, %v4602_v35 }
 0x971   :  { %v2432_v38 = vpop.xlane.xlu1 %2431  ;;  %v2390_v40 = vpop.xlane.xlu0 %2389 }
 0x972   :  { %v2481_v2 = vmax.f32 %v2472_v37, 0.0  ;;  %v2455_v41 = vmul.f32 0.125, %v2432_v38  ;;  %v4606_v14 = vmul.f32 0.125, %v2390_v40 }
 0x974   :  { %v2499_v42 = vadd.f32 1e-05, %v2481_v2  ;;  %v2473_v44 = vsub.f32 %v2455_v41, %v2464_v10  ;;  %v2465_v48 = vmul.f32 %v4606_v14, %v4606_v14  ;;  %v2527_v10 = vld [vmem:[%s4760_s9 + $0x8] sm:$0xff] }
 0x975   :  { %v2435_v45 = vpop.xlane.xlu0 %2434 }
 0x976   :  { %3078 = vrsqrt.f32 %v2499_v42  ;;  %v2482_v47 = vmax.f32 %v2473_v44, 0.0  ;;  %v2456_v49 = vmul.f32 0.125, %v2435_v45 }
 0x977   :  { %v2438_v51 = vpop.xlane.xlu1 %2437 }
 0x978   :  { %v2500_v25 = vadd.f32 1e-05, %v2482_v47  ;;  %v2474_v20 = vsub.f32 %v2456_v49, %v2465_v48  ;;  %v2457_v55 = vmul.f32 0.125, %v2438_v51 }
 0x979   :  { %v2393_v52 = vpop.xlane.xlu0 %2392 }
 0x97a   :  { %3080 = vrsqrt.f32 %v2500_v25  ;;  %v2483_v17 = vmax.f32 %v2474_v20, 0.0  ;;  %v4610_v53 = vmul.f32 0.125, %v2393_v52 }
 0x97b   :  { %v2396_v36 = vpop.xlane.xlu1 %2395 }
 0x97c   :  { %v2501_v54 = vadd.f32 1e-05, %v2483_v17  ;;  %v2466_v21 = vmul.f32 %v4610_v53, %v4610_v53  ;;  %v4614_v26 = vmul.f32 0.125, %v2396_v36 }
 0x97d   :  { %v2441_v57 = vpop.xlane.xlu0 %2440 }
 0x97e   :  { %3082 = vrsqrt.f32 %v2501_v54  ;;  %v2475_v8 = vsub.f32 %v2457_v55, %v2466_v21  ;;  %v2467_v59 = vmul.f32 %v4614_v26, %v4614_v26  ;;  %v2458_v39 = vmul.f32 0.125, %v2441_v57  ;;  %v2493_v21 = vld [vmem:[%s4759_s8 + $0x18] sm:$0xff] }
 0x97f   :  { %v2444_v62 = vpop.xlane.xlu1 %2443 }
 0x980   :  { %v2484_v32 = vmax.f32 %v2475_v8, 0.0  ;;  %v2476_v0 = vsub.f32 %v2458_v39, %v2467_v59  ;;  %v2459_v56 = vmul.f32 0.125, %v2444_v62  ;;  %v2494_v59 = vld [vmem:[%s4759_s8 + $0x20] sm:$0xff] }
 0x981   :  { %v2399_v24 = vpop.xlane.xlu0 %2398 }
 0x982   :  { %v2502_v31 = vadd.f32 1e-05, %v2484_v32  ;;  %v2485_v4 = vmax.f32 %v2476_v0, 0.0  ;;  %v4618_v3 = vmul.f32 0.125, %v2399_v24 }
 0x983   :  { %v3079_v7 = vpop.eup %3078  ;;  %v2402_v5 = vpop.xlane.xlu1 %2401 }
 0x984   :  { %3084 = vrsqrt.f32 %v2502_v31  ;;  %v2503_v50 = vadd.f32 1e-05, %v2485_v4  ;;  %v2468_v15 = vmul.f32 %v4618_v3, %v4618_v3  ;;  %v4625_v18 = vmul.f32 0.125, %v2402_v5  ;;  %v2528_v31 = vld [vmem:[%s4760_s9 + $0x10] sm:$0xff]  ;;  %v2529_v5 = vld [vmem:[%s4760_s9 + $0x18] sm:$0xff] }
 0x985   :  { %v2447_v22 = vpop.xlane.xlu0 %2446  ;;  %v2517_v1 = vmul.f32 %v3079_v7, %v2490_v6 }
 0x986   :  { %3086 = vrsqrt.f32 %v2503_v50  ;;  %v2477_v61 = vsub.f32 %v2459_v56, %v2468_v15  ;;  %v2469_v27 = vmul.f32 %v4625_v18, %v4625_v18  ;;  %v2460_v29 = vmul.f32 0.125, %v2447_v22 }
 0x987   :  { %v3081_v12 = vpop.eup %3080  ;;  %2555 = vperm.xlu1 %2948, %v2517_v1   ;;  %v2535_v60 = vmul.f32 %v2517_v1, %v4598_v16  ;;  %v2492_v16 = vld [vmem:[%s4759_s8 + $0x10] sm:$0xff] }
 0x988   :  { %v2486_v33 = vmax.f32 %v2477_v61, 0.0  ;;  %v2478_v34 = vsub.f32 %v2460_v29, %v2469_v27  ;;  %v2518_v37 = vmul.f32 %v3081_v12, %v2491_v23  ;;  %v2530_v27 = vld [vmem:[%s4760_s9 + $0x20] sm:$0xff]  ;;  %v2531_v12 = vld [vmem:[%s4760_s9 + $0x28] sm:$0xff] }
 0x989   :  { %v2405_v38 = vpop.xlane.xlu0 %2404  ;;  %v2408_v40 = vpop.xlane.xlu1 %2407  ;;  %v2544_v2 = vsub.f32 %v2526_v30, %v2535_v60 }
 0x98a   :  { %v2504_v41 = vadd.f32 1e-05, %v2486_v33  ;;  %v2487_v42 = vmax.f32 %v2478_v34, 0.0  ;;  %v4639_v44 = vmul.f32 0.125, %v2405_v38  ;;  %v4641_v45 = vmul.f32 0.125, %v2408_v40  ;;  %2560 = vperm.xlu0 %2947, %v2518_v37   ;;  %v2497_v34 = vld [vmem:[%s4759_s8 + $0x38] sm:$0xff] }
 0x98b   :  { %v3083_v47 = vpop.eup %3082  ;;  %2609 = vperm.xlu1 %2948, %v2544_v2   ;;  %v2536_v48 = vmul.f32 %v2518_v37, %v4602_v35 }
 0x98c   :  { %3088 = vrsqrt.f32 %v2504_v41  ;;  %v2505_v49 = vadd.f32 1e-05, %v2487_v42  ;;  %v2470_v51 = vmul.f32 %v4639_v44, %v4639_v44  ;;  %v2519_v17 = vmul.f32 %v3083_v47, %v2492_v16  ;;  %v2533_v41 = vld [vmem:[%s4760_s9 + $0x38] sm:$0xff] }
 0x98d   :  { %v2453_v25 = vpop.xlane.xlu0 %2452  ;;  %v2450_v20 = vpop.xlane.xlu1 %2449  ;;  %v2545_v52 = vsub.f32 %v2527_v10, %v2536_v48  ;;  %v2471_v36 = vmul.f32 %v4641_v45, %v4641_v45  ;;  %v2532_v10 = vld [vmem:[%s4760_s9 + $0x30] sm:$0xff] }
 0x98e   :  { %3090 = vrsqrt.f32 %v2505_v49  ;;  %v2462_v54 = vmul.f32 0.125, %v2453_v25  ;;  %v2461_v55 = vmul.f32 0.125, %v2450_v20  ;;  %v2537_v0 = vmul.f32 %v2519_v17, %v4606_v14  ;;  %v2495_v14 = vld [vmem:[%s4759_s8 + $0x28] sm:$0xff] }
 0x98f   :  { %2614 = vperm.xlu0 %2947, %v2545_v52   ;;  %2565 = vperm.xlu1 %2948, %v2519_v17  }
 0x990   :  { %v2480_v35 = vsub.f32 %v2462_v54, %v2471_v36  ;;  %v2479_v57 = vsub.f32 %v2461_v55, %v2470_v51  ;;  %v2546_v50 = vsub.f32 %v2528_v31, %v2537_v0 }
 0x991   :  { %v3085_v8 = vpop.eup %3084 }
 0x992   :  { %v2520_v39 = vmul.f32 %v3085_v8, %v2493_v21  ;;  %v2489_v62 = vmax.f32 %v2480_v35, 0.0  ;;  %v2488_v32 = vmax.f32 %v2479_v57, 0.0 }
 0x993   :  { %v3087_v24 = vpop.eup %3086 }
 0x994   :  { %v2538_v4 = vmul.f32 %v2520_v39, %v4610_v53  ;;  %v2507_v6 = vadd.f32 1e-05, %v2489_v62  ;;  %v2506_v7 = vadd.f32 1e-05, %v2488_v32  ;;  %2570 = vperm.xlu1 %2948, %v2520_v39   ;;  %v2521_v56 = vmul.f32 %v3087_v24, %v2494_v59  ;;  %v2496_v53 = vld [vmem:[%s4759_s8 + $0x30] sm:$0xff] }
 0x996   :  { %3092 = vrsqrt.f32 %v2507_v6  ;;  %2575 = vperm.xlu0 %2947, %v2521_v56   ;;  %v2547_v15 = vsub.f32 %v2529_v5, %v2538_v4  ;;  %v2539_v23 = vmul.f32 %v2521_v56, %v4614_v26  ;;  %v2498_v26 = vld [vmem:[%s4759_s8 + $0x40] sm:$0xff] }
 0x997   :  { %3094 = vrsqrt.f32 %v2506_v7 }
 0x998   :  { %2619 = vperm.xlu1 %2948, %v2546_v50   ;;  %v2548_v60 = vsub.f32 %v2530_v27, %v2539_v23 }
 0x999   :  { %v3089_v22 = vpop.eup %3088 }
 0x99a   :  { %v2522_v1 = vmul.f32 %v3089_v22, %v2495_v14  ;;  %2624 = vperm.xlu0 %2947, %v2547_v15  }
 0x99b   :  { %v3091_v61 = vpop.eup %3090 }
 0x99c   :  { %v2540_v29 = vmul.f32 %v2522_v1, %v4618_v3  ;;  %2580 = vperm.xlu1 %2948, %v2522_v1   ;;  %v2523_v30 = vmul.f32 %v3091_v61, %v2496_v53 }
 0x99e   :  { %2585 = vperm.xlu0 %2947, %v2523_v30   ;;  %v2549_v33 = vsub.f32 %v2531_v12, %v2540_v29  ;;  %v2541_v2 = vmul.f32 %v2523_v30, %v4625_v18  ;;  %v2534_v18 = vld [vmem:[%s4760_s9 + $0x40] sm:$0xff] }
 0x9a0   :  { %2629 = vperm.xlu1 %2948, %v2548_v60   ;;  %v2550_v16 = vsub.f32 %v2532_v10, %v2541_v2 }
 0x9a2   :  { %2634 = vperm.xlu0 %2947, %v2549_v33  }
 0x9a3   :  { %v3093_v3 = vpop.eup %3092 }
 0x9a4   :  { %v3095_v37 = vpop.eup %3094  ;;  %v2525_v38 = vmul.f32 %v3093_v3, %v2498_v26 }
 0x9a5   :  { %v2524_v40 = vmul.f32 %v3095_v37, %v2497_v34 }
 0x9a6   :  { %2595 = vperm.xlu0 %2947, %v2525_v38   ;;  %v2543_v48 = vmul.f32 %v2525_v38, %v4641_v45 }
 0x9a7   :  { %2590 = vperm.xlu1 %2948, %v2524_v40   ;;  %v2542_v42 = vmul.f32 %v2524_v40, %v4639_v44 }
 0x9a8   :  { %v2552_v49 = vsub.f32 %v2534_v18, %v2543_v48 }
 0x9a9   :  { %v2551_v47 = vsub.f32 %v2533_v41, %v2542_v42 }
 0x9ab   :  { %2639 = vperm.xlu1 %2948, %v2550_v16   ;;  %2644 = vperm.xlu0 %2947, %v2551_v47  }
 0x9af   :  { %2649 = vperm.xlu1 %2948, %v2552_v49  }
 0xa02   :  { %v2556_v51 = vpop.permute.xlu1 %2555 }
 0xa03   :  { %v2598_v25 = vmul.f32 %v2556_v51, %v4535_v46 }
 0xa05   :  { %v2561_v20 = vpop.permute.xlu0 %2560 }
 0xa06   :  { %v2610_v52 = vpop.permute.xlu1 %2609  ;;  %v2599_v44 = vmul.f32 %v2561_v20, %v4541_v19 }
 0xa07   :  { %v2652_v17 = vadd.f32 %v2610_v52, %v2598_v25 }
 0xa09   :  { %2670 = vrot.lane.b32.xlu0 %v2652_v17, %s3122_s6 }
 0xa0a   :  { %v2615_v45 = vpop.permute.xlu0 %2614  ;;  %v2566_v54 = vpop.permute.xlu1 %2565 }
 0xa0b   :  { %v2653_v36 = vadd.f32 %v2615_v45, %v2599_v44  ;;  %v2600_v35 = vmul.f32 %v2566_v54, %v4548_v11 }
 0xa0d   :  { %2672 = vrot.lane.b32.xlu1 %v2653_v36, %s3122_s6 }
 0xa0f   :  { %v2571_v55 = vpop.permute.xlu1 %2570 }
 0xa10   :  { %v2601_v46 = vmul.f32 %v2571_v55, %v4555_v28 }
 0xa11   :  { %v2576_v21 = vpop.permute.xlu0 %2575 }
 0xa12   :  { %v2602_v32 = vmul.f32 %v2576_v21, %v4561_v58 }
 0xa13   :  { %v2620_v57 = vpop.permute.xlu1 %2619 }
 0xa14   :  { %v2654_v8 = vadd.f32 %v2620_v57, %v2600_v35 }
 0xa15   :  { %v2625_v59 = vpop.permute.xlu0 %2624 }
 0xa16   :  { %v2655_v39 = vadd.f32 %v2625_v59, %v2601_v46  ;;  %2674 = vrot.lane.b32.xlu0 %v2654_v8, %s3122_s6 }
 0xa17   :  { %v2581_v19 = vpop.permute.xlu1 %2580 }
 0xa18   :  { %2676 = vrot.lane.b32.xlu1 %v2655_v39, %s3122_s6  ;;  %v2603_v24 = vmul.f32 %v2581_v19, %v4569_v63 }
 0xa19   :  { %v2586_v62 = vpop.permute.xlu0 %2585 }
 0xa1a   :  { %v2604_v7 = vmul.f32 %v2586_v62, %v4575_v43 }
 0xa1b   :  { %v2630_v0 = vpop.permute.xlu1 %2629 }
 0xa1c   :  { %v2656_v31 = vadd.f32 %v2630_v0, %v2602_v32 }
 0xa1d   :  { %v2635_v4 = vpop.permute.xlu0 %2634 }
 0xa1e   :  { %v2657_v11 = vadd.f32 %v2635_v4, %v2603_v24  ;;  %2678 = vrot.lane.b32.xlu0 %v2656_v31, %s3122_s6 }
 0xa20   :  { %2680 = vrot.lane.b32.xlu1 %v2657_v11, %s3122_s6 }
 0xa21   :  { %v2596_v28 = vpop.permute.xlu0 %2595 }
 0xa22   :  { %v2591_v6 = vpop.permute.xlu1 %2590  ;;  %v2606_v15 = vmul.f32 %v2596_v28, %v4586_v13 }
 0xa23   :  { %v2605_v56 = vmul.f32 %v2591_v6, %v4583_v9 }
 0xa26   :  { %v2645_v5 = vpop.permute.xlu0 %2644  ;;  %v2640_v50 = vpop.permute.xlu1 %2639 }
 0xa27   :  { %v2659_v14 = vadd.f32 %v2645_v5, %v2605_v56  ;;  %v2658_v58 = vadd.f32 %v2640_v50, %v2604_v7 }
 0xa29   :  { %2684 = vrot.lane.b32.xlu1 %v2659_v14, %s3122_s6  ;;  %2682 = vrot.lane.b32.xlu0 %v2658_v58, %s3122_s6 }
 0xa2a   :  { %v2650_v63 = vpop.permute.xlu1 %2649 }
 0xa2b   :  { %v2660_v22 = vadd.f32 %v2650_v63, %v2606_v15 }
 0xa2d   :  { %2686 = vrot.lane.b32.xlu0 %v2660_v22, %s3122_s6 }
 0xa7b   :  { %v2671_v53 = vpop.permute.xlu0 %2670 }
 0xa7c   :  { %v2697_v1 = vmax.f32 %v2652_v17, %v2671_v53 }
 0xa7e   :  { %v2706_v43 = vmax.f32 %v2697_v1, 0.0 }
 0xa7f   :  { %v2673_v23 = vpop.permute.xlu1 %2672 }
 0xa80   :  { %2716 = vst.msk [vmem:[%s4761_s10] sm:$0xff] %vm2715_vm0, %v2706_v43  ;;  %v2698_v9 = vmax.f32 %v2653_v36, %v2673_v23 }
 0xa82   :  { %v2707_v13 = vmax.f32 %v2698_v9, 0.0 }
 0xa84   :  { %2717 = vst.msk [vmem:[%s4761_s10 + $0x8] sm:$0xff] %vm2715_vm0, %v2707_v13 }
 0xa88   :  { %v2675_v61 = vpop.permute.xlu0 %2674 }
 0xa89   :  { %v2699_v27 = vmax.f32 %v2654_v8, %v2675_v61 }
 0xa8a   :  { %v2677_v29 = vpop.permute.xlu1 %2676 }
 0xa8b   :  { %v2708_v30 = vmax.f32 %v2699_v27, 0.0  ;;  %v2700_v12 = vmax.f32 %v2655_v39, %v2677_v29 }
 0xa8d   :  { %2718 = vst.msk [vmem:[%s4761_s10 + $0x10] sm:$0xff] %vm2715_vm0, %v2708_v30  ;;  %v2709_v60 = vmax.f32 %v2700_v12, 0.0 }
 0xa8f   :  { %2719 = vst.msk [vmem:[%s4761_s10 + $0x18] sm:$0xff] %vm2715_vm0, %v2709_v60 }
 0xa90   :  { %v2679_v33 = vpop.permute.xlu0 %2678 }
 0xa91   :  { %v2701_v26 = vmax.f32 %v2656_v31, %v2679_v33 }
 0xa92   :  { %v2681_v34 = vpop.permute.xlu1 %2680 }
 0xa93   :  { %v2710_v3 = vmax.f32 %v2701_v26, 0.0  ;;  %v2702_v37 = vmax.f32 %v2657_v11, %v2681_v34 }
 0xa95   :  { %2720 = vst.msk [vmem:[%s4761_s10 + $0x20] sm:$0xff] %vm2715_vm0, %v2710_v3  ;;  %v2711_v38 = vmax.f32 %v2702_v37, 0.0 }
 0xa97   :  { %2721 = vst.msk [vmem:[%s4761_s10 + $0x28] sm:$0xff] %vm2715_vm0, %v2711_v38 }
 0xa9b   :  { %v2683_v40 = vpop.permute.xlu0 %2682  ;;  %v2685_v2 = vpop.permute.xlu1 %2684 }
 0xa9c   :  { %v2703_v10 = vmax.f32 %v2658_v58, %v2683_v40  ;;  %v2704_v41 = vmax.f32 %v2659_v14, %v2685_v2 }
 0xa9e   :  { %v2712_v42 = vmax.f32 %v2703_v10, 0.0  ;;  %v2713_v16 = vmax.f32 %v2704_v41, 0.0 }
 0xa9f   :  { %v2687_v47 = vpop.permute.xlu0 %2686 }
 0xaa0   :  { %2722 = vst.msk [vmem:[%s4761_s10 + $0x30] sm:$0xff] %vm2715_vm0, %v2712_v42  ;;  %2723 = vst.msk [vmem:[%s4761_s10 + $0x38] sm:$0xff] %vm2715_vm0, %v2713_v16  ;;  %v2705_v48 = vmax.f32 %v2660_v22, %v2687_v47 }
 0xaa2   :  { %v2714_v18 = vmax.f32 %v2705_v48, 0.0 }
 0xaa4   :  { %2724 = vst.msk [vmem:[%s4761_s10 + $0x40] sm:$0xff] %vm2715_vm0, %v2714_v18 }

</bundles_post_ra>
